<compile_context>
chip_gen: v6e
topology: v6e:2x2x1
jax: 0.10.0
libtpu: 0.0.40
codegen_flags: <defaults>
</compile_context>

<pallas_src>
import functools
import math

import jax
import jax.numpy as jnp
from jax.experimental import pallas as pl
from jax.experimental.pallas import tpu as pltpu


def _round_up(x, m):
    return ((x + m - 1) // m) * m


def _pick_out_tile(out_features, block_out):
    """Pick a lane-dense output tile TO (multiple of 128, >=256 when possible)
    and the padded out dimension (a multiple of TO, minimal padding)."""
    out_128 = _round_up(out_features, 128)
    max_to = min(_round_up(block_out, 128), out_128)
    min_to = min(256, max_to)
    best_to, best_pad = max_to, _round_up(out_features, max_to)
    for cand in range(max_to - 128, min_to - 1, -128):
        padded = _round_up(out_features, cand)
        if padded < best_pad:
            best_to, best_pad = cand, padded
    return best_to, best_pad


# ----------------------------- Pallas kernel -----------------------------
def kan_linear_kernel(x_ref, grid_ref, inv_a_ref, inv_b_ref, w_ref, out_ref,
                      lhs_ref, *, spline_order):
    # x_ref:     (TB, in)          batch tile (f32), constant across j
    # grid_ref:  (G, in)           knots, G = grid_size + 2*spline_order + 1
    # inv_a_ref: (order*G, in)     row (k-1)*G + j : 1/(g[j+k]   - g[j])
    # inv_b_ref: (order*G, in)     row (k-1)*G + j : 1/(g[j+k+1] - g[j+1])
    # w_ref:     (fused_k, TO)     fused [W_base^T ; W_0 ; ... ; W_{K-1}] tile
    # out_ref:   (TB, TO)
    # lhs_ref:   (TB, fused_k)     VMEM scratch, cached across the j grid axis
    in_features = x_ref.shape[1]

    # Build the fused lhs only once per batch tile (j == 0), reuse for all j.
    @pl.when(pl.program_id(1) == 0)
    def _build_lhs():
        x = x_ref[...].astype(jnp.float32)                   # (TB, in)
        g_all = grid_ref[...]                                # (G, in)
        ia_all = inv_a_ref[...]                              # (order*G, in)
        ib_all = inv_b_ref[...]
        G = g_all.shape[0]

        # hoisted knot differences, reused across all recursion levels
        dx = [x - g_all[j:j + 1, :] for j in range(G)]       # each (TB, in)
        ge = [dx[j] >= 0.0 for j in range(G)]                # x >= g[j]

        # order-0 indicator bases: (x >= g[j]) & (x < g[j+1])
        bases = [
            jnp.logical_and(ge[j], jnp.logical_not(ge[j + 1])).astype(jnp.float32)
            for j in range(G - 1)
        ]

        # Cox-de Boor recursion, updated in place: bases[j] is consumed before
        # being overwritten and bases[j+1] still holds the previous-level value.
        for k in range(1, spline_order + 1):
            for j in range(G - 1 - k):
                ia = ia_all[(k - 1) * G + j:(k - 1) * G + j + 1, :]   # (1, in)
                ib = ib_all[(k - 1) * G + j:(k - 1) * G + j + 1, :]   # (1, in)
                bases[j] = ((dx[j] * ia) * bases[j]
                            + (-dx[j + k + 1] * ib) * bases[j + 1])
        K = G - 1 - spline_order                             # grid_size + order

        # slice-write straight into the scratch (no concatenate)
        lhs_ref[:, pl.ds(0, in_features)] = jax.nn.silu(x).astype(lhs_ref.dtype)
        for m in range(K):
            lhs_ref[:, pl.ds((m + 1) * in_features, in_features)] = (
                bases[m].astype(lhs_ref.dtype))

    # single fused MXU matmul per (i, j) grid step
    out_ref[...] = jnp.dot(lhs_ref[...], w_ref[...],
                           preferred_element_type=jnp.float32
                           ).astype(out_ref.dtype)


# ------------------------- parameter preparation -------------------------
def prepare_kan_params(grid, base_weight, spline_weight, spline_scaler, *,
                       spline_order, compute_dtype=jnp.float32, block_out=512):
    """Fold / relayout parameters once. Cache the result outside the hot path.

    grid:          (in, G)            G = grid_size + 2*spline_order + 1
    base_weight:   (out, in)
    spline_weight: (out, in, K)       K = grid_size + spline_order
    spline_scaler: (out, in)
    """
    out_features, in_features, K = spline_weight.shape
    grid_t = jnp.asarray(grid, jnp.float32).T                # (G, in)
    G = grid_t.shape[0]

    # precomputed Cox-de Boor reciprocals (knot spacings are grid constants)
    inv_a = jnp.ones((spline_order, G, in_features), jnp.float32)
    inv_b = jnp.ones((spline_order, G, in_features), jnp.float32)
    for k in range(1, spline_order + 1):
        n = G - k - 1                                        # number of valid j
        da = grid_t[k:k + n, :] - grid_t[0:n, :]             # g[j+k]   - g[j]
        db = grid_t[k + 1:k + 1 + n, :] - grid_t[1:1 + n, :] # g[j+k+1] - g[j+1]
        inv_a = inv_a.at[k - 1, :n, :].set(1.0 / da)
        inv_b = inv_b.at[k - 1, :n, :].set(1.0 / db)
    inv_a = inv_a.reshape(spline_order * G, in_features)     # 2-D for safe slicing
    inv_b = inv_b.reshape(spline_order * G, in_features)

    # fused weight: rows = [W_base^T ; W_0 ; ... ; W_{K-1}], each block (in, out)
    scaled = spline_weight * spline_scaler[..., None]        # (out, in, K)
    spline_rows = jnp.transpose(scaled, (2, 1, 0)).reshape(K * in_features,
                                                           out_features)
    w_fused = jnp.concatenate(
        [base_weight.T.astype(jnp.float32), spline_rows.astype(jnp.float32)],
        axis=0)                                              # ((1+K)*in, out)

    # pick the output tile first, then pad out_features to a multiple of it
    out_tile, out_p = _pick_out_tile(out_features, block_out)
    if out_p != out_features:
        w_fused = jnp.pad(w_fused, ((0, 0), (0, out_p - out_features)))
    w_fused = w_fused.astype(compute_dtype)

    return dict(grid_t=grid_t, inv_a=inv_a, inv_b=inv_b, w_fused=w_fused,
                in_features=in_features, out_features=out_features,
                out_padded=out_p, out_tile=out_tile,
                spline_order=spline_order, compute_dtype=compute_dtype)


# ------------------------------- forward ---------------------------------
def kan_linear_forward(x, params, *, block_b=256, out_dtype=jnp.float32):
    """Pallas KANLinear forward. x: (..., in_features) -> (..., out_features)."""
    in_features = params["in_features"]
    out_features = params["out_features"]
    out_p = params["out_padded"]
    to = params["out_tile"]
    spline_order = params["spline_order"]
    compute_dtype = params["compute_dtype"]
    grid_t = params["grid_t"]
    inv_a = params["inv_a"]
    inv_b = params["inv_b"]
    w_fused = params["w_fused"]

    orig_shape = x.shape
    xf = x.reshape(-1, in_features).astype(jnp.float32)
    B = xf.shape[0]

    cbytes = jnp.dtype(compute_dtype).itemsize
    # batch tile: multiple of 8 (16 for bf16 sublane packing); pad, don't assert
    sub = 8 * max(1, 4 // cbytes)
    bb = min(_round_up(block_b, sub), _round_up(B, sub))
    Bp = _round_up(B, bb)
    if Bp != B:
        xf = jnp.pad(xf, ((0, Bp - B), (0, 0)))

    G = grid_t.shape[0]
    fused_k = w_fused.shape[0]

    # scoped-VMEM budget with headroom (raise v5e's 16 MiB default, stay inside
    # v7x's 64 MiB physical VMEM)
    vmem_est = (2 * fused_k * to * cbytes              # double-buffered weight tile
                + bb * fused_k * cbytes                # cached lhs scratch
                + 2 * bb * in_features * 4             # x tile
                + 2 * bb * to * 4                      # out tile
                + (2 * G + 6) * bb * in_features * 4   # basis working set
                + (2 * spline_order + 1) * G * in_features * 4)
    vmem_limit = int(min(max(1.5 * vmem_est + (4 << 20), 32 << 20), 64 << 20))

    cost = pl.CostEstimate(
        flops=int(2 * Bp * fused_k * out_p),
        transcendentals=int(Bp * in_features),
        bytes_accessed=int(Bp * in_features * 4
                           + (Bp // bb) * fused_k * out_p * cbytes
                           + Bp * out_p * jnp.dtype(out_dtype).itemsize))

    kernel = functools.partial(kan_linear_kernel, spline_order=spline_order)
    out = pl.pallas_call(
        kernel,
        out_shape=jax.ShapeDtypeStruct((Bp, out_p), out_dtype),
        grid_spec=pltpu.PrefetchScalarGridSpec(
            num_scalar_prefetch=0,
            grid=(Bp // bb, out_p // to),
            in_specs=[
                pl.BlockSpec((bb, in_features), lambda i, j: (i, 0)),
                pl.BlockSpec((G, in_features), lambda i, j: (0, 0)),
                pl.BlockSpec((spline_order * G, in_features), lambda i, j: (0, 0)),
                pl.BlockSpec((spline_order * G, in_features), lambda i, j: (0, 0)),
                pl.BlockSpec((fused_k, to), lambda i, j: (0, j)),
            ],
            out_specs=pl.BlockSpec((bb, to), lambda i, j: (i, j)),
            scratch_shapes=[pltpu.VMEM((bb, fused_k), compute_dtype)],
        ),
        compiler_params=pltpu.CompilerParams(
            dimension_semantics=("parallel", "arbitrary"),
            vmem_limit_bytes=vmem_limit),
        cost_estimate=cost,
    )(xf, grid_t, inv_a, inv_b, w_fused)

    out = out[:B, :out_features]
    return out.reshape(*orig_shape[:-1], out_features)


# --------------------- pure-JAX reference (for checking) ------------------
def kan_linear_reference(x, grid, base_weight, spline_weight, spline_scaler,
                         *, spline_order):
    in_f = x.shape[-1]
    out_f = base_weight.shape[0]
    xf = x.reshape(-1, in_f).astype(jnp.float32)
    base = jax.nn.silu(xf) @ base_weight.T
    xe = xf[:, :, None]
    bases = jnp.logical_and(xe >= grid[:, :-1], xe < grid[:, 1:]).astype(jnp.float32)
    for k in range(1, spline_order + 1):
        bases = ((xe - grid[:, :-(k + 1)]) /
                 (grid[:, k:-1] - grid[:, :-(k + 1)]) * bases[:, :, :-1]
                 + (grid[:, k + 1:] - xe) /
                 (grid[:, k + 1:] - grid[:, 1:-k]) * bases[:, :, 1:])
    scaled = spline_weight * spline_scaler[..., None]
    spline_out = bases.reshape(xf.shape[0], -1) @ scaled.reshape(out_f, -1).T
    return (base + spline_out).reshape(*x.shape[:-1], out_f)


if __name__ == "__main__":
    # Module hyper-parameters (mirrors KANLinear.__init__ defaults).
    in_features = 32
    out_features = 16
    grid_size = 5
    spline_order = 3
    grid_range = (-1.0, 1.0)
    K = grid_size + spline_order                              # 8

    # grid buffer: (in_features, grid_size + 2*spline_order + 1)
    h = (grid_range[1] - grid_range[0]) / grid_size
    grid_1d = (jnp.arange(-spline_order, grid_size + spline_order + 1,
                          dtype=jnp.float32) * h + grid_range[0])
    grid = jnp.broadcast_to(grid_1d, (in_features, grid_1d.shape[0]))

    # Deterministic synthetic parameter init (shapes from __init__).
    key = jax.random.PRNGKey(0)
    k_x, k_bw, k_sw, k_ss = jax.random.split(key, 4)
    a_base = 1.0 / math.sqrt(in_features)
    base_weight = jax.random.uniform(k_bw, (out_features, in_features),
                                     minval=-a_base, maxval=a_base,
                                     dtype=jnp.float32)
    spline_weight = jax.random.uniform(k_sw, (out_features, in_features, K),
                                       minval=-0.1 / grid_size,
                                       maxval=0.1 / grid_size,
                                       dtype=jnp.float32)
    spline_scaler = jax.random.uniform(k_ss, (out_features, in_features),
                                       minval=-a_base, maxval=a_base,
                                       dtype=jnp.float32)

    # Example input: (4, 16, 32) -> flattened batch of 64 rows.
    x = jax.random.uniform(k_x, (4, 16, in_features),
                           minval=-1.0, maxval=1.0, dtype=jnp.float32)
    ref = kan_linear_reference(x, grid, base_weight, spline_weight,
                               spline_scaler, spline_order=spline_order)

    # ---- f32 operands: strict check ----
    params_f32 = prepare_kan_params(grid, base_weight, spline_weight,
                                    spline_scaler, spline_order=spline_order,
                                    compute_dtype=jnp.float32)
    out_f32 = jax.block_until_ready(kan_linear_forward(x, params_f32))
    assert out_f32.shape == (4, 16, out_features)
    assert jnp.allclose(out_f32, ref, atol=1e-4, rtol=1e-4), "f32 mismatch vs reference"

    # ---- bf16 operands (v6e/v7x MXU path) + batch-padding path (B=30) ----
    params_bf16 = prepare_kan_params(grid, base_weight, spline_weight,
                                     spline_scaler, spline_order=spline_order,
                                     compute_dtype=jnp.bfloat16)
    x2 = x[:3, :10, :]
    ref2 = kan_linear_reference(x2, grid, base_weight, spline_weight,
                                spline_scaler, spline_order=spline_order)
    out_bf16 = jax.block_until_ready(kan_linear_forward(x2, params_bf16))
    assert out_bf16.shape == (3, 10, out_features)
    assert jnp.allclose(out_bf16, ref2, atol=3e-2, rtol=3e-2), "bf16 mismatch vs reference"

    print("KERNEL_OK")
</pallas_src>

<mosaic_0001>
module attributes {stable_mosaic.version = 11 : i64} {
  func.func @kan_linear_kernel(%arg0: i32, %arg1: i32, %arg2: memref<64x32xf32, #tpu.memory_space<vmem>>, %arg3: memref<12x32xf32, #tpu.memory_space<vmem>>, %arg4: memref<36x32xf32, #tpu.memory_space<vmem>>, %arg5: memref<36x32xf32, #tpu.memory_space<vmem>>, %arg6: memref<288x128xf32, #tpu.memory_space<vmem>>, %arg7: memref<64x128xf32, #tpu.memory_space<vmem>>, %arg8: memref<64x288xf32, #tpu.memory_space<vmem>>) attributes {dimension_semantics = [#tpu.dimension_semantics<parallel>, #tpu.dimension_semantics<arbitrary>], iteration_bounds = array<i64: 1, 1>, scalar_prefetch = 0 : i64, scratch_operands = 1 : i64, tpu.core_type = #tpu.core_type<tc>, window_params = [{transform_indices = @transform_0, window_bounds = array<i64: 64, 32>}, {pipeline_mode = #tpu.pipeline_mode<synchronous>, transform_indices = @transform_1, window_bounds = array<i64: 12, 32>}, {pipeline_mode = #tpu.pipeline_mode<synchronous>, transform_indices = @transform_2, window_bounds = array<i64: 36, 32>}, {pipeline_mode = #tpu.pipeline_mode<synchronous>, transform_indices = @transform_3, window_bounds = array<i64: 36, 32>}, {transform_indices = @transform_4, window_bounds = array<i64: 288, 128>}, {transform_indices = @transform_5, window_bounds = array<i64: 64, 128>}]} {
    %c0_i32 = arith.constant 0 : i32
    %0 = arith.cmpi eq, %arg1, %c0_i32 : i32
    %1 = arith.extui %0 : i1 to i32
    %c0_i32_0 = arith.constant 0 : i32
    %2 = arith.cmpi ne, %1, %c0_i32_0 : i32
    scf.if %2 {
      %c0_6 = arith.constant 0 : index
      %c0_7 = arith.constant 0 : index
      %7 = vector.load %arg2[%c0_6, %c0_7] : memref<64x32xf32, #tpu.memory_space<vmem>>, vector<64x32xf32>
      %c0_8 = arith.constant 0 : index
      %c0_9 = arith.constant 0 : index
      %8 = vector.load %arg3[%c0_8, %c0_9] : memref<12x32xf32, #tpu.memory_space<vmem>>, vector<12x32xf32>
      %c0_10 = arith.constant 0 : index
      %c0_11 = arith.constant 0 : index
      %9 = vector.load %arg4[%c0_10, %c0_11] : memref<36x32xf32, #tpu.memory_space<vmem>>, vector<36x32xf32>
      %c0_12 = arith.constant 0 : index
      %c0_13 = arith.constant 0 : index
      %10 = vector.load %arg5[%c0_12, %c0_13] : memref<36x32xf32, #tpu.memory_space<vmem>>, vector<36x32xf32>
      %11 = vector.extract_strided_slice %8 {offsets = [0, 0], sizes = [1, 32], strides = [1, 1]} : vector<12x32xf32> to vector<1x32xf32>
      %12 = vector.broadcast %11 : vector<1x32xf32> to vector<64x32xf32>
      %13 = arith.subf %7, %12 : vector<64x32xf32>
      %14 = vector.extract_strided_slice %8 {offsets = [1, 0], sizes = [1, 32], strides = [1, 1]} : vector<12x32xf32> to vector<1x32xf32>
      %15 = vector.broadcast %14 : vector<1x32xf32> to vector<64x32xf32>
      %16 = arith.subf %7, %15 : vector<64x32xf32>
      %17 = vector.extract_strided_slice %8 {offsets = [2, 0], sizes = [1, 32], strides = [1, 1]} : vector<12x32xf32> to vector<1x32xf32>
      %18 = vector.broadcast %17 : vector<1x32xf32> to vector<64x32xf32>
      %19 = arith.subf %7, %18 : vector<64x32xf32>
      %20 = vector.extract_strided_slice %8 {offsets = [3, 0], sizes = [1, 32], strides = [1, 1]} : vector<12x32xf32> to vector<1x32xf32>
      %21 = vector.broadcast %20 : vector<1x32xf32> to vector<64x32xf32>
      %22 = arith.subf %7, %21 : vector<64x32xf32>
      %23 = vector.extract_strided_slice %8 {offsets = [4, 0], sizes = [1, 32], strides = [1, 1]} : vector<12x32xf32> to vector<1x32xf32>
      %24 = vector.broadcast %23 : vector<1x32xf32> to vector<64x32xf32>
      %25 = arith.subf %7, %24 : vector<64x32xf32>
      %26 = vector.extract_strided_slice %8 {offsets = [5, 0], sizes = [1, 32], strides = [1, 1]} : vector<12x32xf32> to vector<1x32xf32>
      %27 = vector.broadcast %26 : vector<1x32xf32> to vector<64x32xf32>
      %28 = arith.subf %7, %27 : vector<64x32xf32>
      %29 = vector.extract_strided_slice %8 {offsets = [6, 0], sizes = [1, 32], strides = [1, 1]} : vector<12x32xf32> to vector<1x32xf32>
      %30 = vector.broadcast %29 : vector<1x32xf32> to vector<64x32xf32>
      %31 = arith.subf %7, %30 : vector<64x32xf32>
      %32 = vector.extract_strided_slice %8 {offsets = [7, 0], sizes = [1, 32], strides = [1, 1]} : vector<12x32xf32> to vector<1x32xf32>
      %33 = vector.broadcast %32 : vector<1x32xf32> to vector<64x32xf32>
      %34 = arith.subf %7, %33 : vector<64x32xf32>
      %35 = vector.extract_strided_slice %8 {offsets = [8, 0], sizes = [1, 32], strides = [1, 1]} : vector<12x32xf32> to vector<1x32xf32>
      %36 = vector.broadcast %35 : vector<1x32xf32> to vector<64x32xf32>
      %37 = arith.subf %7, %36 : vector<64x32xf32>
      %38 = vector.extract_strided_slice %8 {offsets = [9, 0], sizes = [1, 32], strides = [1, 1]} : vector<12x32xf32> to vector<1x32xf32>
      %39 = vector.broadcast %38 : vector<1x32xf32> to vector<64x32xf32>
      %40 = arith.subf %7, %39 : vector<64x32xf32>
      %41 = vector.extract_strided_slice %8 {offsets = [10, 0], sizes = [1, 32], strides = [1, 1]} : vector<12x32xf32> to vector<1x32xf32>
      %42 = vector.broadcast %41 : vector<1x32xf32> to vector<64x32xf32>
      %43 = arith.subf %7, %42 : vector<64x32xf32>
      %44 = vector.extract_strided_slice %8 {offsets = [11, 0], sizes = [1, 32], strides = [1, 1]} : vector<12x32xf32> to vector<1x32xf32>
      %45 = vector.broadcast %44 : vector<1x32xf32> to vector<64x32xf32>
      %46 = arith.subf %7, %45 : vector<64x32xf32>
      %cst_14 = arith.constant 0.000000e+00 : f32
      %47 = vector.broadcast %cst_14 : f32 to vector<64x32xf32>
      %48 = arith.cmpf oge, %13, %47 : vector<64x32xf32>
      %cst_15 = arith.constant 0.000000e+00 : f32
      %49 = vector.broadcast %cst_15 : f32 to vector<64x32xf32>
      %50 = arith.cmpf oge, %16, %49 : vector<64x32xf32>
      %cst_16 = arith.constant 0.000000e+00 : f32
      %51 = vector.broadcast %cst_16 : f32 to vector<64x32xf32>
      %52 = arith.cmpf oge, %19, %51 : vector<64x32xf32>
      %cst_17 = arith.constant 0.000000e+00 : f32
      %53 = vector.broadcast %cst_17 : f32 to vector<64x32xf32>
      %54 = arith.cmpf oge, %22, %53 : vector<64x32xf32>
      %cst_18 = arith.constant 0.000000e+00 : f32
      %55 = vector.broadcast %cst_18 : f32 to vector<64x32xf32>
      %56 = arith.cmpf oge, %25, %55 : vector<64x32xf32>
      %cst_19 = arith.constant 0.000000e+00 : f32
      %57 = vector.broadcast %cst_19 : f32 to vector<64x32xf32>
      %58 = arith.cmpf oge, %28, %57 : vector<64x32xf32>
      %cst_20 = arith.constant 0.000000e+00 : f32
      %59 = vector.broadcast %cst_20 : f32 to vector<64x32xf32>
      %60 = arith.cmpf oge, %31, %59 : vector<64x32xf32>
      %cst_21 = arith.constant 0.000000e+00 : f32
      %61 = vector.broadcast %cst_21 : f32 to vector<64x32xf32>
      %62 = arith.cmpf oge, %34, %61 : vector<64x32xf32>
      %cst_22 = arith.constant 0.000000e+00 : f32
      %63 = vector.broadcast %cst_22 : f32 to vector<64x32xf32>
      %64 = arith.cmpf oge, %37, %63 : vector<64x32xf32>
      %cst_23 = arith.constant 0.000000e+00 : f32
      %65 = vector.broadcast %cst_23 : f32 to vector<64x32xf32>
      %66 = arith.cmpf oge, %40, %65 : vector<64x32xf32>
      %cst_24 = arith.constant 0.000000e+00 : f32
      %67 = vector.broadcast %cst_24 : f32 to vector<64x32xf32>
      %68 = arith.cmpf oge, %43, %67 : vector<64x32xf32>
      %cst_25 = arith.constant 0.000000e+00 : f32
      %69 = vector.broadcast %cst_25 : f32 to vector<64x32xf32>
      %70 = arith.cmpf oge, %46, %69 : vector<64x32xf32>
      %cst_26 = arith.constant dense<true> : vector<64x32xi1>
      %71 = arith.xori %50, %cst_26 : vector<64x32xi1>
      %72 = arith.andi %48, %71 : vector<64x32xi1>
      %73 = arith.extui %72 : vector<64x32xi1> to vector<64x32xi32>
      %74 = arith.sitofp %73 : vector<64x32xi32> to vector<64x32xf32>
      %cst_27 = arith.constant dense<true> : vector<64x32xi1>
      %75 = arith.xori %52, %cst_27 : vector<64x32xi1>
      %76 = arith.andi %50, %75 : vector<64x32xi1>
      %77 = arith.extui %76 : vector<64x32xi1> to vector<64x32xi32>
      %78 = arith.sitofp %77 : vector<64x32xi32> to vector<64x32xf32>
      %cst_28 = arith.constant dense<true> : vector<64x32xi1>
      %79 = arith.xori %54, %cst_28 : vector<64x32xi1>
      %80 = arith.andi %52, %79 : vector<64x32xi1>
      %81 = arith.extui %80 : vector<64x32xi1> to vector<64x32xi32>
      %82 = arith.sitofp %81 : vector<64x32xi32> to vector<64x32xf32>
      %cst_29 = arith.constant dense<true> : vector<64x32xi1>
      %83 = arith.xori %56, %cst_29 : vector<64x32xi1>
      %84 = arith.andi %54, %83 : vector<64x32xi1>
      %85 = arith.extui %84 : vector<64x32xi1> to vector<64x32xi32>
      %86 = arith.sitofp %85 : vector<64x32xi32> to vector<64x32xf32>
      %cst_30 = arith.constant dense<true> : vector<64x32xi1>
      %87 = arith.xori %58, %cst_30 : vector<64x32xi1>
      %88 = arith.andi %56, %87 : vector<64x32xi1>
      %89 = arith.extui %88 : vector<64x32xi1> to vector<64x32xi32>
      %90 = arith.sitofp %89 : vector<64x32xi32> to vector<64x32xf32>
      %cst_31 = arith.constant dense<true> : vector<64x32xi1>
      %91 = arith.xori %60, %cst_31 : vector<64x32xi1>
      %92 = arith.andi %58, %91 : vector<64x32xi1>
      %93 = arith.extui %92 : vector<64x32xi1> to vector<64x32xi32>
      %94 = arith.sitofp %93 : vector<64x32xi32> to vector<64x32xf32>
      %cst_32 = arith.constant dense<true> : vector<64x32xi1>
      %95 = arith.xori %62, %cst_32 : vector<64x32xi1>
      %96 = arith.andi %60, %95 : vector<64x32xi1>
      %97 = arith.extui %96 : vector<64x32xi1> to vector<64x32xi32>
      %98 = arith.sitofp %97 : vector<64x32xi32> to vector<64x32xf32>
      %cst_33 = arith.constant dense<true> : vector<64x32xi1>
      %99 = arith.xori %64, %cst_33 : vector<64x32xi1>
      %100 = arith.andi %62, %99 : vector<64x32xi1>
      %101 = arith.extui %100 : vector<64x32xi1> to vector<64x32xi32>
      %102 = arith.sitofp %101 : vector<64x32xi32> to vector<64x32xf32>
      %cst_34 = arith.constant dense<true> : vector<64x32xi1>
      %103 = arith.xori %66, %cst_34 : vector<64x32xi1>
      %104 = arith.andi %64, %103 : vector<64x32xi1>
      %105 = arith.extui %104 : vector<64x32xi1> to vector<64x32xi32>
      %106 = arith.sitofp %105 : vector<64x32xi32> to vector<64x32xf32>
      %cst_35 = arith.constant dense<true> : vector<64x32xi1>
      %107 = arith.xori %68, %cst_35 : vector<64x32xi1>
      %108 = arith.andi %66, %107 : vector<64x32xi1>
      %109 = arith.extui %108 : vector<64x32xi1> to vector<64x32xi32>
      %110 = arith.sitofp %109 : vector<64x32xi32> to vector<64x32xf32>
      %cst_36 = arith.constant dense<true> : vector<64x32xi1>
      %111 = arith.xori %70, %cst_36 : vector<64x32xi1>
      %112 = arith.andi %68, %111 : vector<64x32xi1>
      %113 = arith.extui %112 : vector<64x32xi1> to vector<64x32xi32>
      %114 = arith.sitofp %113 : vector<64x32xi32> to vector<64x32xf32>
      %115 = vector.extract_strided_slice %9 {offsets = [0, 0], sizes = [1, 32], strides = [1, 1]} : vector<36x32xf32> to vector<1x32xf32>
      %116 = vector.extract_strided_slice %10 {offsets = [0, 0], sizes = [1, 32], strides = [1, 1]} : vector<36x32xf32> to vector<1x32xf32>
      %117 = vector.broadcast %115 : vector<1x32xf32> to vector<64x32xf32>
      %118 = arith.mulf %13, %117 : vector<64x32xf32>
      %119 = arith.mulf %118, %74 : vector<64x32xf32>
      %cst_37 = arith.constant 0.000000e+00 : f32
      %120 = vector.broadcast %cst_37 : f32 to vector<64x32xf32>
      %121 = arith.subf %120, %19 : vector<64x32xf32>
      %122 = vector.broadcast %116 : vector<1x32xf32> to vector<64x32xf32>
      %123 = arith.mulf %121, %122 : vector<64x32xf32>
      %124 = arith.mulf %123, %78 : vector<64x32xf32>
      %125 = arith.addf %119, %124 : vector<64x32xf32>
      %126 = vector.extract_strided_slice %9 {offsets = [1, 0], sizes = [1, 32], strides = [1, 1]} : vector<36x32xf32> to vector<1x32xf32>
      %127 = vector.extract_strided_slice %10 {offsets = [1, 0], sizes = [1, 32], strides = [1, 1]} : vector<36x32xf32> to vector<1x32xf32>
      %128 = vector.broadcast %126 : vector<1x32xf32> to vector<64x32xf32>
      %129 = arith.mulf %16, %128 : vector<64x32xf32>
      %130 = arith.mulf %129, %78 : vector<64x32xf32>
      %cst_38 = arith.constant 0.000000e+00 : f32
      %131 = vector.broadcast %cst_38 : f32 to vector<64x32xf32>
      %132 = arith.subf %131, %22 : vector<64x32xf32>
      %133 = vector.broadcast %127 : vector<1x32xf32> to vector<64x32xf32>
      %134 = arith.mulf %132, %133 : vector<64x32xf32>
      %135 = arith.mulf %134, %82 : vector<64x32xf32>
      %136 = arith.addf %130, %135 : vector<64x32xf32>
      %137 = vector.extract_strided_slice %9 {offsets = [2, 0], sizes = [1, 32], strides = [1, 1]} : vector<36x32xf32> to vector<1x32xf32>
      %138 = vector.extract_strided_slice %10 {offsets = [2, 0], sizes = [1, 32], strides = [1, 1]} : vector<36x32xf32> to vector<1x32xf32>
      %139 = vector.broadcast %137 : vector<1x32xf32> to vector<64x32xf32>
      %140 = arith.mulf %19, %139 : vector<64x32xf32>
      %141 = arith.mulf %140, %82 : vector<64x32xf32>
      %cst_39 = arith.constant 0.000000e+00 : f32
      %142 = vector.broadcast %cst_39 : f32 to vector<64x32xf32>
      %143 = arith.subf %142, %25 : vector<64x32xf32>
      %144 = vector.broadcast %138 : vector<1x32xf32> to vector<64x32xf32>
      %145 = arith.mulf %143, %144 : vector<64x32xf32>
      %146 = arith.mulf %145, %86 : vector<64x32xf32>
      %147 = arith.addf %141, %146 : vector<64x32xf32>
      %148 = vector.extract_strided_slice %9 {offsets = [3, 0], sizes = [1, 32], strides = [1, 1]} : vector<36x32xf32> to vector<1x32xf32>
      %149 = vector.extract_strided_slice %10 {offsets = [3, 0], sizes = [1, 32], strides = [1, 1]} : vector<36x32xf32> to vector<1x32xf32>
      %150 = vector.broadcast %148 : vector<1x32xf32> to vector<64x32xf32>
      %151 = arith.mulf %22, %150 : vector<64x32xf32>
      %152 = arith.mulf %151, %86 : vector<64x32xf32>
      %cst_40 = arith.constant 0.000000e+00 : f32
      %153 = vector.broadcast %cst_40 : f32 to vector<64x32xf32>
      %154 = arith.subf %153, %28 : vector<64x32xf32>
      %155 = vector.broadcast %149 : vector<1x32xf32> to vector<64x32xf32>
      %156 = arith.mulf %154, %155 : vector<64x32xf32>
      %157 = arith.mulf %156, %90 : vector<64x32xf32>
      %158 = arith.addf %152, %157 : vector<64x32xf32>
      %159 = vector.extract_strided_slice %9 {offsets = [4, 0], sizes = [1, 32], strides = [1, 1]} : vector<36x32xf32> to vector<1x32xf32>
      %160 = vector.extract_strided_slice %10 {offsets = [4, 0], sizes = [1, 32], strides = [1, 1]} : vector<36x32xf32> to vector<1x32xf32>
      %161 = vector.broadcast %159 : vector<1x32xf32> to vector<64x32xf32>
      %162 = arith.mulf %25, %161 : vector<64x32xf32>
      %163 = arith.mulf %162, %90 : vector<64x32xf32>
      %cst_41 = arith.constant 0.000000e+00 : f32
      %164 = vector.broadcast %cst_41 : f32 to vector<64x32xf32>
      %165 = arith.subf %164, %31 : vector<64x32xf32>
      %166 = vector.broadcast %160 : vector<1x32xf32> to vector<64x32xf32>
      %167 = arith.mulf %165, %166 : vector<64x32xf32>
      %168 = arith.mulf %167, %94 : vector<64x32xf32>
      %169 = arith.addf %163, %168 : vector<64x32xf32>
      %170 = vector.extract_strided_slice %9 {offsets = [5, 0], sizes = [1, 32], strides = [1, 1]} : vector<36x32xf32> to vector<1x32xf32>
      %171 = vector.extract_strided_slice %10 {offsets = [5, 0], sizes = [1, 32], strides = [1, 1]} : vector<36x32xf32> to vector<1x32xf32>
      %172 = vector.broadcast %170 : vector<1x32xf32> to vector<64x32xf32>
      %173 = arith.mulf %28, %172 : vector<64x32xf32>
      %174 = arith.mulf %173, %94 : vector<64x32xf32>
      %cst_42 = arith.constant 0.000000e+00 : f32
      %175 = vector.broadcast %cst_42 : f32 to vector<64x32xf32>
      %176 = arith.subf %175, %34 : vector<64x32xf32>
      %177 = vector.broadcast %171 : vector<1x32xf32> to vector<64x32xf32>
      %178 = arith.mulf %176, %177 : vector<64x32xf32>
      %179 = arith.mulf %178, %98 : vector<64x32xf32>
      %180 = arith.addf %174, %179 : vector<64x32xf32>
      %181 = vector.extract_strided_slice %9 {offsets = [6, 0], sizes = [1, 32], strides = [1, 1]} : vector<36x32xf32> to vector<1x32xf32>
      %182 = vector.extract_strided_slice %10 {offsets = [6, 0], sizes = [1, 32], strides = [1, 1]} : vector<36x32xf32> to vector<1x32xf32>
      %183 = vector.broadcast %181 : vector<1x32xf32> to vector<64x32xf32>
      %184 = arith.mulf %31, %183 : vector<64x32xf32>
      %185 = arith.mulf %184, %98 : vector<64x32xf32>
      %cst_43 = arith.constant 0.000000e+00 : f32
      %186 = vector.broadcast %cst_43 : f32 to vector<64x32xf32>
      %187 = arith.subf %186, %37 : vector<64x32xf32>
      %188 = vector.broadcast %182 : vector<1x32xf32> to vector<64x32xf32>
      %189 = arith.mulf %187, %188 : vector<64x32xf32>
      %190 = arith.mulf %189, %102 : vector<64x32xf32>
      %191 = arith.addf %185, %190 : vector<64x32xf32>
      %192 = vector.extract_strided_slice %9 {offsets = [7, 0], sizes = [1, 32], strides = [1, 1]} : vector<36x32xf32> to vector<1x32xf32>
      %193 = vector.extract_strided_slice %10 {offsets = [7, 0], sizes = [1, 32], strides = [1, 1]} : vector<36x32xf32> to vector<1x32xf32>
      %194 = vector.broadcast %192 : vector<1x32xf32> to vector<64x32xf32>
      %195 = arith.mulf %34, %194 : vector<64x32xf32>
      %196 = arith.mulf %195, %102 : vector<64x32xf32>
      %cst_44 = arith.constant 0.000000e+00 : f32
      %197 = vector.broadcast %cst_44 : f32 to vector<64x32xf32>
      %198 = arith.subf %197, %40 : vector<64x32xf32>
      %199 = vector.broadcast %193 : vector<1x32xf32> to vector<64x32xf32>
      %200 = arith.mulf %198, %199 : vector<64x32xf32>
      %201 = arith.mulf %200, %106 : vector<64x32xf32>
      %202 = arith.addf %196, %201 : vector<64x32xf32>
      %203 = vector.extract_strided_slice %9 {offsets = [8, 0], sizes = [1, 32], strides = [1, 1]} : vector<36x32xf32> to vector<1x32xf32>
      %204 = vector.extract_strided_slice %10 {offsets = [8, 0], sizes = [1, 32], strides = [1, 1]} : vector<36x32xf32> to vector<1x32xf32>
      %205 = vector.broadcast %203 : vector<1x32xf32> to vector<64x32xf32>
      %206 = arith.mulf %37, %205 : vector<64x32xf32>
      %207 = arith.mulf %206, %106 : vector<64x32xf32>
      %cst_45 = arith.constant 0.000000e+00 : f32
      %208 = vector.broadcast %cst_45 : f32 to vector<64x32xf32>
      %209 = arith.subf %208, %43 : vector<64x32xf32>
      %210 = vector.broadcast %204 : vector<1x32xf32> to vector<64x32xf32>
      %211 = arith.mulf %209, %210 : vector<64x32xf32>
      %212 = arith.mulf %211, %110 : vector<64x32xf32>
      %213 = arith.addf %207, %212 : vector<64x32xf32>
      %214 = vector.extract_strided_slice %9 {offsets = [9, 0], sizes = [1, 32], strides = [1, 1]} : vector<36x32xf32> to vector<1x32xf32>
      %215 = vector.extract_strided_slice %10 {offsets = [9, 0], sizes = [1, 32], strides = [1, 1]} : vector<36x32xf32> to vector<1x32xf32>
      %216 = vector.broadcast %214 : vector<1x32xf32> to vector<64x32xf32>
      %217 = arith.mulf %40, %216 : vector<64x32xf32>
      %218 = arith.mulf %217, %110 : vector<64x32xf32>
      %cst_46 = arith.constant 0.000000e+00 : f32
      %219 = vector.broadcast %cst_46 : f32 to vector<64x32xf32>
      %220 = arith.subf %219, %46 : vector<64x32xf32>
      %221 = vector.broadcast %215 : vector<1x32xf32> to vector<64x32xf32>
      %222 = arith.mulf %220, %221 : vector<64x32xf32>
      %223 = arith.mulf %222, %114 : vector<64x32xf32>
      %224 = arith.addf %218, %223 : vector<64x32xf32>
      %225 = vector.extract_strided_slice %9 {offsets = [12, 0], sizes = [1, 32], strides = [1, 1]} : vector<36x32xf32> to vector<1x32xf32>
      %226 = vector.extract_strided_slice %10 {offsets = [12, 0], sizes = [1, 32], strides = [1, 1]} : vector<36x32xf32> to vector<1x32xf32>
      %227 = vector.broadcast %225 : vector<1x32xf32> to vector<64x32xf32>
      %228 = arith.mulf %13, %227 : vector<64x32xf32>
      %229 = arith.mulf %228, %125 : vector<64x32xf32>
      %cst_47 = arith.constant 0.000000e+00 : f32
      %230 = vector.broadcast %cst_47 : f32 to vector<64x32xf32>
      %231 = arith.subf %230, %22 : vector<64x32xf32>
      %232 = vector.broadcast %226 : vector<1x32xf32> to vector<64x32xf32>
      %233 = arith.mulf %231, %232 : vector<64x32xf32>
      %234 = arith.mulf %233, %136 : vector<64x32xf32>
      %235 = arith.addf %229, %234 : vector<64x32xf32>
      %236 = vector.extract_strided_slice %9 {offsets = [13, 0], sizes = [1, 32], strides = [1, 1]} : vector<36x32xf32> to vector<1x32xf32>
      %237 = vector.extract_strided_slice %10 {offsets = [13, 0], sizes = [1, 32], strides = [1, 1]} : vector<36x32xf32> to vector<1x32xf32>
      %238 = vector.broadcast %236 : vector<1x32xf32> to vector<64x32xf32>
      %239 = arith.mulf %16, %238 : vector<64x32xf32>
      %240 = arith.mulf %239, %136 : vector<64x32xf32>
      %cst_48 = arith.constant 0.000000e+00 : f32
      %241 = vector.broadcast %cst_48 : f32 to vector<64x32xf32>
      %242 = arith.subf %241, %25 : vector<64x32xf32>
      %243 = vector.broadcast %237 : vector<1x32xf32> to vector<64x32xf32>
      %244 = arith.mulf %242, %243 : vector<64x32xf32>
      %245 = arith.mulf %244, %147 : vector<64x32xf32>
      %246 = arith.addf %240, %245 : vector<64x32xf32>
      %247 = vector.extract_strided_slice %9 {offsets = [14, 0], sizes = [1, 32], strides = [1, 1]} : vector<36x32xf32> to vector<1x32xf32>
      %248 = vector.extract_strided_slice %10 {offsets = [14, 0], sizes = [1, 32], strides = [1, 1]} : vector<36x32xf32> to vector<1x32xf32>
      %249 = vector.broadcast %247 : vector<1x32xf32> to vector<64x32xf32>
      %250 = arith.mulf %19, %249 : vector<64x32xf32>
      %251 = arith.mulf %250, %147 : vector<64x32xf32>
      %cst_49 = arith.constant 0.000000e+00 : f32
      %252 = vector.broadcast %cst_49 : f32 to vector<64x32xf32>
      %253 = arith.subf %252, %28 : vector<64x32xf32>
      %254 = vector.broadcast %248 : vector<1x32xf32> to vector<64x32xf32>
      %255 = arith.mulf %253, %254 : vector<64x32xf32>
      %256 = arith.mulf %255, %158 : vector<64x32xf32>
      %257 = arith.addf %251, %256 : vector<64x32xf32>
      %258 = vector.extract_strided_slice %9 {offsets = [15, 0], sizes = [1, 32], strides = [1, 1]} : vector<36x32xf32> to vector<1x32xf32>
      %259 = vector.extract_strided_slice %10 {offsets = [15, 0], sizes = [1, 32], strides = [1, 1]} : vector<36x32xf32> to vector<1x32xf32>
      %260 = vector.broadcast %258 : vector<1x32xf32> to vector<64x32xf32>
      %261 = arith.mulf %22, %260 : vector<64x32xf32>
      %262 = arith.mulf %261, %158 : vector<64x32xf32>
      %cst_50 = arith.constant 0.000000e+00 : f32
      %263 = vector.broadcast %cst_50 : f32 to vector<64x32xf32>
      %264 = arith.subf %263, %31 : vector<64x32xf32>
      %265 = vector.broadcast %259 : vector<1x32xf32> to vector<64x32xf32>
      %266 = arith.mulf %264, %265 : vector<64x32xf32>
      %267 = arith.mulf %266, %169 : vector<64x32xf32>
      %268 = arith.addf %262, %267 : vector<64x32xf32>
      %269 = vector.extract_strided_slice %9 {offsets = [16, 0], sizes = [1, 32], strides = [1, 1]} : vector<36x32xf32> to vector<1x32xf32>
      %270 = vector.extract_strided_slice %10 {offsets = [16, 0], sizes = [1, 32], strides = [1, 1]} : vector<36x32xf32> to vector<1x32xf32>
      %271 = vector.broadcast %269 : vector<1x32xf32> to vector<64x32xf32>
      %272 = arith.mulf %25, %271 : vector<64x32xf32>
      %273 = arith.mulf %272, %169 : vector<64x32xf32>
      %cst_51 = arith.constant 0.000000e+00 : f32
      %274 = vector.broadcast %cst_51 : f32 to vector<64x32xf32>
      %275 = arith.subf %274, %34 : vector<64x32xf32>
      %276 = vector.broadcast %270 : vector<1x32xf32> to vector<64x32xf32>
      %277 = arith.mulf %275, %276 : vector<64x32xf32>
      %278 = arith.mulf %277, %180 : vector<64x32xf32>
      %279 = arith.addf %273, %278 : vector<64x32xf32>
      %280 = vector.extract_strided_slice %9 {offsets = [17, 0], sizes = [1, 32], strides = [1, 1]} : vector<36x32xf32> to vector<1x32xf32>
      %281 = vector.extract_strided_slice %10 {offsets = [17, 0], sizes = [1, 32], strides = [1, 1]} : vector<36x32xf32> to vector<1x32xf32>
      %282 = vector.broadcast %280 : vector<1x32xf32> to vector<64x32xf32>
      %283 = arith.mulf %28, %282 : vector<64x32xf32>
      %284 = arith.mulf %283, %180 : vector<64x32xf32>
      %cst_52 = arith.constant 0.000000e+00 : f32
      %285 = vector.broadcast %cst_52 : f32 to vector<64x32xf32>
      %286 = arith.subf %285, %37 : vector<64x32xf32>
      %287 = vector.broadcast %281 : vector<1x32xf32> to vector<64x32xf32>
      %288 = arith.mulf %286, %287 : vector<64x32xf32>
      %289 = arith.mulf %288, %191 : vector<64x32xf32>
      %290 = arith.addf %284, %289 : vector<64x32xf32>
      %291 = vector.extract_strided_slice %9 {offsets = [18, 0], sizes = [1, 32], strides = [1, 1]} : vector<36x32xf32> to vector<1x32xf32>
      %292 = vector.extract_strided_slice %10 {offsets = [18, 0], sizes = [1, 32], strides = [1, 1]} : vector<36x32xf32> to vector<1x32xf32>
      %293 = vector.broadcast %291 : vector<1x32xf32> to vector<64x32xf32>
      %294 = arith.mulf %31, %293 : vector<64x32xf32>
      %295 = arith.mulf %294, %191 : vector<64x32xf32>
      %cst_53 = arith.constant 0.000000e+00 : f32
      %296 = vector.broadcast %cst_53 : f32 to vector<64x32xf32>
      %297 = arith.subf %296, %40 : vector<64x32xf32>
      %298 = vector.broadcast %292 : vector<1x32xf32> to vector<64x32xf32>
      %299 = arith.mulf %297, %298 : vector<64x32xf32>
      %300 = arith.mulf %299, %202 : vector<64x32xf32>
      %301 = arith.addf %295, %300 : vector<64x32xf32>
      %302 = vector.extract_strided_slice %9 {offsets = [19, 0], sizes = [1, 32], strides = [1, 1]} : vector<36x32xf32> to vector<1x32xf32>
      %303 = vector.extract_strided_slice %10 {offsets = [19, 0], sizes = [1, 32], strides = [1, 1]} : vector<36x32xf32> to vector<1x32xf32>
      %304 = vector.broadcast %302 : vector<1x32xf32> to vector<64x32xf32>
      %305 = arith.mulf %34, %304 : vector<64x32xf32>
      %306 = arith.mulf %305, %202 : vector<64x32xf32>
      %cst_54 = arith.constant 0.000000e+00 : f32
      %307 = vector.broadcast %cst_54 : f32 to vector<64x32xf32>
      %308 = arith.subf %307, %43 : vector<64x32xf32>
      %309 = vector.broadcast %303 : vector<1x32xf32> to vector<64x32xf32>
      %310 = arith.mulf %308, %309 : vector<64x32xf32>
      %311 = arith.mulf %310, %213 : vector<64x32xf32>
      %312 = arith.addf %306, %311 : vector<64x32xf32>
      %313 = vector.extract_strided_slice %9 {offsets = [20, 0], sizes = [1, 32], strides = [1, 1]} : vector<36x32xf32> to vector<1x32xf32>
      %314 = vector.extract_strided_slice %10 {offsets = [20, 0], sizes = [1, 32], strides = [1, 1]} : vector<36x32xf32> to vector<1x32xf32>
      %315 = vector.broadcast %313 : vector<1x32xf32> to vector<64x32xf32>
      %316 = arith.mulf %37, %315 : vector<64x32xf32>
      %317 = arith.mulf %316, %213 : vector<64x32xf32>
      %cst_55 = arith.constant 0.000000e+00 : f32
      %318 = vector.broadcast %cst_55 : f32 to vector<64x32xf32>
      %319 = arith.subf %318, %46 : vector<64x32xf32>
      %320 = vector.broadcast %314 : vector<1x32xf32> to vector<64x32xf32>
      %321 = arith.mulf %319, %320 : vector<64x32xf32>
      %322 = arith.mulf %321, %224 : vector<64x32xf32>
      %323 = arith.addf %317, %322 : vector<64x32xf32>
      %324 = vector.extract_strided_slice %9 {offsets = [24, 0], sizes = [1, 32], strides = [1, 1]} : vector<36x32xf32> to vector<1x32xf32>
      %325 = vector.extract_strided_slice %10 {offsets = [24, 0], sizes = [1, 32], strides = [1, 1]} : vector<36x32xf32> to vector<1x32xf32>
      %326 = vector.broadcast %324 : vector<1x32xf32> to vector<64x32xf32>
      %327 = arith.mulf %13, %326 : vector<64x32xf32>
      %328 = arith.mulf %327, %235 : vector<64x32xf32>
      %cst_56 = arith.constant 0.000000e+00 : f32
      %329 = vector.broadcast %cst_56 : f32 to vector<64x32xf32>
      %330 = arith.subf %329, %25 : vector<64x32xf32>
      %331 = vector.broadcast %325 : vector<1x32xf32> to vector<64x32xf32>
      %332 = arith.mulf %330, %331 : vector<64x32xf32>
      %333 = arith.mulf %332, %246 : vector<64x32xf32>
      %334 = arith.addf %328, %333 : vector<64x32xf32>
      %335 = vector.extract_strided_slice %9 {offsets = [25, 0], sizes = [1, 32], strides = [1, 1]} : vector<36x32xf32> to vector<1x32xf32>
      %336 = vector.extract_strided_slice %10 {offsets = [25, 0], sizes = [1, 32], strides = [1, 1]} : vector<36x32xf32> to vector<1x32xf32>
      %337 = vector.broadcast %335 : vector<1x32xf32> to vector<64x32xf32>
      %338 = arith.mulf %16, %337 : vector<64x32xf32>
      %339 = arith.mulf %338, %246 : vector<64x32xf32>
      %cst_57 = arith.constant 0.000000e+00 : f32
      %340 = vector.broadcast %cst_57 : f32 to vector<64x32xf32>
      %341 = arith.subf %340, %28 : vector<64x32xf32>
      %342 = vector.broadcast %336 : vector<1x32xf32> to vector<64x32xf32>
      %343 = arith.mulf %341, %342 : vector<64x32xf32>
      %344 = arith.mulf %343, %257 : vector<64x32xf32>
      %345 = arith.addf %339, %344 : vector<64x32xf32>
      %346 = vector.extract_strided_slice %9 {offsets = [26, 0], sizes = [1, 32], strides = [1, 1]} : vector<36x32xf32> to vector<1x32xf32>
      %347 = vector.extract_strided_slice %10 {offsets = [26, 0], sizes = [1, 32], strides = [1, 1]} : vector<36x32xf32> to vector<1x32xf32>
      %348 = vector.broadcast %346 : vector<1x32xf32> to vector<64x32xf32>
      %349 = arith.mulf %19, %348 : vector<64x32xf32>
      %350 = arith.mulf %349, %257 : vector<64x32xf32>
      %cst_58 = arith.constant 0.000000e+00 : f32
      %351 = vector.broadcast %cst_58 : f32 to vector<64x32xf32>
      %352 = arith.subf %351, %31 : vector<64x32xf32>
      %353 = vector.broadcast %347 : vector<1x32xf32> to vector<64x32xf32>
      %354 = arith.mulf %352, %353 : vector<64x32xf32>
      %355 = arith.mulf %354, %268 : vector<64x32xf32>
      %356 = arith.addf %350, %355 : vector<64x32xf32>
      %357 = vector.extract_strided_slice %9 {offsets = [27, 0], sizes = [1, 32], strides = [1, 1]} : vector<36x32xf32> to vector<1x32xf32>
      %358 = vector.extract_strided_slice %10 {offsets = [27, 0], sizes = [1, 32], strides = [1, 1]} : vector<36x32xf32> to vector<1x32xf32>
      %359 = vector.broadcast %357 : vector<1x32xf32> to vector<64x32xf32>
      %360 = arith.mulf %22, %359 : vector<64x32xf32>
      %361 = arith.mulf %360, %268 : vector<64x32xf32>
      %cst_59 = arith.constant 0.000000e+00 : f32
      %362 = vector.broadcast %cst_59 : f32 to vector<64x32xf32>
      %363 = arith.subf %362, %34 : vector<64x32xf32>
      %364 = vector.broadcast %358 : vector<1x32xf32> to vector<64x32xf32>
      %365 = arith.mulf %363, %364 : vector<64x32xf32>
      %366 = arith.mulf %365, %279 : vector<64x32xf32>
      %367 = arith.addf %361, %366 : vector<64x32xf32>
      %368 = vector.extract_strided_slice %9 {offsets = [28, 0], sizes = [1, 32], strides = [1, 1]} : vector<36x32xf32> to vector<1x32xf32>
      %369 = vector.extract_strided_slice %10 {offsets = [28, 0], sizes = [1, 32], strides = [1, 1]} : vector<36x32xf32> to vector<1x32xf32>
      %370 = vector.broadcast %368 : vector<1x32xf32> to vector<64x32xf32>
      %371 = arith.mulf %25, %370 : vector<64x32xf32>
      %372 = arith.mulf %371, %279 : vector<64x32xf32>
      %cst_60 = arith.constant 0.000000e+00 : f32
      %373 = vector.broadcast %cst_60 : f32 to vector<64x32xf32>
      %374 = arith.subf %373, %37 : vector<64x32xf32>
      %375 = vector.broadcast %369 : vector<1x32xf32> to vector<64x32xf32>
      %376 = arith.mulf %374, %375 : vector<64x32xf32>
      %377 = arith.mulf %376, %290 : vector<64x32xf32>
      %378 = arith.addf %372, %377 : vector<64x32xf32>
      %379 = vector.extract_strided_slice %9 {offsets = [29, 0], sizes = [1, 32], strides = [1, 1]} : vector<36x32xf32> to vector<1x32xf32>
      %380 = vector.extract_strided_slice %10 {offsets = [29, 0], sizes = [1, 32], strides = [1, 1]} : vector<36x32xf32> to vector<1x32xf32>
      %381 = vector.broadcast %379 : vector<1x32xf32> to vector<64x32xf32>
      %382 = arith.mulf %28, %381 : vector<64x32xf32>
      %383 = arith.mulf %382, %290 : vector<64x32xf32>
      %cst_61 = arith.constant 0.000000e+00 : f32
      %384 = vector.broadcast %cst_61 : f32 to vector<64x32xf32>
      %385 = arith.subf %384, %40 : vector<64x32xf32>
      %386 = vector.broadcast %380 : vector<1x32xf32> to vector<64x32xf32>
      %387 = arith.mulf %385, %386 : vector<64x32xf32>
      %388 = arith.mulf %387, %301 : vector<64x32xf32>
      %389 = arith.addf %383, %388 : vector<64x32xf32>
      %390 = vector.extract_strided_slice %9 {offsets = [30, 0], sizes = [1, 32], strides = [1, 1]} : vector<36x32xf32> to vector<1x32xf32>
      %391 = vector.extract_strided_slice %10 {offsets = [30, 0], sizes = [1, 32], strides = [1, 1]} : vector<36x32xf32> to vector<1x32xf32>
      %392 = vector.broadcast %390 : vector<1x32xf32> to vector<64x32xf32>
      %393 = arith.mulf %31, %392 : vector<64x32xf32>
      %394 = arith.mulf %393, %301 : vector<64x32xf32>
      %cst_62 = arith.constant 0.000000e+00 : f32
      %395 = vector.broadcast %cst_62 : f32 to vector<64x32xf32>
      %396 = arith.subf %395, %43 : vector<64x32xf32>
      %397 = vector.broadcast %391 : vector<1x32xf32> to vector<64x32xf32>
      %398 = arith.mulf %396, %397 : vector<64x32xf32>
      %399 = arith.mulf %398, %312 : vector<64x32xf32>
      %400 = arith.addf %394, %399 : vector<64x32xf32>
      %401 = vector.extract_strided_slice %9 {offsets = [31, 0], sizes = [1, 32], strides = [1, 1]} : vector<36x32xf32> to vector<1x32xf32>
      %402 = vector.extract_strided_slice %10 {offsets = [31, 0], sizes = [1, 32], strides = [1, 1]} : vector<36x32xf32> to vector<1x32xf32>
      %403 = vector.broadcast %401 : vector<1x32xf32> to vector<64x32xf32>
      %404 = arith.mulf %34, %403 : vector<64x32xf32>
      %405 = arith.mulf %404, %312 : vector<64x32xf32>
      %cst_63 = arith.constant 0.000000e+00 : f32
      %406 = vector.broadcast %cst_63 : f32 to vector<64x32xf32>
      %407 = arith.subf %406, %46 : vector<64x32xf32>
      %408 = vector.broadcast %402 : vector<1x32xf32> to vector<64x32xf32>
      %409 = arith.mulf %407, %408 : vector<64x32xf32>
      %410 = arith.mulf %409, %323 : vector<64x32xf32>
      %411 = arith.addf %405, %410 : vector<64x32xf32>
      %412 = arith.negf %7 : vector<64x32xf32>
      %413 = math.exp %412 : vector<64x32xf32>
      %cst_64 = arith.constant 1.000000e+00 : f32
      %414 = vector.broadcast %cst_64 : f32 to vector<64x32xf32>
      %415 = arith.addf %414, %413 : vector<64x32xf32>
      %416 = arith.divf %414, %415 : vector<64x32xf32>
      %417 = arith.mulf %7, %416 : vector<64x32xf32>
      %c0_65 = arith.constant 0 : index
      %c0_66 = arith.constant 0 : index
      %418 = vector.load %arg8[%c0_65, %c0_66] : memref<64x288xf32, #tpu.memory_space<vmem>>, vector<64x32xf32>
      tpu.vector_store %arg8[%c0_65, %c0_66], %417 {strides = array<i32>} : memref<64x288xf32, #tpu.memory_space<vmem>>, vector<64x32xf32>,
      %c0_67 = arith.constant 0 : index
      %c32 = arith.constant 32 : index
      %419 = vector.load %arg8[%c0_67, %c32] : memref<64x288xf32, #tpu.memory_space<vmem>>, vector<64x32xf32>
      tpu.vector_store %arg8[%c0_67, %c32], %334 {strides = array<i32>} : memref<64x288xf32, #tpu.memory_space<vmem>>, vector<64x32xf32>,
      %c0_68 = arith.constant 0 : index
      %c64 = arith.constant 64 : index
      %420 = vector.load %arg8[%c0_68, %c64] : memref<64x288xf32, #tpu.memory_space<vmem>>, vector<64x32xf32>
      tpu.vector_store %arg8[%c0_68, %c64], %345 {strides = array<i32>} : memref<64x288xf32, #tpu.memory_space<vmem>>, vector<64x32xf32>,
      %c0_69 = arith.constant 0 : index
      %c96 = arith.constant 96 : index
      %421 = vector.load %arg8[%c0_69, %c96] : memref<64x288xf32, #tpu.memory_space<vmem>>, vector<64x32xf32>
      tpu.vector_store %arg8[%c0_69, %c96], %356 {strides = array<i32>} : memref<64x288xf32, #tpu.memory_space<vmem>>, vector<64x32xf32>,
      %c0_70 = arith.constant 0 : index
      %c128 = arith.constant 128 : index
      %422 = vector.load %arg8[%c0_70, %c128] : memref<64x288xf32, #tpu.memory_space<vmem>>, vector<64x32xf32>
      tpu.vector_store %arg8[%c0_70, %c128], %367 {strides = array<i32>} : memref<64x288xf32, #tpu.memory_space<vmem>>, vector<64x32xf32>,
      %c0_71 = arith.constant 0 : index
      %c160 = arith.constant 160 : index
      %423 = vector.load %arg8[%c0_71, %c160] : memref<64x288xf32, #tpu.memory_space<vmem>>, vector<64x32xf32>
      tpu.vector_store %arg8[%c0_71, %c160], %378 {strides = array<i32>} : memref<64x288xf32, #tpu.memory_space<vmem>>, vector<64x32xf32>,
      %c0_72 = arith.constant 0 : index
      %c192 = arith.constant 192 : index
      %424 = vector.load %arg8[%c0_72, %c192] : memref<64x288xf32, #tpu.memory_space<vmem>>, vector<64x32xf32>
      tpu.vector_store %arg8[%c0_72, %c192], %389 {strides = array<i32>} : memref<64x288xf32, #tpu.memory_space<vmem>>, vector<64x32xf32>,
      %c0_73 = arith.constant 0 : index
      %c224 = arith.constant 224 : index
      %425 = vector.load %arg8[%c0_73, %c224] : memref<64x288xf32, #tpu.memory_space<vmem>>, vector<64x32xf32>
      tpu.vector_store %arg8[%c0_73, %c224], %400 {strides = array<i32>} : memref<64x288xf32, #tpu.memory_space<vmem>>, vector<64x32xf32>,
      %c0_74 = arith.constant 0 : index
      %c256 = arith.constant 256 : index
      %426 = vector.load %arg8[%c0_74, %c256] : memref<64x288xf32, #tpu.memory_space<vmem>>, vector<64x32xf32>
      tpu.vector_store %arg8[%c0_74, %c256], %411 {strides = array<i32>} : memref<64x288xf32, #tpu.memory_space<vmem>>, vector<64x32xf32>,
    } else {
    }
    %c0 = arith.constant 0 : index
    %c0_1 = arith.constant 0 : index
    %3 = vector.load %arg8[%c0, %c0_1] : memref<64x288xf32, #tpu.memory_space<vmem>>, vector<64x288xf32>
    %c0_2 = arith.constant 0 : index
    %c0_3 = arith.constant 0 : index
    %4 = vector.load %arg6[%c0_2, %c0_3] : memref<288x128xf32, #tpu.memory_space<vmem>>, vector<288x128xf32>
    %cst = arith.constant dense<0.000000e+00> : vector<64x128xf32>
    %5 = tpu.matmul %3, %4, %cst {dimension_numbers = #tpu.dot_dimension_numbers<[1], [0], [0], [1], [0, 0, 1, 1], [], []>} : vector<64x288xf32>, vector<288x128xf32>, vector<64x128xf32> -> vector<64x128xf32>
    %c0_4 = arith.constant 0 : index
    %c0_5 = arith.constant 0 : index
    %6 = vector.load %arg7[%c0_4, %c0_5] : memref<64x128xf32, #tpu.memory_space<vmem>>, vector<64x128xf32>
    tpu.vector_store %arg7[%c0_4, %c0_5], %5 {strides = array<i32>} : memref<64x128xf32, #tpu.memory_space<vmem>>, vector<64x128xf32>,
    return
  }
  func.func @transform_0(%arg0: i32, %arg1: i32) -> (i32, i32) {
    %c0_i32 = arith.constant 0 : i32
    %c0_i32_0 = arith.constant 0 : i32
    return %arg0, %c0_i32 : i32, i32
  }
  func.func @transform_1(%arg0: i32, %arg1: i32) -> (i32, i32) {
    %c0_i32 = arith.constant 0 : i32
    %c0_i32_0 = arith.constant 0 : i32
    %c0_i32_1 = arith.constant 0 : i32
    return %c0_i32, %c0_i32_0 : i32, i32
  }
  func.func @transform_2(%arg0: i32, %arg1: i32) -> (i32, i32) {
    %c0_i32 = arith.constant 0 : i32
    %c0_i32_0 = arith.constant 0 : i32
    %c0_i32_1 = arith.constant 0 : i32
    return %c0_i32, %c0_i32_0 : i32, i32
  }
  func.func @transform_3(%arg0: i32, %arg1: i32) -> (i32, i32) {
    %c0_i32 = arith.constant 0 : i32
    %c0_i32_0 = arith.constant 0 : i32
    %c0_i32_1 = arith.constant 0 : i32
    return %c0_i32, %c0_i32_0 : i32, i32
  }
  func.func @transform_4(%arg0: i32, %arg1: i32) -> (i32, i32) {
    %c0_i32 = arith.constant 0 : i32
    %c0_i32_0 = arith.constant 0 : i32
    return %c0_i32, %arg1 : i32, i32
  }
  func.func @transform_5(%arg0: i32, %arg1: i32) -> (i32, i32) {
    %c0_i32 = arith.constant 0 : i32
    return %arg0, %arg1 : i32, i32
  }
}

</mosaic_0001>

<bundles_post_ra>
// kernel: tpu_custom_call.1
= control target key start
LH: loop header
LB: loop body
LE: loop exit
PB: predicated region body
PF: predicated region fallthrough
CT: control target
= control target key end

     0   :  { %10 = vsyncpa [#allocation4], 0  ;;  %s5580_s0 = inlined_call_operand.vmem [shape: f32[64,32], index: 0, kind: input, shape index: {}]   ;;  %s5581_s1 = inlined_call_operand.vmem [shape: f32[12,32], index: 1, kind: input, shape index: {}]   ;;  %s5582_s2 = inlined_call_operand.vmem [shape: f32[36,32], index: 2, kind: input, shape index: {}]   ;;  %s5583_s3 = inlined_call_operand.vmem [shape: f32[36,32], index: 3, kind: input, shape index: {}]   ;;  %s5584_s4 = inlined_call_operand.hbm [shape: f32[288,128], index: 4, kind: input, shape index: {}]   ;;  %s5585_s5 = inlined_call_operand.hbm [shape: f32[64,128], index: 5, kind: output, shape index: {}]  }
   0x1   :  { %11 = vsyncpa [#allocation5], 0  ;;  %s2985_s18 = smov [#allocation3]  }
   0x2   :  { %s25_s19 = sshll.u32 %s2985_s18, 4  ;;  %s26_s19 = int_to_ptr.vmem [resolvable:$true] %s25_s19 }
   0x3   :  { %s2949_s20 = scalar_lea.vmem %s26_s19, 4608  ;;  %p2954_p1 = scmp.lt.s32.totalorder %s26_s19, %s26_s19 }
   0x4   :  { %p2950_p0 = scmp.ne.s32.totalorder %s26_s19, %s2949_s20  ;;  %p2955_p2 = scmp.lt.s32.totalorder %s2949_s20, %s2949_s20 }
   0x6   :  { %p2956_p3 = por %p2955_p2, %p2954_p1 }
   0x8   :  { %p2957_p4 = pnand %p2956_p3, %p2950_p0 }
   0xa   :  { %2960 = shalt.err (!%p2957_p4)
}
   0xb   :  { %s2986_s21 = smov 128   ;;  %s2987_s22 = smov 8  }
   0xc   :  { %31 = dma.hbm_to_vmem [thread:$0]  %s5584_s4, 4608, %s26_s19, [#allocation4], %s2986_s21, %s2986_s21, %s2987_s22  }
   0xd   :  { %2981 = dma.done.wait [#allocation4], 4608  }
   0xe   :  { %2982 = vsyncadd [#allocation4], 4294962688  ;;  %v57_v0 = vlaneseq  ;;  %v3045_v8 = vld [vmem:[%s5580_s0] sm:$0xff]  ;;  %v3055_v10 = vld [vmem:[%s5581_s1 + $0x8] sm:$0xf]  ;;  %vm2988_vm5 = vmmov 1  }
   0xf   :  { %v3050_v9 = vld [vmem:[%s5581_s1] sm:$0xff]  ;;  %v3122_v27 = vld [vmem:[%s5582_s2 + $0x8] sm:$0xff]  ;;  %v3143_v32 = vld [vmem:[%s5582_s2 + $0x10] sm:$0xff]  ;;  %v5592_v42 = vmov 0.0   ;;  %s2990_s17 = smov 64   ;;  %s2992_s24 = smov 96  }
  0x10   :  { %v58_v1 = vshrl.u32 %v57_v0, 7  ;;  %v3064_v13 = vld [vmem:[%s5582_s2] sm:$0xff]  ;;  %v3148_v33 = vld [vmem:[%s5583_s3 + $0x10] sm:$0xff]  ;;  %v3180_v41 = vld [vmem:[%s5582_s2 + $0x18] sm:$0xff] }
  0x11   :  { %v3085_v18 = vld [vmem:[%s5583_s3] sm:$0xff]  ;;  %v3199_v47 = vld [vmem:[%s5583_s3 + $0x18] sm:$0xff] }
  0x12   :  { %v3030_v2 = vsub.s32 0, %v58_v1  ;;  %v3032_v3 = vsub.s32 5, %v58_v1  ;;  %v3034_v4 = vsub.s32 1, %v58_v1  ;;  %v3036_v5 = vsub.s32 6, %v58_v1 }
  0x13   :  { %v3038_v6 = vsub.s32 7, %v58_v1  ;;  %v3040_v7 = vsub.s32 2, %v58_v1  ;;  %v3057_v11 = vsub.s32 3, %v58_v1  ;;  %v3059_v12 = vsub.s32 4, %v58_v1 }
  0x14   :  { %v3068_v14 = vrot.slane %v3050_v9, %v3032_v3  ;;  %v3072_v15 = vrot.slane %v3050_v9, %v3036_v5  ;;  %v3080_v17 = vrot.slane %v3055_v10, %v3030_v2  ;;  %v3089_v19 = vrot.slane %v3055_v10, %v3034_v4 }
  0x15   :  { %v3076_v16 = vrot.slane %v3050_v9, %v3038_v6  ;;  %v3093_v20 = vrot.slane %v3064_v13, %v3032_v3  ;;  %v3097_v21 = vrot.slane %v3064_v13, %v3036_v5  ;;  %v3101_v22 = vrot.slane %v3064_v13, %v3038_v6 }
  0x16   :  { %5759 = vst [vmem:[#allocation9_spill] sm:$0xff] %v3068_v14  ;;  %5760 = vst [vmem:[#allocation10_spill] sm:$0xff] %v3072_v15  ;;  %v3105_v23 = vsub.f32 %v3045_v8, %v3068_v14  ;;  %v3109_v24 = vsub.f32 %v3045_v8, %v3072_v15  ;;  %v3117_v26 = vsub.f32 %v3045_v8, %v3080_v17 }
  0x17   :  { %5761 = vst [vmem:[#allocation11_spill] sm:$0xff] %v3076_v16  ;;  %5762 = vst [vmem:[#allocation12_spill] sm:$0xff] %v3080_v17  ;;  %v3113_v25 = vsub.f32 %v3045_v8, %v3076_v16  ;;  %v3126_v28 = vsub.f32 %v3045_v8, %v3089_v19  ;;  %v3130_v29 = vrot.slane %v3085_v18, %v3032_v3 }
  0x18   :  { %5763 = vst [vmem:[#allocation13_spill] sm:$0xff] %v3089_v19  ;;  %5764 = vst [vmem:[#allocation14_spill] sm:$0xff] %v3093_v20  ;;  %v3134_v30 = vrot.slane %v3085_v18, %v3036_v5  ;;  %v3138_v31 = vrot.slane %v3085_v18, %v3038_v6  ;;  %vm241_vm0 = vcmp.ge.f32.partialorder %v3105_v23, 0.0  ;;  %vm249_vm1 = vcmp.ge.f32.partialorder %v3109_v24, 0.0 }
  0x19   :  { %5765 = vst [vmem:[#allocation15_spill] sm:$0xff] %v3097_v21  ;;  %5766 = vst [vmem:[#allocation16_spill] sm:$0xff] %v3101_v22  ;;  %vm257_vm2 = vcmp.ge.f32.partialorder %v3113_v25, 0.0  ;;  %vm265_vm3 = vcmp.ge.f32.partialorder %v3117_v26, 0.0  ;;  %vm273_vm4 = vcmp.ge.f32.partialorder %v3126_v28, 0.0  ;;  %v933_v34 = vmul.f32 %v3093_v20, %v3105_v23 }
  0x1a   :  { %5767 = vst [vmem:[#allocation17_spill] sm:$0xff] %v3130_v29  ;;  %5768 = vst [vmem:[#allocation18_spill] sm:$0xff] %v3134_v30  ;;  %v3161_v35 = vsub.f32 0.0, %v3113_v25  ;;  %v989_v36 = vmul.f32 %v3097_v21, %v3109_v24  ;;  %v3168_v37 = vsub.f32 0.0, %v3117_v26  ;;  %v1045_v38 = vmul.f32 %v3101_v22, %v3113_v25 }
  0x1b   :  { %5769 = vst [vmem:[#allocation19_spill] sm:$0xff] %v3138_v31  ;;  %vm457_vm6 = vmxor %vm249_vm1, %vm2988_vm5  ;;  %v1061_v39 = vsub.f32 0.0, %v3126_v28  ;;  %v3175_v40 = vrot.slane %v3122_v27, %v3030_v2  ;;  %v3190_v45 = vrot.slane %v3143_v32, %v3034_v4  ;;  %v3194_v46 = vrot.slane %v3148_v33, %v3034_v4 }
  0x1c   :  { %vm465_vm7 = vmand %vm241_vm0, %vm457_vm6  ;;  %v961_v44 = vmul.f32 %v3130_v29, %v3161_v35  ;;  %v1017_v49 = vmul.f32 %v3134_v30, %v3168_v37  ;;  %v3218_v55 = vrot.slane %v3143_v32, %v3040_v7  ;;  %v3224_v58 = vrot.slane %v3148_v33, %v3040_v7 }
  0x1d   :  { %5770 = vst [vmem:[#allocation20_spill] sm:$0xff] %v3175_v40  ;;  %v2709_v43 = vsel %vm465_vm7, 1.0, %v5592_v42  ;;  %vm489_vm8 = vmxor %vm257_vm2, %vm2988_vm5  ;;  %v1073_v50 = vmul.f32 %v3138_v31, %v1061_v39  ;;  %v1101_v51 = vmul.f32 %v3175_v40, %v3117_v26  ;;  %v1453_v53 = vmul.f32 %v3190_v45, %v3105_v23 }
  0x1e   :  { %5771 = vst [vmem:[#allocation21_spill] sm:$0xff] %v3190_v45  ;;  %5772 = vst [vmem:[#allocation22_spill] sm:$0xff] %v3194_v46  ;;  %v941_v48 = vmul.f32 %v2709_v43, %v933_v34  ;;  %v1473_v54 = vmul.f32 %v3194_v46, %v3168_v37  ;;  %v3228_v59 = vrot.slane %v3180_v41, %v3032_v3 }
  0x1f   :  { %vm497_vm9 = vmand %vm249_vm1, %vm489_vm8  ;;  %5773 = vst [vmem:[#allocation23_spill] sm:$0xff] %v3218_v55  ;;  %v1501_v61 = vmul.f32 %v3218_v55, %v3109_v24  ;;  %v3238_v62 = vrot.slane %v3199_v47, %v3032_v3  ;;  %v3242_v63 = vrot.slane %v3050_v9, %v3059_v12  ;;  %v3297_v19 = vrot.slane %v3180_v41, %v3059_v12 }
  0x20   :  { %v2717_v52 = vsel %vm497_vm9, 1.0, %v5592_v42  ;;  %vm521_vm10 = vmxor %vm265_vm3, %vm2988_vm5  ;;  %5774 = vst [vmem:[#allocation24_spill] sm:$0xff] %v3224_v58  ;;  %v3439_v29 = vrot.slane %v3180_v41, %v3034_v4 }
  0x21   :  { %vm529_vm11 = vmand %vm257_vm2, %vm521_vm10  ;;  %v969_v56 = vmul.f32 %v2717_v52, %v961_v44  ;;  %v997_v57 = vmul.f32 %v2717_v52, %v989_v36  ;;  %5775 = vst [vmem:[#allocation25_spill] sm:$0xff] %v3228_v59  ;;  %v1521_v36 = vmul.f32 %v3224_v58, %v1061_v39  ;;  %v1885_v52 = vmul.f32 %v3228_v59, %v3105_v23 }
  0x22   :  { %v2725_v60 = vsel %vm529_vm11, 1.0, %v5592_v42  ;;  %vm553_vm12 = vmxor %vm273_vm4, %vm2988_vm5  ;;  %5776 = vst [vmem:[#allocation26_spill] sm:$0xff] %v3238_v62  ;;  %v1905_v40 = vmul.f32 %v3238_v62, %v1061_v39  ;;  %v109_v31 = vsub.f32 %v3045_v8, %v3242_v63  ;;  %v3267_v39 = vrot.slane %v3085_v18, %v3059_v12 }
  0x23   :  { %5777 = vst [vmem:[#allocation27_spill] sm:$0xff] %v3242_v63  ;;  %vm561_vm13 = vmand %vm265_vm3, %vm553_vm12  ;;  %v977_v0 = vadd.f32 %v969_v56, %v941_v48  ;;  %v1025_v1 = vmul.f32 %v2725_v60, %v1017_v49  ;;  %v1053_v34 = vmul.f32 %v2725_v60, %v1045_v38  ;;  %v3260_v56 = vrot.slane %v3064_v13, %v3059_v12 }
  0x24   :  { %v2733_v44 = vsel %vm561_vm13, 1.0, %v5592_v42  ;;  %vm425_vm14 = vmxor %vm241_vm0, %vm2988_vm5  ;;  %vm233_vm15 = vcmp.ge.f32.partialorder %v109_v31, 0.0  ;;  %v3263_v60 = vsub.f32 0.0, %v3109_v24  ;;  %5780 = vst [vmem:[#allocation30_spill] sm:$0xff] %v3267_v39 }
  0x25   :  { %v1033_v55 = vadd.f32 %v1025_v1, %v997_v57  ;;  %v1081_v48 = vmul.f32 %v2733_v44, %v1073_v50  ;;  %v3256_v49 = vmul.f32 %v2733_v44, %v1101_v51  ;;  %v1461_v38 = vmul.f32 %v1453_v53, %v977_v0  ;;  %5778 = vst [vmem:[#allocation28_spill] sm:$0xff] %v3260_v56  ;;  %vm433_vm0 = vmand %vm233_vm15, %vm425_vm14 }
  0x26   :  { %5779 = vst [vmem:[#allocation29_spill] sm:$0xff] %v3263_v60  ;;  %v3274_v50 = vrot.slane %v3143_v32, %v3030_v2  ;;  %v5782_v51 = vmov 0.0   ;;  %v877_v1 = vmul.f32 %v3260_v56, %v109_v31  ;;  %v905_v44 = vmul.f32 %v3267_v39, %v3263_v60  ;;  %5785 = vst [vmem:[#allocation34_spill] sm:$0xff] %v3297_v19 }
  0x27   :  { %v3269_v42 = vadd.f32 %v1081_v48, %v1053_v34  ;;  %v1481_v62 = vmul.f32 %v1473_v54, %v1033_v55  ;;  %v1509_v57 = vmul.f32 %v1501_v61, %v1033_v55  ;;  %v3277_v53 = vsel %vm433_vm0, 1.0, %v5782_v51  ;;  %vm3356_vm2 = vmxor %vm233_vm15, %vm2988_vm5  ;;  %5805 = vst [vmem:[#allocation51_spill] sm:$0xff] %v3439_v29 }
  0x28   :  { %5781 = vst [vmem:[#allocation31_spill] sm:$0xff] %v3274_v50  ;;  %v3284_v34 = vrot.slane %v3148_v33, %v3030_v2  ;;  %v1405_v61 = vmul.f32 %v3274_v50, %v109_v31  ;;  %v3290_v48 = vrot.slane %v3199_v47, %v3057_v11  ;;  %v885_v58 = vmul.f32 %v3277_v53, %v877_v1 }
  0x29   :  { %v1489_v54 = vadd.f32 %v1481_v62, %v1461_v38  ;;  %v1529_v55 = vmul.f32 %v1521_v36, %v3269_v42  ;;  %v913_v59 = vmul.f32 %v2709_v43, %v905_v44  ;;  %v3305_v38 = vrot.slane %v3199_v47, %v3059_v12 }
  0x2a   :  { %5783 = vst [vmem:[#allocation32_spill] sm:$0xff] %v3284_v34  ;;  %5784 = vst [vmem:[#allocation33_spill] sm:$0xff] %v3290_v48  ;;  %v1425_v22 = vmul.f32 %v3284_v34, %v3161_v35  ;;  %v1809_v36 = vmul.f32 %v3290_v48, %v3161_v35  ;;  %v1837_v1 = vmul.f32 %v3297_v19, %v109_v31 }
  0x2b   :  { %v3299_v60 = vadd.f32 %v1529_v55, %v1509_v57  ;;  %v1893_v62 = vmul.f32 %v1885_v52, %v1489_v54  ;;  %5786 = vst [vmem:[#allocation35_spill] sm:$0xff] %v3305_v38  ;;  %v3307_v46 = vadd.f32 %v913_v59, %v885_v58  ;;  %v3312_v44 = vrot.slane %v3050_v9, %v3034_v4 }
  0x2c   :  { %v1433_v43 = vmul.f32 %v1425_v22, %v977_v0  ;;  %v1857_v52 = vmul.f32 %v3305_v38, %v3168_v37  ;;  %v3319_v35 = vrot.slane %v3050_v9, %v3040_v7  ;;  %v3323_v58 = vrot.slane %v3050_v9, %v3057_v11 }
  0x2d   :  { %5787 = vst [vmem:[#allocation36_spill] sm:$0xff] %v3307_v46  ;;  %5788 = vst [vmem:[#allocation37_spill] sm:$0xff] %v3312_v44  ;;  %v1913_v57 = vmul.f32 %v1905_v40, %v3299_v60  ;;  %v1413_v22 = vmul.f32 %v1405_v61, %v3307_v46  ;;  %v3328_v59 = vsub.f32 %v3045_v8, %v3312_v44 }
  0x2e   :  { %5789 = vst [vmem:[#allocation38_spill] sm:$0xff] %v3319_v35  ;;  %5790 = vst [vmem:[#allocation39_spill] sm:$0xff] %v3323_v58  ;;  %v3332_v40 = vrot.slane %v3064_v13, %v3034_v4  ;;  %v3336_v37 = vrot.slane %v3085_v18, %v3034_v4  ;;  %v1865_v55 = vmul.f32 %v1857_v52, %v1489_v54 }
  0x2f   :  { %v1921_v0 = vadd.f32 %v1913_v57, %v1893_v62  ;;  %v3340_v38 = vsub.f32 %v3045_v8, %v3319_v35  ;;  %v3344_v61 = vsub.f32 %v3045_v8, %v3323_v58  ;;  %v1441_v44 = vadd.f32 %v1433_v43, %v1413_v22  ;;  %v3370_v22 = vld [vmem:[%s5583_s3 + $0x8] sm:$0xff]  ;;  %s2991_s3 = smov 32  }
  0x30   :  { %5791 = vst [vmem:[#allocation40_spill] sm:$0xff] %v3332_v40  ;;  %5792 = vst [vmem:[#allocation41_spill] sm:$0xff] %v3336_v37  ;;  %vm209_vm1 = vcmp.ge.f32.partialorder %v3328_v59, 0.0  ;;  %v709_v46 = vmul.f32 %v3332_v40, %v3328_v59  ;;  %v3351_v19 = vrot.slane %v3064_v13, %v3040_v7  ;;  %v3363_v43 = vsub.f32 0.0, %v109_v31 }
  0x31   :  { %2269 = vrot.lane.b32.xlu1 %v1921_v0, %s2990_s17  ;;  %vm217_vm3 = vcmp.ge.f32.partialorder %v3340_v38, 0.0  ;;  %vm225_vm6 = vcmp.ge.f32.partialorder %v3344_v61, 0.0  ;;  %v1845_v57 = vmul.f32 %v1837_v1, %v1441_v44  ;;  %v3365_v52 = vmul.f32 %v1809_v36, %v1441_v44  ;;  %vm297_vm12 = vmxor %vm209_vm1, %vm2988_vm5 }
  0x32   :  { %5793 = vst [vmem:[#allocation42_spill] sm:$0xff] %v3351_v19  ;;  %vm329_vm7 = vmxor %vm217_vm3, %vm2988_vm5  ;;  %v765_v0 = vmul.f32 %v3351_v19, %v3340_v38  ;;  %v3379_v62 = vrot.slane %v3085_v18, %v3040_v7  ;;  %v5798_v31 = vsub.f32 0.0, %v3344_v61  ;;  %v3388_v1 = vrot.slane %v3064_v13, %v3057_v11 }
  0x33   :  { %5796 = vst [vmem:[#allocation43_spill] sm:$0xff] %v3365_v52  ;;  %vm337_vm8 = vmand %vm209_vm1, %vm329_vm7  ;;  %v837_v44 = vsub.f32 0.0, %v3105_v23  ;;  %v3393_v52 = vrot.slane %v3085_v18, %v3057_v11  ;;  %v1873_v19 = vadd.f32 %v1865_v55, %v1845_v57  ;;  %v3412_v58 = vrot.slane %v3370_v22, %v3032_v3 }
  0x34   :  { %5797 = vst [vmem:[#allocation44_spill] sm:$0xff] %v3379_v62  ;;  %v737_v36 = vmul.f32 %v3336_v37, %v5798_v31  ;;  %5799 = vst [vmem:[#allocation45_spill] sm:$0xff] %v3388_v1  ;;  %v2677_v40 = vsel %vm337_vm8, 1.0, %v5782_v51  ;;  %v793_v31 = vmul.f32 %v3379_v62, %v3363_v43  ;;  %v3403_v37 = vrot.slane %v3122_v27, %v3032_v3 }
  0x35   :  { %5800 = vst [vmem:[#allocation46_spill] sm:$0xff] %v3393_v52  ;;  %vm361_vm9 = vmxor %vm225_vm6, %vm2988_vm5  ;;  %v717_v23 = vmul.f32 %v2677_v40, %v709_v46  ;;  %v821_v55 = vmul.f32 %v3388_v1, %v3344_v61  ;;  %v849_v57 = vmul.f32 %v3393_v52, %v837_v44  ;;  %2229 = vrot.lane.b32.xlu0 %v1873_v19, %s2991_s3 }
  0x36   :  { %5801 = vst [vmem:[#allocation47_spill] sm:$0xff] %v3403_v37  ;;  %vm369_vm10 = vmand %vm217_vm3, %vm361_vm9  ;;  %v1261_v46 = vmul.f32 %v3403_v37, %v3328_v59  ;;  %v3424_v52 = vrot.slane %v3122_v27, %v3036_v5  ;;  %v3428_v3 = vrot.slane %v3370_v22, %v3036_v5  ;;  %v1281_v34 = vmul.f32 %v3412_v58, %v3363_v43 }
  0x37   :  { %5802 = vst [vmem:[#allocation48_spill] sm:$0xff] %v3412_v58  ;;  %v2685_v62 = vsel %vm369_vm10, 1.0, %v5782_v51  ;;  %vm401_vm11 = vmand %vm225_vm6, %vm3356_vm2  ;;  %v857_v54 = vmul.f32 %v3277_v53, %v849_v57  ;;  %v669_v57 = vsub.f32 0.0, %v3340_v38  ;;  %vm2081_vm6 = vcmask 261120  }
  0x38   :  { %5803 = vst [vmem:[#allocation49_spill] sm:$0xff] %v3424_v52  ;;  %5804 = vst [vmem:[#allocation50_spill] sm:$0xff] %v3428_v3  ;;  %v2693_v19 = vsel %vm401_vm11, 1.0, %v5782_v51  ;;  %v745_v1 = vmul.f32 %v2685_v62, %v737_v36  ;;  %v773_v35 = vmul.f32 %v2685_v62, %v765_v0  ;;  %v1309_v37 = vmul.f32 %v3424_v52, %v3340_v38 }
  0x39   :  { %v801_v48 = vmul.f32 %v2693_v19, %v793_v31  ;;  %v829_v45 = vmul.f32 %v2693_v19, %v821_v55  ;;  %v1329_v50 = vmul.f32 %v3428_v3, %v837_v44  ;;  %v3443_v62 = vrot.slane %v3199_v47, %v3034_v4 }
  0x3a   :  { %v753_v30 = vadd.f32 %v745_v1, %v717_v23  ;;  %v3449_v36 = vrot.slane %v3050_v9, %v3030_v2  ;;  %v3453_v1 = vrot.slane %v3064_v13, %v3030_v2  ;;  %v1693_v23 = vmul.f32 %v3439_v29, %v3328_v59 }
  0x3b   :  { %5806 = vst [vmem:[#allocation52_spill] sm:$0xff] %v3443_v62  ;;  %v809_v53 = vadd.f32 %v801_v48, %v773_v35  ;;  %v3445_v0 = vadd.f32 %v857_v54, %v829_v45  ;;  %v1713_v55 = vmul.f32 %v3443_v62, %v837_v44  ;;  %v3467_v13 = vrot.slane %v3085_v18, %v3030_v2 }
  0x3c   :  { %5807 = vst [vmem:[#allocation53_spill] sm:$0xff] %v3449_v36  ;;  %5808 = vst [vmem:[#allocation54_spill] sm:$0xff] %v3453_v1  ;;  %v1269_v31 = vmul.f32 %v1261_v46, %v753_v30  ;;  %v61_v9 = vsub.f32 %v3045_v8, %v3449_v36  ;;  %v3471_v35 = vrot.slane %v3122_v27, %v3059_v12  ;;  %v5813_v54 = vsub.f32 0.0, %v3344_v61 }
  0x3d   :  { %v1289_v19 = vmul.f32 %v1281_v34, %v809_v53  ;;  %v1317_v48 = vmul.f32 %v1309_v37, %v809_v53  ;;  %v1337_v45 = vmul.f32 %v1329_v50, %v3445_v0  ;;  %5809 = vst [vmem:[#allocation55_spill] sm:$0xff] %v3467_v13  ;;  %v3475_v34 = vrot.slane %v3370_v22, %v3059_v12 }
  0x3e   :  { %5810 = vst [vmem:[#allocation56_spill] sm:$0xff] %v3471_v35  ;;  %v3479_v50 = vrot.slane %v3180_v41, %v3030_v2  ;;  %vm201_vm13 = vcmp.ge.f32.partialorder %v61_v9, 0.0  ;;  %v653_v59 = vmul.f32 %v3453_v1, %v61_v9  ;;  %v681_v18 = vmul.f32 %v3467_v13, %v669_v57 }
  0x3f   :  { %5811 = vst [vmem:[#allocation57_spill] sm:$0xff] %v3475_v34  ;;  %v1297_v37 = vadd.f32 %v1289_v19, %v1269_v31  ;;  %v3481_v44 = vadd.f32 %v1337_v45, %v1317_v48  ;;  %vm305_vm14 = vmand %vm201_vm13, %vm297_vm12  ;;  %v1213_v46 = vmul.f32 %v3471_v35, %v61_v9  ;;  %v1233_v53 = vmul.f32 %v3475_v34, %v5813_v54 }
  0x40   :  { %5812 = vst [vmem:[#allocation58_spill] sm:$0xff] %v3479_v50  ;;  %v1645_v62 = vmul.f32 %v3479_v50, %v61_v9  ;;  %v2669_v31 = vsel %vm305_vm14, 1.0, %v5782_v51  ;;  %v3494_v19 = vrot.slane %v3199_v47, %v3030_v2  ;;  %v689_v45 = vmul.f32 %v2677_v40, %v681_v18 }
  0x41   :  { %v1701_v3 = vmul.f32 %v1693_v23, %v1297_v37  ;;  %v1721_v29 = vmul.f32 %v1713_v55, %v3481_v44  ;;  %v661_v48 = vmul.f32 %v2669_v31, %v653_v59  ;;  %v1241_v57 = vmul.f32 %v1233_v53, %v753_v30 }
  0x42   :  { %5814 = vst [vmem:[#allocation59_spill] sm:$0xff] %v3494_v19  ;;  %v3498_v52 = vrot.slane %v3055_v10, %v3040_v7  ;;  %v1665_v9 = vmul.f32 %v3494_v19, %v3363_v43  ;;  %v3504_v23 = vrot.slane %v3055_v10, %v3057_v11  ;;  %v3508_v55 = vrot.slane %v3370_v22, %v3030_v2 }
  0x43   :  { %v1729_v58 = vadd.f32 %v1721_v29, %v1701_v3  ;;  %v697_v54 = vadd.f32 %v689_v45, %v661_v48  ;;  %v3514_v40 = vrot.slane %v3122_v27, %v3034_v4  ;;  %v3518_v29 = vrot.slane %v3370_v22, %v3034_v4 }
  0x44   :  { %5815 = vst [vmem:[#allocation60_spill] sm:$0xff] %v3508_v55  ;;  %v181_v30 = vsub.f32 %v3045_v8, %v3498_v52  ;;  %v1673_v10 = vmul.f32 %v1665_v9, %v1297_v37  ;;  %v193_v43 = vsub.f32 %v3045_v8, %v3504_v23  ;;  %v3525_v2 = vrot.slane %v3143_v32, %v3057_v11 }
  0x45   :  { %5816 = vst [vmem:[#allocation61_spill] sm:$0xff] %v3518_v29  ;;  %2139 = vrot.lane.b32.xlu1 %v1729_v58, %s2990_s17  ;;  %v3529_v3 = vrot.slane %v3148_v33, %v3057_v11  ;;  %v1221_v59 = vmul.f32 %v1213_v46, %v697_v54  ;;  %v1157_v4 = vmul.f32 %v3514_v40, %v3126_v28 }
  0x46   :  { %vm281_vm15 = vcmp.ge.f32.partialorder %v181_v30, 0.0  ;;  %v1117_v18 = vsub.f32 0.0, %v181_v30  ;;  %vm289_vm0 = vcmp.ge.f32.partialorder %v193_v43, 0.0  ;;  %v1173_v58 = vsub.f32 0.0, %v193_v43 }
  0x47   :  { %5817 = vst [vmem:[#allocation62_spill] sm:$0xff] %v3529_v3  ;;  %vm585_vm1 = vmxor %vm281_vm15, %vm2988_vm5  ;;  %v1549_v8 = vmul.f32 %v3525_v2, %v3113_v25  ;;  %v3539_v37 = vrot.slane %v3143_v32, %v3059_v12  ;;  %v1249_v53 = vadd.f32 %v1241_v57, %v1221_v59  ;;  %v3547_v48 = vrot.slane %v3148_v33, %v3059_v12  ;;  %v3560_v12 = vld [vmem:[%s5580_s0 + $0x30] sm:$0xff] }
  0x48   :  { %vm593_vm2 = vmand %vm273_vm4, %vm585_vm1  ;;  %v1129_v46 = vmul.f32 %v3508_v55, %v1117_v18  ;;  %v1569_v31 = vmul.f32 %v3529_v3, %v1117_v18  ;;  %v1185_v9 = vmul.f32 %v3518_v29, %v1173_v58 }
  0x49   :  { %5818 = vst [vmem:[#allocation63_spill] sm:$0xff] %v3539_v37  ;;  %5819 = vst [vmem:[#allocation64_spill] sm:$0xff] %v3547_v48  ;;  %v2741_v45 = vsel %vm593_vm2, 1.0, %v5782_v51  ;;  %v1557_v32 = vmul.f32 %v1549_v8, %v3269_v42  ;;  %v1597_v28 = vmul.f32 %v3539_v37, %v3117_v26  ;;  %v1653_v57 = vmul.f32 %v1645_v62, %v1249_v53 }
  0x4a   :  { %vm617_vm3 = vmxor %vm289_vm0, %vm2988_vm5  ;;  %v1137_v54 = vmul.f32 %v2741_v45, %v1129_v46  ;;  %v1165_v43 = vmul.f32 %v2741_v45, %v1157_v4  ;;  %v1617_v59 = vmul.f32 %v3547_v48, %v1173_v58  ;;  %v3565_v42 = vrot.slane %v3180_v41, %v3036_v5 }
  0x4b   :  { %vm625_vm4 = vmand %vm281_vm15, %vm617_vm3  ;;  %v3569_v26 = vrot.slane %v3199_v47, %v3036_v5  ;;  %v3573_v62 = vrot.slane %v3180_v41, %v3038_v6  ;;  %v1681_v30 = vadd.f32 %v1673_v10, %v1653_v57  ;;  %v3578_v53 = vrot.slane %v3199_v47, %v3038_v6 }
  0x4c   :  { %v2749_v33 = vsel %vm625_vm4, 1.0, %v5782_v51  ;;  %5820 = vst [vmem:[#allocation65_spill] sm:$0xff] %v3565_v42  ;;  %v1145_v4 = vadd.f32 %v1137_v54, %v3256_v49  ;;  %v1933_v46 = vmul.f32 %v3565_v42, %v3109_v24  ;;  %v3587_v48 = vsub.f32 %v3560_v12, %v3242_v63 }
  0x4d   :  { %5821 = vst [vmem:[#allocation66_spill] sm:$0xff] %v3569_v26  ;;  %5822 = vst [vmem:[#allocation67_spill] sm:$0xff] %v3573_v62  ;;  %v1193_v8 = vmul.f32 %v2749_v33, %v1185_v9  ;;  %v1953_v45 = vmul.f32 %v3569_v26, %v1117_v18  ;;  %v1981_v5 = vmul.f32 %v3573_v62, %v3113_v25  ;;  %2098 = vrot.lane.b32.xlu0 %v1681_v30, %s2991_s3 }
  0x4e   :  { %5823 = vst [vmem:[#allocation68_spill] sm:$0xff] %v3578_v53  ;;  %v1577_v10 = vmul.f32 %v1569_v31, %v1145_v4  ;;  %v1605_v9 = vmul.f32 %v1597_v28, %v1145_v4  ;;  %v2001_v57 = vmul.f32 %v3578_v53, %v1173_v58  ;;  %v1941_v54 = vmul.f32 %v1933_v46, %v3299_v60 }
  0x4f   :  { %v1201_v49 = vadd.f32 %v1193_v8, %v1165_v43  ;;  %v3594_v24 = vsub.f32 %v3560_v12, %v3068_v14  ;;  %v3598_v25 = vsub.f32 %v3560_v12, %v3072_v15  ;;  %v3602_v18 = vsub.f32 %v3560_v12, %v3076_v16 }
  0x50   :  { %v1585_v43 = vadd.f32 %v1577_v10, %v1557_v32  ;;  %v3606_v58 = vsub.f32 %v3560_v12, %v3080_v17  ;;  %vm239_vm7 = vcmp.ge.f32.partialorder %v3587_v48, 0.0  ;;  %v883_v60 = vmul.f32 %v3260_v56, %v3587_v48  ;;  %v5832_v17 = vld [vmem:[#allocation34_spill] sm:$0xff] }
  0x51   :  { %v1625_v31 = vmul.f32 %v1617_v59, %v1201_v49  ;;  %vm247_vm8 = vcmp.ge.f32.partialorder %v3594_v24, 0.0  ;;  %vm255_vm9 = vcmp.ge.f32.partialorder %v3598_v25, 0.0  ;;  %vm263_vm10 = vcmp.ge.f32.partialorder %v3602_v18, 0.0 }
  0x52   :  { %v1961_v33 = vmul.f32 %v1953_v45, %v1585_v43  ;;  %v1989_v30 = vmul.f32 %v1981_v5, %v1585_v43  ;;  %vm271_vm11 = vcmp.ge.f32.partialorder %v3606_v58, 0.0  ;;  %vm431_vm12 = vmxor %vm247_vm8, %vm2988_vm5  ;;  %v3621_v32 = vsub.f32 0.0, %v3598_v25  ;;  %v5825_v43 = vld [vmem:[#allocation17_spill] sm:$0xff] }
  0x53   :  { %v1633_v28 = vadd.f32 %v1625_v31, %v1605_v9  ;;  %vm439_vm13 = vmand %vm239_vm7, %vm431_vm12  ;;  %v939_v59 = vmul.f32 %v3093_v20, %v3594_v24  ;;  %v955_v4 = vsub.f32 0.0, %v3602_v18  ;;  %v995_v8 = vmul.f32 %v3097_v21, %v3598_v25  ;;  %v5827_v21 = vld [vmem:[#allocation18_spill] sm:$0xff]  ;;  %v5828_v20 = vld [vmem:[#allocation32_spill] sm:$0xff] }
  0x54   :  { %5824 = vst [vmem:[#allocation69_spill] sm:$0xff] %v3621_v32  ;;  %v1969_v46 = vadd.f32 %v1961_v33, %v1941_v54  ;;  %v3629_v5 = vsel %vm439_vm13, 1.0, %v5782_v51  ;;  %vm463_vm14 = vmxor %vm255_vm9, %vm2988_vm5  ;;  %v1011_v49 = vsub.f32 0.0, %v3606_v58  ;;  %v911_v9 = vmul.f32 %v3267_v39, %v3621_v32 }
  0x55   :  { %v2009_v45 = vmul.f32 %v2001_v57, %v1633_v28  ;;  %vm471_vm15 = vmand %vm247_vm8, %vm463_vm14  ;;  %v891_v10 = vmul.f32 %v3629_v5, %v883_v60  ;;  %v967_v54 = vmul.f32 %v5825_v43, %v955_v4  ;;  %v5826_v57 = vld [vmem:[#allocation31_spill] sm:$0xff]  ;;  %v1431_v56 = vmul.f32 %v5828_v20, %v955_v4 }
  0x56   :  { %v1411_v31 = vmul.f32 %v5826_v57, %v3587_v48  ;;  %2309 = vrot.lane.b32.xlu1 %v1969_v46, %s2992_s24  ;;  %v2715_v33 = vsel %vm471_vm15, 1.0, %v5782_v51  ;;  %vm495_vm0 = vmxor %vm263_vm10, %vm2988_vm5  ;;  %v1023_v60 = vmul.f32 %v5827_v21, %v1011_v49  ;;  %v5830_v57 = vld [vmem:[#allocation22_spill] sm:$0xff]  ;;  %v5831_v21 = vld [vmem:[#allocation33_spill] sm:$0xff]  ;;  %v1843_v16 = vmul.f32 %v5832_v17, %v3587_v48 }
  0x57   :  { %v2017_v28 = vadd.f32 %v2009_v45, %v1989_v30  ;;  %vm503_vm1 = vmand %vm255_vm9, %vm495_vm0  ;;  %v919_v32 = vmul.f32 %v2715_v33, %v911_v9  ;;  %v947_v43 = vmul.f32 %v2715_v33, %v939_v59  ;;  %v5829_v30 = vld [vmem:[#allocation21_spill] sm:$0xff]  ;;  %v1479_v46 = vmul.f32 %v5830_v57, %v1011_v49  ;;  %v5833_v9 = vld [vmem:[#allocation35_spill] sm:$0xff] }
  0x58   :  { %v1459_v45 = vmul.f32 %v5829_v30, %v3594_v24  ;;  %v2723_v39 = vsel %vm503_vm1, 1.0, %v5782_v51  ;;  %vm527_vm2 = vmxor %vm271_vm11, %vm2988_vm5  ;;  %v1815_v20 = vmul.f32 %v5831_v21, %v955_v4  ;;  %v1863_v59 = vmul.f32 %v5833_v9, %v1011_v49 }
  0x59   :  { %2341 = vst.msk [vmem:[#allocation2 + $0x10] sm:$0xff] %vm2081_vm6, %v2017_v28  ;;  %vm535_vm3 = vmand %vm263_vm10, %vm527_vm2  ;;  %v3666_v33 = vadd.f32 %v919_v32, %v891_v10  ;;  %v975_v57 = vmul.f32 %v2723_v39, %v967_v54  ;;  %v1003_v28 = vmul.f32 %v2723_v39, %v995_v8  ;;  %v3670_v30 = vrot.slane %v3122_v27, %v3038_v6  ;;  %v5839_v54 = vld [vmem:[#allocation29_spill] sm:$0xff] }
  0x5a   :  { %v3673_v15 = vsel %vm535_vm3, 1.0, %v5782_v51  ;;  %v3677_v4 = vrot.slane %v3370_v22, %v3038_v6  ;;  %v3681_v49 = vrot.slane %v3180_v41, %v3040_v7  ;;  %v3685_v32 = vrot.slane %v3199_v47, %v3040_v7  ;;  %vm3729_vm9 = vmxor %vm239_vm7, %vm2988_vm5 }
  0x5b   :  { %5834 = vst [vmem:[#allocation70_spill] sm:$0xff] %v3666_v33  ;;  %5835 = vst [vmem:[#allocation71_spill] sm:$0xff] %v3670_v30  ;;  %v983_v39 = vadd.f32 %v975_v57, %v947_v43  ;;  %v1031_v8 = vmul.f32 %v3673_v15, %v1023_v60  ;;  %v1419_v27 = vmul.f32 %v1411_v31, %v3666_v33  ;;  %v5841_v60 = vld [vmem:[#allocation36_spill] sm:$0xff] }
  0x5c   :  { %5836 = vst [vmem:[#allocation72_spill] sm:$0xff] %v3677_v4  ;;  %5837 = vst [vmem:[#allocation73_spill] sm:$0xff] %v3681_v49  ;;  %v1357_v10 = vmul.f32 %v3670_v30, %v3344_v61  ;;  %v1377_v6 = vmul.f32 %v3677_v4, %v5839_v54  ;;  %v1741_v22 = vmul.f32 %v3681_v49, %v3340_v38 }
  0x5d   :  { %5838 = vst [vmem:[#allocation74_spill] sm:$0xff] %v3685_v32  ;;  %v1761_v9 = vmul.f32 %v3685_v32, %v5839_v54  ;;  %v3699_v7 = vrot.slane %v3180_v41, %v3057_v11  ;;  %v3701_v47 = vadd.f32 %v1031_v8, %v1003_v28  ;;  %v1439_v43 = vmul.f32 %v1431_v56, %v983_v39  ;;  %v5842_v41 = vld [vmem:[#allocation37_spill] sm:$0xff]  ;;  %v5843_v56 = vld [vmem:[#allocation38_spill] sm:$0xff] }
  0x5e   :  { %v1467_v57 = vmul.f32 %v1459_v45, %v983_v39  ;;  %v1365_v31 = vmul.f32 %v1357_v10, %v3445_v0  ;;  %v1385_v33 = vmul.f32 %v1377_v6, %v5841_v60  ;;  %v1749_v4 = vmul.f32 %v1741_v22, %v3481_v44  ;;  %v5844_v39 = vld [vmem:[#allocation39_spill] sm:$0xff]  ;;  %v5856_v10 = vld [vmem:[#allocation49_spill] sm:$0xff] }
  0x5f   :  { %5840 = vst [vmem:[#allocation29_spill] sm:$0xff] %v3699_v7  ;;  %v1789_v38 = vmul.f32 %v3699_v7, %v3344_v61  ;;  %v67_v54 = vsub.f32 %v3560_v12, %v3449_v36  ;;  %v1447_v32 = vadd.f32 %v1439_v43, %v1419_v27  ;;  %v1487_v11 = vmul.f32 %v1479_v46, %v3701_v47 }
  0x60   :  { %v79_v28 = vsub.f32 %v3560_v12, %v5842_v41  ;;  %v3715_v45 = vsub.f32 %v3560_v12, %v5843_v56  ;;  %v1393_v0 = vadd.f32 %v1385_v33, %v1365_v31  ;;  %v3719_v44 = vsub.f32 %v3560_v12, %v5844_v39  ;;  %v5850_v31 = vld [vmem:[#allocation42_spill] sm:$0xff] }
  0x61   :  { %vm207_vm4 = vcmp.ge.f32.partialorder %v67_v54, 0.0  ;;  %v659_v61 = vmul.f32 %v3453_v1, %v67_v54  ;;  %v3722_v8 = vadd.f32 %v1487_v11, %v1467_v57  ;;  %v3724_v27 = vmul.f32 %v1815_v20, %v1447_v32  ;;  %v5859_v41 = vld [vmem:[#allocation46_spill] sm:$0xff] }
  0x62   :  { %v1851_v46 = vmul.f32 %v1843_v16, %v1447_v32  ;;  %vm215_vm8 = vcmp.ge.f32.partialorder %v79_v28, 0.0  ;;  %v1769_v33 = vmul.f32 %v1761_v9, %v1393_v0  ;;  %v3733_v6 = vmul.f32 %v1789_v38, %v1393_v0  ;;  %v5849_v32 = vld [vmem:[#allocation40_spill] sm:$0xff] }
  0x63   :  { %5845 = vst [vmem:[#allocation36_spill] sm:$0xff] %v3724_v27  ;;  %vm223_vm10 = vcmp.ge.f32.partialorder %v3715_v45, 0.0  ;;  %vm231_vm12 = vcmp.ge.f32.partialorder %v3719_v44, 0.0  ;;  %vm303_vm13 = vmxor %vm215_vm8, %vm2988_vm5  ;;  %v1871_v16 = vmul.f32 %v1863_v59, %v3722_v8  ;;  %v675_v20 = vsub.f32 0.0, %v3715_v45  ;;  %v5851_v27 = vld [vmem:[#allocation41_spill] sm:$0xff] }
  0x64   :  { %5848 = vst [vmem:[#allocation75_spill] sm:$0xff] %v3733_v6  ;;  %vm311_vm14 = vmand %vm207_vm4, %vm303_vm13  ;;  %v715_v22 = vmul.f32 %v5849_v32, %v79_v28  ;;  %v731_v43 = vsub.f32 0.0, %v3719_v44  ;;  %v1777_v57 = vadd.f32 %v1769_v33, %v1749_v4  ;;  %v771_v60 = vmul.f32 %v5850_v31, %v3715_v45  ;;  %v5852_v33 = vld [vmem:[#allocation44_spill] sm:$0xff] }
  0x65   :  { %v2675_v9 = vsel %vm311_vm14, 1.0, %v5782_v51  ;;  %vm335_vm7 = vmxor %vm223_vm10, %vm2988_vm5  ;;  %v787_v38 = vsub.f32 0.0, %v3587_v48  ;;  %v1879_v59 = vadd.f32 %v1871_v16, %v1851_v46  ;;  %v687_v0 = vmul.f32 %v3467_v13, %v675_v20  ;;  %v5853_v20 = vld [vmem:[#allocation47_spill] sm:$0xff] }
  0x66   :  { %vm343_vm15 = vmand %vm215_vm8, %vm335_vm7  ;;  %v667_v11 = vmul.f32 %v2675_v9, %v659_v61  ;;  %v743_v6 = vmul.f32 %v5851_v27, %v731_v43  ;;  %2180 = vrot.lane.b32.xlu1 %v1777_v57, %s2992_s24  ;;  %v1219_v48 = vmul.f32 %v3471_v35, %v67_v54  ;;  %v1239_v46 = vmul.f32 %v3475_v34, %v731_v43  ;;  %v5854_v9 = vld [vmem:[#allocation48_spill] sm:$0xff] }
  0x67   :  { %v2683_v4 = vsel %vm343_vm15, 1.0, %v5782_v51  ;;  %vm367_vm0 = vmxor %vm231_vm12, %vm2988_vm5  ;;  %v799_v31 = vmul.f32 %v5852_v33, %v787_v38  ;;  %2241 = vrot.lane.b32.xlu0 %v1879_v59, %s2991_s3  ;;  %v1267_v57 = vmul.f32 %v5853_v20, %v79_v28  ;;  %v1287_v27 = vmul.f32 %v5854_v9, %v787_v38  ;;  %v5855_v33 = vld [vmem:[#allocation45_spill] sm:$0xff] }
  0x68   :  { %vm375_vm1 = vmand %vm223_vm10, %vm367_vm0  ;;  %v695_v61 = vmul.f32 %v2683_v4, %v687_v0  ;;  %v723_v16 = vmul.f32 %v2683_v4, %v715_v22  ;;  %v1651_v43 = vmul.f32 %v3479_v50, %v67_v54  ;;  %v1671_v59 = vmul.f32 %v3494_v19, %v787_v38  ;;  %v5857_v54 = vld [vmem:[#allocation51_spill] sm:$0xff]  ;;  %v5858_v38 = vld [vmem:[#allocation13_spill] sm:$0xff] }
  0x69   :  { %v2691_v13 = vsel %vm375_vm1, 1.0, %v5782_v51  ;;  %vm407_vm2 = vmand %vm231_vm12, %vm3729_vm9  ;;  %v827_v34 = vmul.f32 %v5855_v33, %v3719_v44  ;;  %v843_v32 = vsub.f32 0.0, %v3594_v24  ;;  %v1315_v1 = vmul.f32 %v5856_v10, %v3715_v45 }
  0x6a   :  { %v2699_v22 = vsel %vm407_vm2, 1.0, %v5782_v51  ;;  %v703_v0 = vadd.f32 %v695_v61, %v667_v11  ;;  %v751_v4 = vmul.f32 %v2691_v13, %v743_v6  ;;  %v779_v20 = vmul.f32 %v2691_v13, %v771_v60  ;;  %v5860_v11 = vld [vmem:[#allocation50_spill] sm:$0xff]  ;;  %v5861_v13 = vld [vmem:[#allocation52_spill] sm:$0xff] }
  0x6b   :  { %v807_v9 = vmul.f32 %v2699_v22, %v799_v31  ;;  %v835_v35 = vmul.f32 %v2699_v22, %v827_v34  ;;  %v1699_v50 = vmul.f32 %v5857_v54, %v79_v28  ;;  %v175_v19 = vsub.f32 %v3560_v12, %v5858_v38  ;;  %v5862_v61 = vld [vmem:[#allocation16_spill] sm:$0xff] }
  0x6c   :  { %v759_v39 = vadd.f32 %v751_v4, %v723_v16  ;;  %v1227_v56 = vmul.f32 %v1219_v48, %v703_v0  ;;  %v855_v36 = vmul.f32 %v5859_v41, %v843_v32  ;;  %v1335_v6 = vmul.f32 %v5860_v11, %v843_v32 }
  0x6d   :  { %v815_v33 = vadd.f32 %v807_v9, %v779_v20  ;;  %v1719_v31 = vmul.f32 %v5861_v13, %v843_v32  ;;  %vm279_vm3 = vcmp.ge.f32.partialorder %v175_v19, 0.0  ;;  %v1051_v22 = vmul.f32 %v5862_v61, %v3602_v18 }
  0x6e   :  { %v1247_v34 = vmul.f32 %v1239_v46, %v759_v39  ;;  %v1275_v60 = vmul.f32 %v1267_v57, %v759_v39  ;;  %v863_v48 = vmul.f32 %v3629_v5, %v855_v36  ;;  %vm559_vm4 = vmxor %vm279_vm3, %vm2988_vm5  ;;  %v1067_v20 = vsub.f32 0.0, %v175_v19  ;;  %v5863_v39 = vld [vmem:[#allocation23_spill] sm:$0xff]  ;;  %v5864_v57 = vld [vmem:[#allocation25_spill] sm:$0xff] }
  0x6f   :  { %v1295_v16 = vmul.f32 %v1287_v27, %v815_v33  ;;  %v1323_v28 = vmul.f32 %v1315_v1, %v815_v33  ;;  %vm567_vm8 = vmand %vm271_vm11, %vm559_vm4  ;;  %v1059_v32 = vmul.f32 %v3673_v15, %v1051_v22  ;;  %v1507_v46 = vmul.f32 %v5863_v39, %v3598_v25  ;;  %v5865_v1 = vld [vmem:[#allocation19_spill] sm:$0xff] }
  0x70   :  { %v1255_v9 = vadd.f32 %v1247_v34, %v1227_v56  ;;  %v1891_v0 = vmul.f32 %v5864_v57, %v3594_v24  ;;  %v3797_v4 = vadd.f32 %v863_v48, %v835_v35  ;;  %v2739_v36 = vsel %vm567_vm8, 1.0, %v5782_v51  ;;  %v5866_v34 = vld [vmem:[#allocation24_spill] sm:$0xff]  ;;  %v5867_v24 = vld [vmem:[#allocation26_spill] sm:$0xff] }
  0x71   :  { %v1303_v27 = vadd.f32 %v1295_v16, %v1275_v60  ;;  %v1079_v5 = vmul.f32 %v5865_v1, %v1067_v20  ;;  %v1515_v56 = vmul.f32 %v1507_v46, %v3701_v47  ;;  %v1527_v61 = vmul.f32 %v5866_v34, %v1067_v20 }
  0x72   :  { %v1659_v33 = vmul.f32 %v1651_v43, %v1255_v9  ;;  %v1899_v15 = vmul.f32 %v1891_v0, %v3722_v8  ;;  %v1343_v39 = vmul.f32 %v1335_v6, %v3797_v4  ;;  %v1911_v60 = vmul.f32 %v5867_v24, %v1067_v20  ;;  %v5868_v43 = vld [vmem:[#allocation20_spill] sm:$0xff] }
  0x73   :  { %v1679_v22 = vmul.f32 %v1671_v59, %v1303_v27  ;;  %v1707_v13 = vmul.f32 %v1699_v50, %v1303_v27  ;;  %v1087_v11 = vmul.f32 %v2739_v36, %v1079_v5  ;;  %v187_v35 = vsub.f32 %v3560_v12, %v3498_v52 }
  0x74   :  { %v199_v16 = vsub.f32 %v3560_v12, %v3504_v23  ;;  %v1107_v47 = vmul.f32 %v5868_v43, %v3606_v58  ;;  %v3812_v9 = vadd.f32 %v1343_v39, %v1323_v28  ;;  %v1163_v59 = vmul.f32 %v3514_v40, %v175_v19 }
  0x75   :  { %v1687_v48 = vadd.f32 %v1679_v22, %v1659_v33  ;;  %v1095_v8 = vadd.f32 %v1087_v11, %v1059_v32  ;;  %vm287_vm11 = vcmp.ge.f32.partialorder %v187_v35, 0.0  ;;  %v1123_v6 = vsub.f32 0.0, %v187_v35  ;;  %v5869_v22 = vld [vmem:[#allocation64_spill] sm:$0xff] }
  0x76   :  { %vm295_vm9 = vcmp.ge.f32.partialorder %v199_v16, 0.0  ;;  %v1115_v50 = vmul.f32 %v2739_v36, %v1107_v47  ;;  %v1727_v20 = vmul.f32 %v1719_v31, %v3812_v9  ;;  %vm591_vm10 = vmxor %vm287_vm11, %vm2988_vm5  ;;  %v1179_v12 = vsub.f32 0.0, %v199_v16 }
  0x77   :  { %2110 = vrot.lane.b32.xlu0 %v1687_v48, %s2991_s3  ;;  %v1535_v46 = vmul.f32 %v1527_v61, %v1095_v8  ;;  %v1555_v28 = vmul.f32 %v3525_v2, %v3602_v18  ;;  %vm599_vm12 = vmand %vm279_vm3, %vm591_vm10  ;;  %v1135_v11 = vmul.f32 %v3508_v55, %v1123_v6  ;;  %v1575_v32 = vmul.f32 %v3529_v3, %v1123_v6 }
  0x78   :  { %v1603_v39 = vmul.f32 %v3539_v37, %v3606_v58  ;;  %v1939_v31 = vmul.f32 %v3565_v42, %v3598_v25  ;;  %v1735_v61 = vadd.f32 %v1727_v20, %v1707_v13  ;;  %v2747_v27 = vsel %vm599_vm12, 1.0, %v5782_v51  ;;  %vm623_vm13 = vmxor %vm295_vm9, %vm2988_vm5  ;;  %v3837_v25 = vld [vmem:[%s5580_s0 + $0x8] sm:$0xff] }
  0x79   :  { %v1543_v0 = vadd.f32 %v1535_v46, %v1515_v56  ;;  %v1191_v19 = vmul.f32 %v3518_v29, %v1179_v12  ;;  %vm631_vm14 = vmand %vm287_vm11, %vm623_vm13  ;;  %v1143_v36 = vmul.f32 %v2747_v27, %v1135_v11  ;;  %v1171_v5 = vmul.f32 %v2747_v27, %v1163_v59 }
  0x7a   :  { %v1563_v33 = vmul.f32 %v1555_v28, %v1095_v8  ;;  %v1623_v47 = vmul.f32 %v5869_v22, %v1179_v12  ;;  %2151 = vrot.lane.b32.xlu1 %v1735_v61, %s2990_s17  ;;  %v2755_v13 = vsel %vm631_vm14, 1.0, %v5782_v51  ;;  %v1959_v16 = vmul.f32 %v3569_v26, %v1123_v6  ;;  %v5870_v28 = vld [vmem:[#allocation10_spill] sm:$0xff]  ;;  %v5871_v61 = vld [vmem:[#allocation11_spill] sm:$0xff] }
  0x7b   :  { %v1919_v58 = vmul.f32 %v1911_v60, %v1543_v0  ;;  %v1947_v56 = vmul.f32 %v1939_v31, %v1543_v0  ;;  %v1151_v35 = vadd.f32 %v1143_v36, %v1115_v50  ;;  %v1199_v48 = vmul.f32 %v2755_v13, %v1191_v19  ;;  %v5875_v36 = vld [vmem:[#allocation14_spill] sm:$0xff] }
  0x7c   :  { %v1987_v8 = vmul.f32 %v3573_v62, %v3602_v18  ;;  %v2007_v59 = vmul.f32 %v3578_v53, %v1179_v12  ;;  %v3847_v46 = vsub.f32 %v3837_v25, %v3242_v63  ;;  %v3851_v60 = vsub.f32 %v3837_v25, %v3068_v14 }
  0x7d   :  { %v1927_v20 = vadd.f32 %v1919_v58, %v1899_v15  ;;  %v3855_v11 = vsub.f32 %v3837_v25, %v5870_v28  ;;  %v1207_v50 = vadd.f32 %v1199_v48, %v1171_v5  ;;  %v1583_v6 = vmul.f32 %v1575_v32, %v1151_v35  ;;  %v5872_v15 = vld [vmem:[#allocation12_spill] sm:$0xff] }
  0x7e   :  { %v1611_v31 = vmul.f32 %v1603_v39, %v1151_v35  ;;  %v3859_v18 = vsub.f32 %v3837_v25, %v5871_v61  ;;  %v3864_v12 = vsub.f32 %v3837_v25, %v5872_v15  ;;  %vm234_vm7 = vcmp.ge.f32.partialorder %v3847_v46, 0.0  ;;  %v5873_v32 = vld [vmem:[#allocation28_spill] sm:$0xff]  ;;  %v5882_v61 = vld [vmem:[#allocation21_spill] sm:$0xff] }
  0x7f   :  { %2281 = vrot.lane.b32.xlu0 %v1927_v20, %s2990_s17  ;;  %vm242_vm15 = vcmp.ge.f32.partialorder %v3851_v60, 0.0  ;;  %vm250_vm0 = vcmp.ge.f32.partialorder %v3855_v11, 0.0  ;;  %v1591_v0 = vadd.f32 %v1583_v6, %v1563_v33  ;;  %v1631_v27 = vmul.f32 %v1623_v47, %v1207_v50  ;;  %v5876_v20 = vld [vmem:[#allocation30_spill] sm:$0xff]  ;;  %v5877_v6 = vld [vmem:[#allocation17_spill] sm:$0xff]  ;;  %v5880_v15 = vld [vmem:[#allocation32_spill] sm:$0xff] }
  0x80   :  { %vm258_vm1 = vcmp.ge.f32.partialorder %v3859_v18, 0.0  ;;  %vm426_vm2 = vmxor %vm242_vm15, %vm2988_vm5  ;;  %v878_v39 = vmul.f32 %v5873_v32, %v3847_v46  ;;  %vm266_vm3 = vcmp.ge.f32.partialorder %v3864_v12, 0.0  ;;  %v3879_v19 = vsub.f32 0.0, %v3855_v11 }
  0x81   :  { %vm434_vm4 = vmand %vm234_vm7, %vm426_vm2  ;;  %v934_v5 = vmul.f32 %v5875_v36, %v3851_v60  ;;  %v950_v33 = vsub.f32 0.0, %v3859_v18  ;;  %v1639_v47 = vadd.f32 %v1631_v27, %v1611_v31  ;;  %v1967_v58 = vmul.f32 %v1959_v16, %v1591_v0  ;;  %v5878_v16 = vld [vmem:[#allocation15_spill] sm:$0xff] }
  0x82   :  { %5874 = vst [vmem:[#allocation49_spill] sm:$0xff] %v3879_v19  ;;  %v1995_v13 = vmul.f32 %v1987_v8, %v1591_v0  ;;  %v3885_v35 = vsel %vm434_vm4, 1.0, %v5782_v51  ;;  %vm458_vm8 = vmxor %vm250_vm0, %vm2988_vm5  ;;  %v906_v50 = vmul.f32 %v5876_v20, %v3879_v19  ;;  %v990_v8 = vmul.f32 %v5878_v16, %v3855_v11 }
  0x83   :  { %vm466_vm11 = vmand %vm242_vm15, %vm458_vm8  ;;  %v886_v48 = vmul.f32 %v3885_v35, %v878_v39  ;;  %v962_v36 = vmul.f32 %v5877_v6, %v950_v33  ;;  %v1975_v31 = vadd.f32 %v1967_v58, %v1947_v56  ;;  %v2015_v0 = vmul.f32 %v2007_v59, %v1639_v47  ;;  %v5879_v6 = vld [vmem:[#allocation31_spill] sm:$0xff]  ;;  %v5881_v47 = vld [vmem:[#allocation18_spill] sm:$0xff] }
  0x84   :  { %v2710_v27 = vsel %vm466_vm11, 1.0, %v5782_v51  ;;  %vm490_vm9 = vmxor %vm258_vm1, %vm2988_vm5  ;;  %v1006_v32 = vsub.f32 0.0, %v3864_v12  ;;  %v1406_v20 = vmul.f32 %v5879_v6, %v3847_v46  ;;  %v1426_v16 = vmul.f32 %v5880_v15, %v950_v33 }
  0x85   :  { %vm498_vm10 = vmand %vm250_vm0, %vm490_vm9  ;;  %v914_v39 = vmul.f32 %v2710_v27, %v906_v50  ;;  %v942_v19 = vmul.f32 %v2710_v27, %v934_v5  ;;  %v2023_v56 = vadd.f32 %v2015_v0, %v1995_v13  ;;  %2321 = vrot.lane.b32.xlu1 %v1975_v31, %s2992_s24  ;;  %v1454_v50 = vmul.f32 %v5882_v61, %v3851_v60  ;;  %v5884_v0 = vld [vmem:[#allocation22_spill] sm:$0xff]  ;;  %v5885_v61 = vld [vmem:[#allocation35_spill] sm:$0xff] }
  0x86   :  { %v2718_v59 = vsel %vm498_vm10, 1.0, %v5782_v51  ;;  %vm522_vm12 = vmxor %vm266_vm3, %vm2988_vm5  ;;  %v1018_v58 = vmul.f32 %v5881_v47, %v1006_v32  ;;  %v1474_v31 = vmul.f32 %v5884_v0, %v1006_v32  ;;  %v1810_v6 = vmul.f32 %v5831_v21, %v950_v33  ;;  %v5888_v33 = vld [vmem:[#allocation74_spill] sm:$0xff] }
  0x87   :  { %vm530_vm13 = vmand %vm258_vm1, %vm522_vm12  ;;  %v3918_v5 = vadd.f32 %v914_v39, %v886_v48  ;;  %v970_v27 = vmul.f32 %v2718_v59, %v962_v36  ;;  %v998_v13 = vmul.f32 %v2718_v59, %v990_v8  ;;  %2347 = vst.msk [vmem:[#allocation2 + $0xa0] sm:$0xff] %vm2081_vm6, %v2023_v56  ;;  %v1838_v47 = vmul.f32 %v5832_v17, %v3847_v46  ;;  %v5886_v39 = vld [vmem:[#allocation69_spill] sm:$0xff]  ;;  %v5887_v56 = vld [vmem:[#allocation72_spill] sm:$0xff] }
  0x88   :  { %v3923_v15 = vsel %vm530_vm13, 1.0, %v5782_v51  ;;  %v1858_v28 = vmul.f32 %v5885_v61, %v1006_v32  ;;  %v1363_v8 = vmul.f32 %v3670_v30, %v3719_v44  ;;  %v1383_v59 = vmul.f32 %v5887_v56, %v5886_v39  ;;  %v5890_v56 = vld [vmem:[#allocation53_spill] sm:$0xff]  ;;  %vm3962_vm0 = vmxor %vm234_vm7, %vm2988_vm5 }
  0x89   :  { %5883 = vst [vmem:[#allocation51_spill] sm:$0xff] %v3918_v5  ;;  %v978_v14 = vadd.f32 %v970_v27, %v942_v19  ;;  %v1026_v48 = vmul.f32 %v3923_v15, %v1018_v58  ;;  %v1414_v36 = vmul.f32 %v1406_v20, %v3918_v5  ;;  %v1747_v0 = vmul.f32 %v3681_v49, %v3715_v45  ;;  %v5889_v5 = vld [vmem:[#allocation70_spill] sm:$0xff]  ;;  %v5891_v45 = vld [vmem:[#allocation37_spill] sm:$0xff] }
  0x8a   :  { %v1767_v21 = vmul.f32 %v5888_v33, %v5886_v39  ;;  %v1795_v32 = vmul.f32 %v3699_v7, %v3719_v44  ;;  %v1371_v20 = vmul.f32 %v1363_v8, %v3797_v4  ;;  %v1391_v30 = vmul.f32 %v1383_v59, %v5889_v5  ;;  %v5892_v44 = vld [vmem:[#allocation38_spill] sm:$0xff] }
  0x8b   :  { %v3941_v19 = vadd.f32 %v1026_v48, %v998_v13  ;;  %v1434_v58 = vmul.f32 %v1426_v16, %v978_v14  ;;  %v1462_v27 = vmul.f32 %v1454_v50, %v978_v14  ;;  %v1755_v61 = vmul.f32 %v1747_v0, %v3812_v9  ;;  %v5893_v14 = vld [vmem:[#allocation39_spill] sm:$0xff]  ;;  %v5896_v50 = vld [vmem:[#allocation54_spill] sm:$0xff]  ;;  %v5910_v9 = vld [vmem:[#allocation45_spill] sm:$0xff] }
  0x8c   :  { %v62_v17 = vsub.f32 %v3837_v25, %v5890_v56  ;;  %v74_v49 = vsub.f32 %v3837_v25, %v5891_v45  ;;  %v3953_v13 = vsub.f32 %v3837_v25, %v5892_v44  ;;  %v3957_v4 = vsub.f32 %v3837_v25, %v5893_v14  ;;  %v5909_v44 = vld [vmem:[#allocation59_spill] sm:$0xff] }
  0x8d   :  { %v1442_v39 = vadd.f32 %v1434_v58, %v1414_v36  ;;  %v1482_v33 = vmul.f32 %v1474_v31, %v3941_v19  ;;  %v1399_v16 = vadd.f32 %v1391_v30, %v1371_v20 }
  0x8e   :  { %vm202_vm14 = vcmp.ge.f32.partialorder %v62_v17, 0.0  ;;  %vm210_vm15 = vcmp.ge.f32.partialorder %v74_v49, 0.0  ;;  %v654_v5 = vmul.f32 %v5896_v50, %v62_v17  ;;  %vm218_vm1 = vcmp.ge.f32.partialorder %v3953_v13, 0.0 }
  0x8f   :  { %v3967_v0 = vadd.f32 %v1482_v33, %v1462_v27  ;;  %v3969_v31 = vmul.f32 %v1810_v6, %v1442_v39  ;;  %v1846_v48 = vmul.f32 %v1838_v47, %v1442_v39  ;;  %vm298_vm2 = vmxor %vm210_vm15, %vm2988_vm5  ;;  %v1775_v30 = vmul.f32 %v1767_v21, %v1399_v16  ;;  %v5899_v6 = vld [vmem:[#allocation40_spill] sm:$0xff]  ;;  %v5900_v27 = vld [vmem:[#allocation55_spill] sm:$0xff] }
  0x90   :  { %v3974_v36 = vmul.f32 %v1795_v32, %v1399_v16  ;;  %vm226_vm7 = vcmp.ge.f32.partialorder %v3957_v4, 0.0  ;;  %vm306_vm4 = vmand %vm202_vm14, %vm298_vm2  ;;  %v670_v8 = vsub.f32 0.0, %v3953_v13  ;;  %v710_v47 = vmul.f32 %v5899_v6, %v74_v49  ;;  %v5901_v39 = vld [vmem:[#allocation42_spill] sm:$0xff] }
  0x91   :  { %5897 = vst [vmem:[#allocation46_spill] sm:$0xff] %v3969_v31  ;;  %v1866_v59 = vmul.f32 %v1858_v28, %v3967_v0  ;;  %v2670_v33 = vsel %vm306_vm4, 1.0, %v5782_v51  ;;  %vm330_vm8 = vmxor %vm218_vm1, %vm2988_vm5  ;;  %v726_v58 = vsub.f32 0.0, %v3957_v4  ;;  %v1783_v21 = vadd.f32 %v1775_v30, %v1755_v61  ;;  %v5903_v30 = vld [vmem:[#allocation56_spill] sm:$0xff] }
  0x92   :  { %5898 = vst [vmem:[#allocation19_spill] sm:$0xff] %v3974_v36  ;;  %vm338_vm11 = vmand %vm210_vm15, %vm330_vm8  ;;  %v662_v32 = vmul.f32 %v2670_v33, %v654_v5  ;;  %v682_v20 = vmul.f32 %v5900_v27, %v670_v8  ;;  %v766_v16 = vmul.f32 %v5901_v39, %v3953_v13  ;;  %v5902_v36 = vld [vmem:[#allocation41_spill] sm:$0xff]  ;;  %v782_v50 = vsub.f32 0.0, %v3847_v46  ;;  %v5905_v46 = vld [vmem:[#allocation44_spill] sm:$0xff] }
  0x93   :  { %v1874_v28 = vadd.f32 %v1866_v59, %v1846_v48  ;;  %v2678_v31 = vsel %vm338_vm11, 1.0, %v5782_v51  ;;  %vm362_vm9 = vmxor %vm226_vm7, %vm2988_vm5  ;;  %v738_v6 = vmul.f32 %v5902_v36, %v726_v58  ;;  %2192 = vrot.lane.b32.xlu1 %v1783_v21, %s2992_s24  ;;  %v1214_v8 = vmul.f32 %v5903_v30, %v62_v17  ;;  %v5904_v48 = vld [vmem:[#allocation57_spill] sm:$0xff]  ;;  %v5906_v36 = vld [vmem:[#allocation47_spill] sm:$0xff] }
  0x94   :  { %vm370_vm10 = vmand %vm218_vm1, %vm362_vm9  ;;  %v690_v61 = vmul.f32 %v2678_v31, %v682_v20  ;;  %v718_v5 = vmul.f32 %v2678_v31, %v710_v47  ;;  %v1234_v59 = vmul.f32 %v5904_v48, %v726_v58  ;;  %v794_v21 = vmul.f32 %v5905_v46, %v782_v50  ;;  %v5907_v27 = vld [vmem:[#allocation48_spill] sm:$0xff] }
  0x95   :  { %2231 = vrot.lane.b32.xlu0 %v1874_v28, %s2991_s3  ;;  %v2686_v33 = vsel %vm370_vm10, 1.0, %v5782_v51  ;;  %vm402_vm12 = vmand %vm226_vm7, %vm3962_vm0  ;;  %v1262_v39 = vmul.f32 %v5906_v36, %v74_v49  ;;  %v1282_v20 = vmul.f32 %v5907_v27, %v782_v50  ;;  %v5908_v28 = vld [vmem:[#allocation58_spill] sm:$0xff]  ;;  %v1666_v45 = vmul.f32 %v5909_v44, %v782_v50 }
  0x96   :  { %v2694_v31 = vsel %vm402_vm12, 1.0, %v5782_v51  ;;  %v698_v47 = vadd.f32 %v690_v61, %v662_v32  ;;  %v746_v30 = vmul.f32 %v2686_v33, %v738_v6  ;;  %v774_v58 = vmul.f32 %v2686_v33, %v766_v16  ;;  %v5911_v61 = vld [vmem:[#allocation50_spill] sm:$0xff] }
  0x97   :  { %v802_v48 = vmul.f32 %v2694_v31, %v794_v21  ;;  %v1646_v14 = vmul.f32 %v5908_v28, %v62_v17  ;;  %v822_v56 = vmul.f32 %v5910_v9, %v3957_v4  ;;  %v838_v46 = vsub.f32 0.0, %v3851_v60 }
  0x98   :  { %v754_v7 = vadd.f32 %v746_v30, %v718_v5  ;;  %v1222_v63 = vmul.f32 %v1214_v8, %v698_v47  ;;  %v1310_v27 = vmul.f32 %v5856_v10, %v3953_v13  ;;  %v1694_v6 = vmul.f32 %v5857_v54, %v74_v49  ;;  %v5912_v8 = vld [vmem:[#allocation52_spill] sm:$0xff] }
  0x99   :  { %v810_v36 = vadd.f32 %v802_v48, %v774_v58  ;;  %v830_v53 = vmul.f32 %v2694_v31, %v822_v56  ;;  %v170_v32 = vsub.f32 %v3837_v25, %v5858_v38  ;;  %v850_v50 = vmul.f32 %v5859_v41, %v838_v46  ;;  %v5913_v49 = vld [vmem:[#allocation16_spill] sm:$0xff] }
  0x9a   :  { %v1242_v17 = vmul.f32 %v1234_v59, %v754_v7  ;;  %v1270_v16 = vmul.f32 %v1262_v39, %v754_v7  ;;  %v1330_v33 = vmul.f32 %v5911_v61, %v838_v46  ;;  %v1714_v21 = vmul.f32 %v5912_v8, %v838_v46  ;;  %v5914_v39 = vld [vmem:[#allocation23_spill] sm:$0xff] }
  0x9b   :  { %v1290_v5 = vmul.f32 %v1282_v20, %v810_v36  ;;  %v1318_v30 = vmul.f32 %v1310_v27, %v810_v36  ;;  %vm274_vm13 = vcmp.ge.f32.partialorder %v170_v32, 0.0  ;;  %v858_v48 = vmul.f32 %v3885_v35, %v850_v50 }
  0x9c   :  { %v1250_v47 = vadd.f32 %v1242_v17, %v1222_v63  ;;  %vm554_vm14 = vmxor %vm274_vm13, %vm2988_vm5  ;;  %v1046_v56 = vmul.f32 %v5913_v49, %v3859_v18  ;;  %v1062_v59 = vsub.f32 0.0, %v170_v32  ;;  %v1502_v36 = vmul.f32 %v5914_v39, %v3855_v11 }
  0x9d   :  { %v1298_v7 = vadd.f32 %v1290_v5, %v1270_v16  ;;  %vm562_vm15 = vmand %vm266_vm3, %vm554_vm14  ;;  %v1886_v27 = vmul.f32 %v5864_v57, %v3851_v60  ;;  %v182_v63 = vsub.f32 %v3837_v25, %v3498_v52  ;;  %v4036_v46 = vadd.f32 %v858_v48, %v830_v53 }
  0x9e   :  { %v1654_v35 = vmul.f32 %v1646_v14, %v1250_v47  ;;  %v2734_v20 = vsel %vm562_vm15, 1.0, %v5782_v51  ;;  %v1054_v31 = vmul.f32 %v3923_v15, %v1046_v56  ;;  %v1074_v16 = vmul.f32 %v5865_v1, %v1062_v59 }
  0x9f   :  { %v1674_v58 = vmul.f32 %v1666_v45, %v1298_v7  ;;  %v1702_v17 = vmul.f32 %v1694_v6, %v1298_v7  ;;  %v1510_v50 = vmul.f32 %v1502_v36, %v3941_v19  ;;  %v1338_v5 = vmul.f32 %v1330_v33, %v4036_v46 }
  0xa0   :  { %v1522_v60 = vmul.f32 %v5866_v34, %v1062_v59  ;;  %v1894_v57 = vmul.f32 %v1886_v27, %v3967_v0  ;;  %v1906_v14 = vmul.f32 %v5867_v24, %v1062_v59  ;;  %v1082_v47 = vmul.f32 %v2734_v20, %v1074_v16 }
  0xa1   :  { %v1682_v53 = vadd.f32 %v1674_v58, %v1654_v35  ;;  %v194_v48 = vsub.f32 %v3837_v25, %v3504_v23  ;;  %vm282_vm3 = vcmp.ge.f32.partialorder %v182_v63, 0.0  ;;  %v4048_v15 = vadd.f32 %v1338_v5, %v1318_v30  ;;  %v4070_v5 = vld [vmem:[%s5580_s0 + $0x38] sm:$0xff] }
  0xa2   :  { %vm586_vm0 = vmxor %vm282_vm3, %vm2988_vm5  ;;  %v1102_v19 = vmul.f32 %v5868_v43, %v3864_v12  ;;  %v1118_v45 = vsub.f32 0.0, %v182_v63  ;;  %v1158_v6 = vmul.f32 %v3514_v40, %v170_v32  ;;  %v1090_v0 = vadd.f32 %v1082_v47, %v1054_v31 }
  0xa3   :  { %2100 = vrot.lane.b32.xlu0 %v1682_v53, %s2991_s3  ;;  %vm290_vm1 = vcmp.ge.f32.partialorder %v194_v48, 0.0  ;;  %vm594_vm2 = vmand %vm274_vm13, %vm586_vm0  ;;  %v1174_v33 = vsub.f32 0.0, %v194_v48  ;;  %v1550_v25 = vmul.f32 %v3525_v2, %v3859_v18  ;;  %v1722_v30 = vmul.f32 %v1714_v21, %v4048_v15 }
  0xa4   :  { %v2742_v56 = vsel %vm594_vm2, 1.0, %v5782_v51  ;;  %vm618_vm7 = vmxor %vm290_vm1, %vm2988_vm5  ;;  %v1110_v59 = vmul.f32 %v2734_v20, %v1102_v19  ;;  %v1130_v7 = vmul.f32 %v3508_v55, %v1118_v45  ;;  %v1530_v36 = vmul.f32 %v1522_v60, %v1090_v0 }
  0xa5   :  { %vm626_vm4 = vmand %vm282_vm3, %vm618_vm7  ;;  %v1166_v27 = vmul.f32 %v2742_v56, %v1158_v6  ;;  %v1186_v32 = vmul.f32 %v3518_v29, %v1174_v33  ;;  %v1558_v35 = vmul.f32 %v1550_v25, %v1090_v0  ;;  %v1730_v31 = vadd.f32 %v1722_v30, %v1702_v17  ;;  %v5916_v30 = vld [vmem:[#allocation27_spill] sm:$0xff] }
  0xa6   :  { %v2750_v58 = vsel %vm626_vm4, 1.0, %v5782_v51  ;;  %v1138_v16 = vmul.f32 %v2742_v56, %v1130_v7  ;;  %v1570_v21 = vmul.f32 %v3529_v3, %v1118_v45  ;;  %v1538_v20 = vadd.f32 %v1530_v36, %v1510_v50  ;;  %v5915_v50 = vld [vmem:[#allocation68_spill] sm:$0xff] }
  0xa7   :  { %v1194_v53 = vmul.f32 %v2750_v58, %v1186_v32  ;;  %v1598_v63 = vmul.f32 %v3539_v37, %v3864_v12  ;;  %v1618_v60 = vmul.f32 %v5869_v22, %v1174_v33  ;;  %2141 = vrot.lane.b32.xlu1 %v1730_v31, %s2990_s17  ;;  %v1934_v47 = vmul.f32 %v3565_v42, %v3855_v11  ;;  %v5918_v31 = vld [vmem:[#allocation10_spill] sm:$0xff]  ;;  %v5920_v58 = vld [vmem:[#allocation12_spill] sm:$0xff] }
  0xa8   :  { %v1146_v17 = vadd.f32 %v1138_v16, %v1110_v59  ;;  %v1954_v48 = vmul.f32 %v3569_v26, %v1118_v45  ;;  %v1982_v19 = vmul.f32 %v3573_v62, %v3859_v18  ;;  %v1914_v6 = vmul.f32 %v1906_v14, %v1538_v20  ;;  %v5917_v59 = vld [vmem:[#allocation9_spill] sm:$0xff]  ;;  %v5919_v14 = vld [vmem:[#allocation11_spill] sm:$0xff] }
  0xa9   :  { %v1202_v0 = vadd.f32 %v1194_v53, %v1166_v27  ;;  %v2002_v25 = vmul.f32 %v5915_v50, %v1174_v33  ;;  %v4084_v12 = vsub.f32 %v4070_v5, %v5916_v30  ;;  %v1942_v36 = vmul.f32 %v1934_v47, %v1538_v20  ;;  %v5923_v47 = vld [vmem:[#allocation14_spill] sm:$0xff]  ;;  %v5935_v30 = vld [vmem:[#allocation35_spill] sm:$0xff] }
  0xaa   :  { %v1578_v56 = vmul.f32 %v1570_v21, %v1146_v17  ;;  %v1606_v7 = vmul.f32 %v1598_v63, %v1146_v17  ;;  %v4088_v32 = vsub.f32 %v4070_v5, %v5917_v59  ;;  %v1922_v11 = vadd.f32 %v1914_v6, %v1894_v57  ;;  %v5934_v59 = vld [vmem:[#allocation34_spill] sm:$0xff] }
  0xab   :  { %v1626_v45 = vmul.f32 %v1618_v60, %v1202_v0  ;;  %v4092_v18 = vsub.f32 %v4070_v5, %v5918_v31  ;;  %v4096_v33 = vsub.f32 %v4070_v5, %v5919_v14  ;;  %v4100_v16 = vsub.f32 %v4070_v5, %v5920_v58 }
  0xac   :  { %v1586_v27 = vadd.f32 %v1578_v56, %v1558_v35  ;;  %vm240_vm8 = vcmp.ge.f32.partialorder %v4084_v12, 0.0  ;;  %vm248_vm11 = vcmp.ge.f32.partialorder %v4088_v32, 0.0  ;;  %2271 = vrot.lane.b32.xlu0 %v1922_v11, %s2990_s17  ;;  %v5921_v35 = vld [vmem:[#allocation28_spill] sm:$0xff] }
  0xad   :  { %v1634_v57 = vadd.f32 %v1626_v45, %v1606_v7  ;;  %vm256_vm9 = vcmp.ge.f32.partialorder %v4092_v18, 0.0  ;;  %vm264_vm10 = vcmp.ge.f32.partialorder %v4096_v33, 0.0  ;;  %vm432_vm12 = vmxor %vm248_vm11, %vm2988_vm5  ;;  %v884_v21 = vmul.f32 %v5921_v35, %v4084_v12  ;;  %v5925_v7 = vld [vmem:[#allocation15_spill] sm:$0xff]  ;;  %v5930_v35 = vld [vmem:[#allocation21_spill] sm:$0xff] }
  0xae   :  { %v1962_v20 = vmul.f32 %v1954_v48, %v1586_v27  ;;  %v1990_v53 = vmul.f32 %v1982_v19, %v1586_v27  ;;  %vm272_vm13 = vcmp.ge.f32.partialorder %v4100_v16, 0.0  ;;  %vm440_vm14 = vmand %vm240_vm8, %vm432_vm12  ;;  %v4116_v63 = vsub.f32 0.0, %v4092_v18 }
  0xaf   :  { %v2010_v60 = vmul.f32 %v2002_v25, %v1634_v57  ;;  %v4119_v17 = vsel %vm440_vm14, 1.0, %v5782_v51  ;;  %vm464_vm15 = vmxor %vm256_vm9, %vm2988_vm5  ;;  %v940_v48 = vmul.f32 %v5923_v47, %v4088_v32  ;;  %v956_v19 = vsub.f32 0.0, %v4096_v33  ;;  %v5924_v25 = vld [vmem:[#allocation30_spill] sm:$0xff]  ;;  %v5926_v57 = vld [vmem:[#allocation17_spill] sm:$0xff] }
  0xb0   :  { %5922 = vst [vmem:[#allocation26_spill] sm:$0xff] %v4116_v63  ;;  %v1970_v6 = vadd.f32 %v1962_v20, %v1942_v36  ;;  %vm472_vm3 = vmand %vm248_vm11, %vm464_vm15  ;;  %v892_v0 = vmul.f32 %v4119_v17, %v884_v21  ;;  %v912_v56 = vmul.f32 %v5924_v25, %v4116_v63  ;;  %v996_v11 = vmul.f32 %v5925_v7, %v4092_v18  ;;  %v5927_v7 = vld [vmem:[#allocation31_spill] sm:$0xff] }
  0xb1   :  { %v2018_v45 = vadd.f32 %v2010_v60, %v1990_v53  ;;  %v2716_v27 = vsel %vm472_vm3, 1.0, %v5782_v51  ;;  %vm496_vm0 = vmxor %vm264_vm10, %vm2988_vm5  ;;  %v968_v36 = vmul.f32 %v5926_v57, %v956_v19  ;;  %v1012_v20 = vsub.f32 0.0, %v4100_v16  ;;  %v5928_v60 = vld [vmem:[#allocation32_spill] sm:$0xff]  ;;  %v5929_v57 = vld [vmem:[#allocation18_spill] sm:$0xff] }
  0xb2   :  { %2311 = vrot.lane.b32.xlu1 %v1970_v6, %s2992_s24  ;;  %vm504_vm1 = vmand %vm256_vm9, %vm496_vm0  ;;  %v920_v21 = vmul.f32 %v2716_v27, %v912_v56  ;;  %v948_v63 = vmul.f32 %v2716_v27, %v940_v48  ;;  %v1412_v53 = vmul.f32 %v5927_v7, %v4084_v12  ;;  %v1432_v25 = vmul.f32 %v5928_v60, %v956_v19  ;;  %v5931_v56 = vld [vmem:[#allocation22_spill] sm:$0xff]  ;;  %v5933_v7 = vld [vmem:[#allocation33_spill] sm:$0xff] }
  0xb3   :  { %2342 = vst.msk [vmem:[#allocation2 + $0x28] sm:$0xff] %vm2081_vm6, %v2018_v45  ;;  %v2724_v47 = vsel %vm504_vm1, 1.0, %v5782_v51  ;;  %vm528_vm2 = vmxor %vm272_vm13, %vm2988_vm5  ;;  %v1024_v6 = vmul.f32 %v5929_v57, %v1012_v20  ;;  %v1460_v58 = vmul.f32 %v5930_v35, %v4088_v32  ;;  %v1480_v48 = vmul.f32 %v5931_v56, %v1012_v20  ;;  %v5936_v35 = vld [vmem:[#allocation71_spill] sm:$0xff] }
  0xb4   :  { %vm536_vm7 = vmand %vm264_vm10, %vm528_vm2  ;;  %v4157_v27 = vadd.f32 %v920_v21, %v892_v0  ;;  %v976_v60 = vmul.f32 %v2724_v47, %v968_v36  ;;  %v1004_v45 = vmul.f32 %v2724_v47, %v996_v11  ;;  %v1816_v14 = vmul.f32 %v5933_v7, %v956_v19  ;;  %v5937_v36 = vld [vmem:[#allocation49_spill] sm:$0xff]  ;;  %v5938_v47 = vld [vmem:[#allocation72_spill] sm:$0xff] }
  0xb5   :  { %v4161_v31 = vsel %vm536_vm7, 1.0, %v5782_v51  ;;  %v1844_v57 = vmul.f32 %v5934_v59, %v4084_v12  ;;  %v1864_v50 = vmul.f32 %v5935_v30, %v1012_v20  ;;  %v1358_v56 = vmul.f32 %v5936_v35, %v3957_v4  ;;  %v5939_v21 = vld [vmem:[#allocation73_spill] sm:$0xff]  ;;  %v5940_v59 = vld [vmem:[#allocation74_spill] sm:$0xff]  ;;  %vm4200_vm10 = vmxor %vm240_vm8, %vm2988_vm5 }
  0xb6   :  { %5932 = vst [vmem:[#allocation20_spill] sm:$0xff] %v4157_v27  ;;  %v984_v62 = vadd.f32 %v976_v60, %v948_v63  ;;  %v1032_v26 = vmul.f32 %v4161_v31, %v1024_v6  ;;  %v1420_v0 = vmul.f32 %v1412_v53, %v4157_v27  ;;  %v1378_v11 = vmul.f32 %v5938_v47, %v5937_v36  ;;  %v5941_v20 = vld [vmem:[#allocation29_spill] sm:$0xff]  ;;  %v5942_v6 = vld [vmem:[#allocation51_spill] sm:$0xff] }
  0xb7   :  { %v1366_v19 = vmul.f32 %v1358_v56, %v4036_v46  ;;  %v1742_v7 = vmul.f32 %v5939_v21, %v3953_v13  ;;  %v1762_v42 = vmul.f32 %v5940_v59, %v5937_v36  ;;  %v1790_v30 = vmul.f32 %v5941_v20, %v3957_v4  ;;  %v5943_v47 = vld [vmem:[#allocation53_spill] sm:$0xff]  ;;  %v5945_v21 = vld [vmem:[#allocation38_spill] sm:$0xff] }
  0xb8   :  { %v4179_v35 = vadd.f32 %v1032_v26, %v1004_v45  ;;  %v1440_v63 = vmul.f32 %v1432_v25, %v984_v62  ;;  %v1468_v60 = vmul.f32 %v1460_v58, %v984_v62  ;;  %v1386_v53 = vmul.f32 %v1378_v11, %v5942_v6  ;;  %v5944_v56 = vld [vmem:[#allocation37_spill] sm:$0xff]  ;;  %v5946_v25 = vld [vmem:[#allocation39_spill] sm:$0xff]  ;;  %v5949_v58 = vld [vmem:[#allocation54_spill] sm:$0xff] }
  0xb9   :  { %v1750_v27 = vmul.f32 %v1742_v7, %v4048_v15  ;;  %v68_v46 = vsub.f32 %v4070_v5, %v5943_v47  ;;  %v80_v13 = vsub.f32 %v4070_v5, %v5944_v56  ;;  %v4189_v36 = vsub.f32 %v4070_v5, %v5945_v21  ;;  %v5952_v6 = vld [vmem:[#allocation40_spill] sm:$0xff] }
  0xba   :  { %v1448_v59 = vadd.f32 %v1440_v63, %v1420_v0  ;;  %v1488_v26 = vmul.f32 %v1480_v48, %v4179_v35  ;;  %v1394_v4 = vadd.f32 %v1386_v53, %v1366_v19  ;;  %v4194_v62 = vsub.f32 %v4070_v5, %v5946_v25 }
  0xbb   :  { %vm208_vm4 = vcmp.ge.f32.partialorder %v68_v46, 0.0  ;;  %vm216_vm11 = vcmp.ge.f32.partialorder %v80_v13, 0.0  ;;  %vm224_vm9 = vcmp.ge.f32.partialorder %v4189_v36, 0.0  ;;  %v660_v7 = vmul.f32 %v5949_v58, %v68_v46 }
  0xbc   :  { %v4205_v45 = vadd.f32 %v1488_v26, %v1468_v60  ;;  %v4207_v48 = vmul.f32 %v1816_v14, %v1448_v59  ;;  %v1852_v0 = vmul.f32 %v1844_v57, %v1448_v59  ;;  %v1770_v11 = vmul.f32 %v1762_v42, %v1394_v4  ;;  %vm304_vm12 = vmxor %vm216_vm11, %vm2988_vm5  ;;  %v5953_v59 = vld [vmem:[#allocation55_spill] sm:$0xff]  ;;  %v5954_v26 = vld [vmem:[#allocation42_spill] sm:$0xff] }
  0xbd   :  { %v4211_v19 = vmul.f32 %v1790_v30, %v1394_v4  ;;  %vm232_vm14 = vcmp.ge.f32.partialorder %v4194_v62, 0.0  ;;  %vm312_vm15 = vmand %vm208_vm4, %vm304_vm12  ;;  %v676_v63 = vsub.f32 0.0, %v4189_v36  ;;  %v716_v53 = vmul.f32 %v5952_v6, %v80_v13  ;;  %v5956_v6 = vld [vmem:[#allocation56_spill] sm:$0xff] }
  0xbe   :  { %5950 = vst [vmem:[#allocation69_spill] sm:$0xff] %v4207_v48  ;;  %v1872_v58 = vmul.f32 %v1864_v50, %v4205_v45  ;;  %v1778_v60 = vadd.f32 %v1770_v11, %v1750_v27  ;;  %v2676_v14 = vsel %vm312_vm15, 1.0, %v5782_v51  ;;  %vm336_vm8 = vmxor %vm224_vm9, %vm2988_vm5  ;;  %v732_v42 = vsub.f32 0.0, %v4194_v62  ;;  %v5955_v11 = vld [vmem:[#allocation41_spill] sm:$0xff] }
  0xbf   :  { %5951 = vst [vmem:[#allocation70_spill] sm:$0xff] %v4211_v19  ;;  %vm344_vm3 = vmand %vm216_vm11, %vm336_vm8  ;;  %v668_v30 = vmul.f32 %v2676_v14, %v660_v7  ;;  %v688_v57 = vmul.f32 %v5953_v59, %v676_v63  ;;  %v772_v4 = vmul.f32 %v5954_v26, %v4189_v36  ;;  %v788_v48 = vsub.f32 0.0, %v4084_v12  ;;  %v5957_v26 = vld [vmem:[#allocation44_spill] sm:$0xff] }
  0xc0   :  { %v1880_v50 = vadd.f32 %v1872_v58, %v1852_v0  ;;  %2182 = vrot.lane.b32.xlu1 %v1778_v60, %s2992_s24  ;;  %v2684_v27 = vsel %vm344_vm3, 1.0, %v5782_v51  ;;  %vm368_vm0 = vmxor %vm232_vm14, %vm2988_vm5  ;;  %v744_v19 = vmul.f32 %v5955_v11, %v732_v42  ;;  %v1220_v7 = vmul.f32 %v5956_v6, %v68_v46  ;;  %v5958_v58 = vld [vmem:[#allocation57_spill] sm:$0xff]  ;;  %v5959_v11 = vld [vmem:[#allocation47_spill] sm:$0xff] }
  0xc1   :  { %vm376_vm1 = vmand %vm224_vm9, %vm368_vm0  ;;  %v696_v63 = vmul.f32 %v2684_v27, %v688_v57  ;;  %v724_v14 = vmul.f32 %v2684_v27, %v716_v53  ;;  %v800_v12 = vmul.f32 %v5957_v26, %v788_v48  ;;  %v1240_v0 = vmul.f32 %v5958_v58, %v732_v42  ;;  %v5960_v59 = vld [vmem:[#allocation48_spill] sm:$0xff] }
  0xc2   :  { %2243 = vrot.lane.b32.xlu0 %v1880_v50, %s2991_s3  ;;  %v2692_v60 = vsel %vm376_vm1, 1.0, %v5782_v51  ;;  %vm408_vm2 = vmand %vm232_vm14, %vm4200_vm10  ;;  %v1268_v6 = vmul.f32 %v5959_v11, %v80_v13  ;;  %v1288_v25 = vmul.f32 %v5960_v59, %v788_v48  ;;  %v1652_v57 = vmul.f32 %v5908_v28, %v68_v46 }
  0xc3   :  { %v2700_v53 = vsel %vm408_vm2, 1.0, %v5782_v51  ;;  %v704_v27 = vadd.f32 %v696_v63, %v668_v30  ;;  %v752_v26 = vmul.f32 %v2692_v60, %v744_v19  ;;  %v780_v42 = vmul.f32 %v2692_v60, %v772_v4 }
  0xc4   :  { %v808_v58 = vmul.f32 %v2700_v53, %v800_v12  ;;  %v1672_v50 = vmul.f32 %v5909_v44, %v788_v48  ;;  %v828_v15 = vmul.f32 %v5910_v9, %v4194_v62  ;;  %v844_v21 = vsub.f32 0.0, %v4088_v32 }
  0xc5   :  { %v760_v56 = vadd.f32 %v752_v26, %v724_v14  ;;  %v1228_v47 = vmul.f32 %v1220_v7, %v704_v27  ;;  %v1316_v59 = vmul.f32 %v5856_v10, %v4189_v36  ;;  %v1700_v46 = vmul.f32 %v5857_v54, %v80_v13 }
  0xc6   :  { %v816_v28 = vadd.f32 %v808_v58, %v780_v42  ;;  %v836_v11 = vmul.f32 %v2700_v53, %v828_v15  ;;  %v856_v19 = vmul.f32 %v5859_v41, %v844_v21  ;;  %v1336_v30 = vmul.f32 %v5911_v61, %v844_v21 }
  0xc7   :  { %v1248_v4 = vmul.f32 %v1240_v0, %v760_v56  ;;  %v1276_v48 = vmul.f32 %v1268_v6, %v760_v56  ;;  %v1720_v63 = vmul.f32 %v5912_v8, %v844_v21  ;;  %v176_v12 = vsub.f32 %v4070_v5, %v5858_v38 }
  0xc8   :  { %v1296_v26 = vmul.f32 %v1288_v25, %v816_v28  ;;  %v864_v7 = vmul.f32 %v4119_v17, %v856_v19  ;;  %v1324_v14 = vmul.f32 %v1316_v59, %v816_v28  ;;  %v1052_v13 = vmul.f32 %v5913_v49, %v4096_v33  ;;  %v5961_v17 = vld [vmem:[#allocation25_spill] sm:$0xff] }
  0xc9   :  { %v1256_v58 = vadd.f32 %v1248_v4, %v1228_v47  ;;  %vm280_vm7 = vcmp.ge.f32.partialorder %v176_v12, 0.0  ;;  %v1068_v60 = vsub.f32 0.0, %v176_v12  ;;  %v1508_v53 = vmul.f32 %v5914_v39, %v4092_v18 }
  0xca   :  { %v1304_v0 = vadd.f32 %v1296_v26, %v1276_v48  ;;  %v4265_v56 = vadd.f32 %v864_v7, %v836_v11  ;;  %vm560_vm4 = vmxor %vm280_vm7, %vm2988_vm5  ;;  %v1060_v21 = vmul.f32 %v4161_v31, %v1052_v13  ;;  %v1892_v28 = vmul.f32 %v5961_v17, %v4088_v32 }
  0xcb   :  { %v1660_v25 = vmul.f32 %v1652_v57, %v1256_v58  ;;  %vm568_vm11 = vmand %vm272_vm13, %vm560_vm4  ;;  %v1080_v47 = vmul.f32 %v5865_v1, %v1068_v60  ;;  %v1516_v6 = vmul.f32 %v1508_v53, %v4179_v35  ;;  %v1528_v59 = vmul.f32 %v5866_v34, %v1068_v60 }
  0xcc   :  { %v1680_v11 = vmul.f32 %v1672_v50, %v1304_v0  ;;  %v1344_v27 = vmul.f32 %v1336_v30, %v4265_v56  ;;  %v1708_v42 = vmul.f32 %v1700_v46, %v1304_v0  ;;  %v2740_v15 = vsel %vm568_vm11, 1.0, %v5782_v51 }
  0xcd   :  { %v1088_v31 = vmul.f32 %v2740_v15, %v1080_v47  ;;  %v1900_v19 = vmul.f32 %v1892_v28, %v4205_v45  ;;  %v1912_v32 = vmul.f32 %v5867_v24, %v1068_v60  ;;  %v188_v57 = vsub.f32 %v4070_v5, %v3498_v52 }
  0xce   :  { %v1688_v4 = vadd.f32 %v1680_v11, %v1660_v25  ;;  %v4283_v48 = vadd.f32 %v1344_v27, %v1324_v14  ;;  %v200_v35 = vsub.f32 %v4070_v5, %v3504_v23  ;;  %v1108_v50 = vmul.f32 %v5868_v43, %v4100_v16 }
  0xcf   :  { %v1096_v46 = vadd.f32 %v1088_v31, %v1060_v21  ;;  %vm288_vm13 = vcmp.ge.f32.partialorder %v188_v57, 0.0  ;;  %v1124_v30 = vsub.f32 0.0, %v188_v57  ;;  %v1164_v26 = vmul.f32 %v3514_v40, %v176_v12 }
  0xd0   :  { %2112 = vrot.lane.b32.xlu0 %v1688_v4, %s2991_s3  ;;  %v1728_v45 = vmul.f32 %v1720_v63, %v4283_v48  ;;  %vm296_vm9 = vcmp.ge.f32.partialorder %v200_v35, 0.0  ;;  %vm592_vm10 = vmxor %vm288_vm13, %vm2988_vm5  ;;  %v1116_v7 = vmul.f32 %v2740_v15, %v1108_v50  ;;  %v1180_v14 = vsub.f32 0.0, %v200_v35  ;;  %v5964_v35 = vld [vmem:[#allocation67_spill] sm:$0xff] }
  0xd1   :  { %v1536_v13 = vmul.f32 %v1528_v59, %v1096_v46  ;;  %vm600_vm12 = vmand %vm280_vm7, %vm592_vm10  ;;  %v1136_v5 = vmul.f32 %v3508_v55, %v1124_v30  ;;  %v1556_v58 = vmul.f32 %v3525_v2, %v4096_v33  ;;  %v1576_v60 = vmul.f32 %v3529_v3, %v1124_v30  ;;  %v4308_v59 = vld [vmem:[%s5580_s0 + $0x10] sm:$0xff] }
  0xd2   :  { %v1736_v53 = vadd.f32 %v1728_v45, %v1708_v42  ;;  %v2748_v0 = vsel %vm600_vm12, 1.0, %v5782_v51  ;;  %vm624_vm14 = vmxor %vm296_vm9, %vm2988_vm5  ;;  %v1192_v63 = vmul.f32 %v3518_v29, %v1180_v14  ;;  %v1604_v21 = vmul.f32 %v3539_v37, %v4100_v16  ;;  %v5962_v42 = vld [vmem:[#allocation65_spill] sm:$0xff] }
  0xd3   :  { %v1544_v28 = vadd.f32 %v1536_v13, %v1516_v6  ;;  %vm632_vm15 = vmand %vm288_vm13, %vm624_vm14  ;;  %v1144_v12 = vmul.f32 %v2748_v0, %v1136_v5  ;;  %v1172_v25 = vmul.f32 %v2748_v0, %v1164_v26  ;;  %v1564_v47 = vmul.f32 %v1556_v58, %v1096_v46  ;;  %v5963_v6 = vld [vmem:[#allocation66_spill] sm:$0xff]  ;;  %v5965_v26 = vld [vmem:[#allocation68_spill] sm:$0xff] }
  0xd4   :  { %2153 = vrot.lane.b32.xlu1 %v1736_v53, %s2990_s17  ;;  %v2756_v11 = vsel %vm632_vm15, 1.0, %v5782_v51  ;;  %v1624_v27 = vmul.f32 %v5869_v22, %v1180_v14  ;;  %v1940_v16 = vmul.f32 %v5962_v42, %v4092_v18  ;;  %v1960_v15 = vmul.f32 %v5963_v6, %v1124_v30  ;;  %v5966_v13 = vld [vmem:[#allocation27_spill] sm:$0xff]  ;;  %v5967_v58 = vld [vmem:[#allocation9_spill] sm:$0xff] }
  0xd5   :  { %v1920_v31 = vmul.f32 %v1912_v32, %v1544_v28  ;;  %v1152_v57 = vadd.f32 %v1144_v12, %v1116_v7  ;;  %v1200_v4 = vmul.f32 %v2756_v11, %v1192_v63  ;;  %v1988_v50 = vmul.f32 %v5964_v35, %v4096_v33  ;;  %v5968_v7 = vld [vmem:[#allocation10_spill] sm:$0xff]  ;;  %v5969_v33 = vld [vmem:[#allocation11_spill] sm:$0xff] }
  0xd6   :  { %v1948_v46 = vmul.f32 %v1940_v16, %v1544_v28  ;;  %v2008_v45 = vmul.f32 %v5965_v26, %v1180_v14  ;;  %v4321_v5 = vsub.f32 %v4308_v59, %v5966_v13  ;;  %v4325_v53 = vsub.f32 %v4308_v59, %v5967_v58  ;;  %v5970_v14 = vld [vmem:[#allocation12_spill] sm:$0xff] }
  0xd7   :  { %v1928_v18 = vadd.f32 %v1920_v31, %v1900_v19  ;;  %v1208_v0 = vadd.f32 %v1200_v4, %v1172_v25  ;;  %v1584_v30 = vmul.f32 %v1576_v60, %v1152_v57  ;;  %v1612_v32 = vmul.f32 %v1604_v21, %v1152_v57  ;;  %v5971_v60 = vld [vmem:[#allocation28_spill] sm:$0xff]  ;;  %v5973_v31 = vld [vmem:[#allocation14_spill] sm:$0xff] }
  0xd8   :  { %v4329_v63 = vsub.f32 %v4308_v59, %v5968_v7  ;;  %v4333_v28 = vsub.f32 %v4308_v59, %v5969_v33  ;;  %v4337_v12 = vsub.f32 %v4308_v59, %v5970_v14  ;;  %vm235_vm8 = vcmp.ge.f32.partialorder %v4321_v5, 0.0  ;;  %v5977_v33 = vld [vmem:[#allocation31_spill] sm:$0xff]  ;;  %v5979_v7 = vld [vmem:[#allocation18_spill] sm:$0xff] }
  0xd9   :  { %2283 = vrot.lane.b32.xlu0 %v1928_v18, %s2990_s17  ;;  %v1592_v19 = vadd.f32 %v1584_v30, %v1564_v47  ;;  %v1632_v25 = vmul.f32 %v1624_v27, %v1208_v0  ;;  %vm243_vm3 = vcmp.ge.f32.partialorder %v4325_v53, 0.0  ;;  %v879_v21 = vmul.f32 %v5971_v60, %v4321_v5  ;;  %v5974_v18 = vld [vmem:[#allocation30_spill] sm:$0xff] }
  0xda   :  { %vm251_vm0 = vcmp.ge.f32.partialorder %v4329_v63, 0.0  ;;  %vm259_vm1 = vcmp.ge.f32.partialorder %v4333_v28, 0.0  ;;  %vm267_vm2 = vcmp.ge.f32.partialorder %v4337_v12, 0.0  ;;  %vm427_vm7 = vmxor %vm243_vm3, %vm2988_vm5  ;;  %v4351_v11 = vsub.f32 0.0, %v4329_v63 }
  0xdb   :  { %v1640_v47 = vadd.f32 %v1632_v25, %v1612_v32  ;;  %v1968_v27 = vmul.f32 %v1960_v15, %v1592_v19  ;;  %v1996_v16 = vmul.f32 %v1988_v50, %v1592_v19  ;;  %vm435_vm4 = vmand %vm235_vm8, %vm427_vm7  ;;  %v935_v57 = vmul.f32 %v5973_v31, %v4325_v53  ;;  %v5975_v15 = vld [vmem:[#allocation15_spill] sm:$0xff] }
  0xdc   :  { %5972 = vst [vmem:[#allocation45_spill] sm:$0xff] %v4351_v11  ;;  %v4358_v4 = vsel %vm435_vm4, 1.0, %v5782_v51  ;;  %vm459_vm11 = vmxor %vm251_vm0, %vm2988_vm5  ;;  %v907_v0 = vmul.f32 %v5974_v18, %v4351_v11  ;;  %v951_v30 = vsub.f32 0.0, %v4333_v28  ;;  %v991_v50 = vmul.f32 %v5975_v15, %v4329_v63  ;;  %v5976_v18 = vld [vmem:[#allocation17_spill] sm:$0xff] }
  0xdd   :  { %v1976_v32 = vadd.f32 %v1968_v27, %v1948_v46  ;;  %v2016_v19 = vmul.f32 %v2008_v45, %v1640_v47  ;;  %vm467_vm13 = vmand %vm243_vm3, %vm459_vm11  ;;  %v887_v25 = vmul.f32 %v4358_v4, %v879_v21  ;;  %v1007_v31 = vsub.f32 0.0, %v4337_v12  ;;  %v5978_v46 = vld [vmem:[#allocation32_spill] sm:$0xff] }
  0xde   :  { %v2711_v60 = vsel %vm467_vm13, 1.0, %v5782_v51  ;;  %vm491_vm9 = vmxor %vm259_vm1, %vm2988_vm5  ;;  %v963_v14 = vmul.f32 %v5976_v18, %v951_v30  ;;  %v1407_v15 = vmul.f32 %v5977_v33, %v4321_v5  ;;  %v1427_v45 = vmul.f32 %v5978_v46, %v951_v30  ;;  %v5980_v33 = vld [vmem:[#allocation21_spill] sm:$0xff]  ;;  %v5981_v46 = vld [vmem:[#allocation22_spill] sm:$0xff] }
  0xdf   :  { %v2024_v47 = vadd.f32 %v2016_v19, %v1996_v16  ;;  %2323 = vrot.lane.b32.xlu1 %v1976_v32, %s2992_s24  ;;  %vm499_vm10 = vmand %vm251_vm0, %vm491_vm9  ;;  %v915_v21 = vmul.f32 %v2711_v60, %v907_v0  ;;  %v943_v27 = vmul.f32 %v2711_v60, %v935_v57  ;;  %v1019_v58 = vmul.f32 %v5979_v7, %v1007_v31  ;;  %v5982_v19 = vld [vmem:[#allocation33_spill] sm:$0xff]  ;;  %v5984_v7 = vld [vmem:[#allocation34_spill] sm:$0xff] }
  0xe0   :  { %v2719_v13 = vsel %vm499_vm10, 1.0, %v5782_v51  ;;  %vm523_vm12 = vmxor %vm267_vm2, %vm2988_vm5  ;;  %v1455_v18 = vmul.f32 %v5980_v33, %v4325_v53  ;;  %v1475_v16 = vmul.f32 %v5981_v46, %v1007_v31  ;;  %v1811_v32 = vmul.f32 %v5982_v19, %v951_v30  ;;  %v5985_v33 = vld [vmem:[#allocation35_spill] sm:$0xff]  ;;  %v5987_v19 = vld [vmem:[#allocation26_spill] sm:$0xff] }
  0xe1   :  { %2348 = vst.msk [vmem:[#allocation2 + $0xb8] sm:$0xff] %vm2081_vm6, %v2024_v47  ;;  %vm531_vm14 = vmand %vm259_vm1, %vm523_vm12  ;;  %v4395_v60 = vadd.f32 %v915_v21, %v887_v25  ;;  %v971_v57 = vmul.f32 %v2719_v13, %v963_v14  ;;  %v999_v0 = vmul.f32 %v2719_v13, %v991_v50  ;;  %v1839_v11 = vmul.f32 %v5984_v7, %v4321_v5  ;;  %v5986_v46 = vld [vmem:[#allocation71_spill] sm:$0xff]  ;;  %v5988_v47 = vld [vmem:[#allocation72_spill] sm:$0xff] }
  0xe2   :  { %v4400_v26 = vsel %vm531_vm14, 1.0, %v5782_v51  ;;  %v1859_v6 = vmul.f32 %v5985_v33, %v1007_v31  ;;  %v1364_v30 = vmul.f32 %v5986_v46, %v4194_v62  ;;  %v1384_v22 = vmul.f32 %v5988_v47, %v5987_v19  ;;  %v5989_v13 = vld [vmem:[#allocation73_spill] sm:$0xff]  ;;  %v5990_v7 = vld [vmem:[#allocation20_spill] sm:$0xff]  ;;  %v5991_v31 = vld [vmem:[#allocation74_spill] sm:$0xff] }
  0xe3   :  { %5983 = vst [vmem:[#allocation50_spill] sm:$0xff] %v4395_v60  ;;  %v979_v3 = vadd.f32 %v971_v57, %v943_v27  ;;  %v1027_v25 = vmul.f32 %v4400_v26, %v1019_v58  ;;  %v1415_v14 = vmul.f32 %v1407_v15, %v4395_v60  ;;  %v1748_v50 = vmul.f32 %v5989_v13, %v4189_v36  ;;  %v5992_v60 = vld [vmem:[#allocation53_spill] sm:$0xff]  ;;  %vm4442_vm0 = vmxor %vm235_vm8, %vm2988_vm5 }
  0xe4   :  { %v1372_v21 = vmul.f32 %v1364_v30, %v4265_v56  ;;  %v1392_v29 = vmul.f32 %v1384_v22, %v5990_v7  ;;  %v1768_v33 = vmul.f32 %v5991_v31, %v5987_v19  ;;  %v1796_v46 = vmul.f32 %v5941_v20, %v4194_v62  ;;  %v5993_v13 = vld [vmem:[#allocation37_spill] sm:$0xff]  ;;  %v5994_v22 = vld [vmem:[#allocation38_spill] sm:$0xff] }
  0xe5   :  { %v4417_v55 = vadd.f32 %v1027_v25, %v999_v0  ;;  %v1435_v27 = vmul.f32 %v1427_v45, %v979_v3  ;;  %v1463_v57 = vmul.f32 %v1455_v18, %v979_v3  ;;  %v1756_v58 = vmul.f32 %v1748_v50, %v4283_v48  ;;  %v5995_v0 = vld [vmem:[#allocation39_spill] sm:$0xff] }
  0xe6   :  { %v1400_v15 = vadd.f32 %v1392_v29, %v1372_v21  ;;  %v63_v36 = vsub.f32 %v4308_v59, %v5992_v60  ;;  %v4424_v56 = vsub.f32 %v4308_v59, %v5993_v13  ;;  %v4428_v7 = vsub.f32 %v4308_v59, %v5994_v22 }
  0xe7   :  { %v1443_v19 = vadd.f32 %v1435_v27, %v1415_v14  ;;  %v1483_v62 = vmul.f32 %v1475_v16, %v4417_v55  ;;  %v4433_v3 = vsub.f32 %v4308_v59, %v5995_v0  ;;  %v783_v29 = vsub.f32 0.0, %v4321_v5 }
  0xe8   :  { %v1776_v48 = vmul.f32 %v1768_v33, %v1400_v15  ;;  %v4436_v18 = vmul.f32 %v1796_v46, %v1400_v15  ;;  %vm203_vm15 = vcmp.ge.f32.partialorder %v63_v36, 0.0  ;;  %vm211_vm3 = vcmp.ge.f32.partialorder %v4424_v56, 0.0  ;;  %v6000_v46 = vld [vmem:[#allocation54_spill] sm:$0xff] }
  0xe9   :  { %v1491_v16 = vadd.f32 %v1483_v62, %v1463_v57  ;;  %v4446_v30 = vmul.f32 %v1811_v32, %v1443_v19  ;;  %v1847_v25 = vmul.f32 %v1839_v11, %v1443_v19  ;;  %vm219_vm1 = vcmp.ge.f32.partialorder %v4428_v7, 0.0  ;;  %vm299_vm7 = vmxor %vm211_vm3, %vm2988_vm5  ;;  %v6001_v11 = vld [vmem:[#allocation40_spill] sm:$0xff] }
  0xea   :  { %5996 = vst [vmem:[#allocation52_spill] sm:$0xff] %v4436_v18  ;;  %v1784_v33 = vadd.f32 %v1776_v48, %v1756_v58  ;;  %vm227_vm4 = vcmp.ge.f32.partialorder %v4433_v3, 0.0  ;;  %vm307_vm11 = vmand %vm203_vm15, %vm299_vm7  ;;  %v655_v5 = vmul.f32 %v6000_v46, %v63_v36  ;;  %v671_v14 = vsub.f32 0.0, %v4428_v7  ;;  %v6002_v58 = vld [vmem:[#allocation55_spill] sm:$0xff]  ;;  %v6004_v62 = vld [vmem:[#allocation44_spill] sm:$0xff] }
  0xeb   :  { %5999 = vst [vmem:[#allocation49_spill] sm:$0xff] %v4446_v30  ;;  %v1867_v50 = vmul.f32 %v1859_v6, %v1491_v16  ;;  %v2671_v21 = vsel %vm307_vm11, 1.0, %v5782_v51  ;;  %vm331_vm8 = vmxor %vm219_vm1, %vm2988_vm5  ;;  %v711_v32 = vmul.f32 %v6001_v11, %v4424_v56  ;;  %v727_v27 = vsub.f32 0.0, %v4433_v3  ;;  %v6003_v6 = vld [vmem:[#allocation42_spill] sm:$0xff]  ;;  %v6005_v11 = vld [vmem:[#allocation41_spill] sm:$0xff] }
  0xec   :  { %2194 = vrot.lane.b32.xlu1 %v1784_v33, %s2992_s24  ;;  %vm339_vm13 = vmand %vm211_vm3, %vm331_vm8  ;;  %v663_v57 = vmul.f32 %v2671_v21, %v655_v5  ;;  %v683_v15 = vmul.f32 %v6002_v58, %v671_v14  ;;  %v767_v19 = vmul.f32 %v6003_v6, %v4428_v7  ;;  %v795_v48 = vmul.f32 %v6004_v62, %v783_v29  ;;  %v6006_v46 = vld [vmem:[#allocation56_spill] sm:$0xff]  ;;  %v6007_v21 = vld [vmem:[#allocation57_spill] sm:$0xff] }
  0xed   :  { %v1875_v30 = vadd.f32 %v1867_v50, %v1847_v25  ;;  %v2679_v18 = vsel %vm339_vm13, 1.0, %v5782_v51  ;;  %vm363_vm9 = vmxor %vm227_vm4, %vm2988_vm5  ;;  %v739_v33 = vmul.f32 %v6005_v11, %v727_v27  ;;  %v1215_v0 = vmul.f32 %v6006_v46, %v63_v36  ;;  %v6008_v62 = vld [vmem:[#allocation47_spill] sm:$0xff]  ;;  %v6009_v46 = vld [vmem:[#allocation48_spill] sm:$0xff] }
  0xee   :  { %vm371_vm10 = vmand %vm219_vm1, %vm363_vm9  ;;  %v691_v5 = vmul.f32 %v2679_v18, %v683_v15  ;;  %v719_v14 = vmul.f32 %v2679_v18, %v711_v32  ;;  %v1235_v58 = vmul.f32 %v6007_v21, %v727_v27  ;;  %v1263_v25 = vmul.f32 %v6008_v62, %v4424_v56  ;;  %v6010_v6 = vld [vmem:[#allocation58_spill] sm:$0xff] }
  0xef   :  { %2233 = vrot.lane.b32.xlu0 %v1875_v30, %s2991_s3  ;;  %v2687_v50 = vsel %vm371_vm10, 1.0, %v5782_v51  ;;  %vm403_vm12 = vmand %vm227_vm4, %vm4442_vm0  ;;  %v1283_v11 = vmul.f32 %v6009_v46, %v783_v29  ;;  %v1647_v22 = vmul.f32 %v6010_v6, %v63_v36  ;;  %v1667_v18 = vmul.f32 %v5909_v44, %v783_v29 }
  0xf0   :  { %v2695_v32 = vsel %vm403_vm12, 1.0, %v5782_v51  ;;  %v699_v27 = vadd.f32 %v691_v5, %v663_v57  ;;  %v747_v15 = vmul.f32 %v2687_v50, %v739_v33  ;;  %v775_v62 = vmul.f32 %v2687_v50, %v767_v19 }
  0xf1   :  { %v803_v21 = vmul.f32 %v2695_v32, %v795_v48  ;;  %v171_v30 = vsub.f32 %v4308_v59, %v5858_v38  ;;  %v1047_v45 = vmul.f32 %v5913_v49, %v4333_v28  ;;  %v1503_v13 = vmul.f32 %v5914_v39, %v4329_v63 }
  0xf2   :  { %v755_v46 = vadd.f32 %v747_v15, %v719_v14  ;;  %v1223_v60 = vmul.f32 %v1215_v0, %v699_v27  ;;  %v1887_v36 = vmul.f32 %v5961_v17, %v4325_v53  ;;  %v823_v29 = vmul.f32 %v5910_v9, %v4433_v3 }
  0xf3   :  { %v811_v57 = vadd.f32 %v803_v21, %v775_v62  ;;  %vm275_vm14 = vcmp.ge.f32.partialorder %v171_v30, 0.0  ;;  %v1055_v19 = vmul.f32 %v4400_v26, %v1047_v45  ;;  %v1063_v48 = vsub.f32 0.0, %v171_v30 }
  0xf4   :  { %v1243_v33 = vmul.f32 %v1235_v58, %v755_v46  ;;  %v1271_v5 = vmul.f32 %v1263_v25, %v755_v46  ;;  %vm555_vm15 = vmxor %vm275_vm14, %vm2988_vm5  ;;  %v1511_v50 = vmul.f32 %v1503_v13, %v4417_v55  ;;  %v1895_v14 = vmul.f32 %v1887_v36, %v1491_v16 }
  0xf5   :  { %v1291_v0 = vmul.f32 %v1283_v11, %v811_v57  ;;  %vm563_vm3 = vmand %vm267_vm2, %vm555_vm15  ;;  %v1075_v27 = vmul.f32 %v5865_v1, %v1063_v48  ;;  %v1523_v62 = vmul.f32 %v5866_v34, %v1063_v48  ;;  %v1907_v21 = vmul.f32 %v5867_v24, %v1063_v48 }
  0xf6   :  { %v1251_v26 = vadd.f32 %v1243_v33, %v1223_v60  ;;  %v2735_v58 = vsel %vm563_vm3, 1.0, %v5782_v51  ;;  %v831_v46 = vmul.f32 %v2695_v32, %v823_v29  ;;  %v839_v25 = vsub.f32 0.0, %v4325_v53 }
  0xf7   :  { %v1299_v15 = vadd.f32 %v1291_v0, %v1271_v5  ;;  %v1083_v45 = vmul.f32 %v2735_v58, %v1075_v27  ;;  %v1311_v55 = vmul.f32 %v5856_v10, %v4428_v7  ;;  %v1695_v13 = vmul.f32 %v5857_v54, %v4424_v56 }
  0xf8   :  { %v1655_v16 = vmul.f32 %v1647_v22, %v1251_v26  ;;  %v851_v11 = vmul.f32 %v5859_v41, %v839_v25  ;;  %v1331_v36 = vmul.f32 %v5911_v61, %v839_v25  ;;  %v1715_v60 = vmul.f32 %v5912_v8, %v839_v25 }
  0xf9   :  { %v1675_v48 = vmul.f32 %v1667_v18, %v1299_v15  ;;  %v1091_v33 = vadd.f32 %v1083_v45, %v1055_v19  ;;  %v1319_v32 = vmul.f32 %v1311_v55, %v811_v57  ;;  %v1703_v29 = vmul.f32 %v1695_v13, %v1299_v15  ;;  %v6011_v13 = vld [vmem:[#allocation60_spill] sm:$0xff] }
  0xfa   :  { %v859_v53 = vmul.f32 %v4358_v4, %v851_v11  ;;  %v183_v5 = vsub.f32 %v4308_v59, %v3498_v52  ;;  %v195_v0 = vsub.f32 %v4308_v59, %v3504_v23  ;;  %v1103_v56 = vmul.f32 %v5868_v43, %v4337_v12  ;;  %v6012_v11 = vld [vmem:[#allocation61_spill] sm:$0xff] }
  0xfb   :  { %v1683_v22 = vadd.f32 %v1675_v48, %v1655_v16  ;;  %v1531_v27 = vmul.f32 %v1523_v62, %v1091_v33  ;;  %v1159_v26 = vmul.f32 %v3514_v40, %v171_v30  ;;  %v1551_v18 = vmul.f32 %v3525_v2, %v4333_v28  ;;  %v6013_v48 = vld [vmem:[#allocation62_spill] sm:$0xff] }
  0xfc   :  { %v867_v57 = vadd.f32 %v859_v53, %v831_v46  ;;  %vm283_vm2 = vcmp.ge.f32.partialorder %v183_v5, 0.0  ;;  %vm291_vm0 = vcmp.ge.f32.partialorder %v195_v0, 0.0  ;;  %v1111_v4 = vmul.f32 %v2735_v58, %v1103_v56 }
  0xfd   :  { %2102 = vrot.lane.b32.xlu0 %v1683_v22, %s2991_s3  ;;  %v1539_v19 = vadd.f32 %v1531_v27, %v1511_v50  ;;  %vm587_vm1 = vmxor %vm283_vm2, %vm2988_vm5  ;;  %v1119_v59 = vsub.f32 0.0, %v183_v5  ;;  %v1175_v25 = vsub.f32 0.0, %v195_v0  ;;  %v1559_v15 = vmul.f32 %v1551_v18, %v1091_v33  ;;  %v6015_v18 = vld [vmem:[#allocation66_spill] sm:$0xff]  ;;  %v6017_v5 = vld [vmem:[#allocation71_spill] sm:$0xff] }
  0xfe   :  { %v1339_v45 = vmul.f32 %v1331_v36, %v867_v57  ;;  %vm595_vm7 = vmand %vm275_vm14, %vm587_vm1  ;;  %v1599_v62 = vmul.f32 %v3539_v37, %v4337_v12  ;;  %v1935_v46 = vmul.f32 %v5962_v42, %v4329_v63  ;;  %v1983_v58 = vmul.f32 %v5964_v35, %v4333_v28  ;;  %v6014_v63 = vld [vmem:[#allocation64_spill] sm:$0xff] }
  0xff   :  { %v1915_v55 = vmul.f32 %v1907_v21, %v1539_v19  ;;  %v2743_v50 = vsel %vm595_vm7, 1.0, %v5782_v51  ;;  %vm619_vm4 = vmxor %vm291_vm0, %vm2988_vm5  ;;  %v1131_v16 = vmul.f32 %v6011_v13, %v1119_v59  ;;  %v1187_v30 = vmul.f32 %v6012_v11, %v1175_v25  ;;  %v6016_v42 = vld [vmem:[#allocation68_spill] sm:$0xff] }
 0x100   :  { %v1347_v36 = vadd.f32 %v1339_v45, %v1319_v32  ;;  %vm627_vm11 = vmand %vm283_vm2, %vm619_vm4  ;;  %v1167_v12 = vmul.f32 %v2743_v50, %v1159_v26  ;;  %v1571_v33 = vmul.f32 %v6013_v48, %v1119_v59  ;;  %v1619_v53 = vmul.f32 %v6014_v63, %v1175_v25  ;;  %v6018_v45 = vld [vmem:[#allocation45_spill] sm:$0xff]  ;;  %v4731_v48 = vld [vmem:[#allocation3 + $0x58] sm:$0xff] }
 0x101   :  { %v1923_v56 = vadd.f32 %v1915_v55, %v1895_v14  ;;  %v2751_v28 = vsel %vm627_vm11, 1.0, %v5782_v51  ;;  %v1139_v21 = vmul.f32 %v2743_v50, %v1131_v16  ;;  %v1943_v22 = vmul.f32 %v1935_v46, %v1539_v19  ;;  %v6019_v14 = vld [vmem:[#allocation73_spill] sm:$0xff] }
 0x102   :  { %v1723_v27 = vmul.f32 %v1715_v60, %v1347_v36  ;;  %v1195_v0 = vmul.f32 %v2751_v28, %v1187_v30  ;;  %v1955_v35 = vmul.f32 %v6015_v18, %v1119_v59  ;;  %v2003_v37 = vmul.f32 %v6016_v42, %v1175_v25  ;;  %v4559_v60 = vld [vmem:[%s5580_s0 + $0x18] sm:$0xff]  ;;  %v6020_v30 = vld [vmem:[#allocation50_spill] sm:$0xff] }
 0x103   :  { %2273 = vrot.lane.b32.xlu0 %v1923_v56, %s2990_s17  ;;  %v1147_v32 = vadd.f32 %v1139_v21, %v1111_v4  ;;  %v1359_v26 = vmul.f32 %v6017_v5, %v4433_v3  ;;  %v1379_v63 = vmul.f32 %v5988_v47, %v6018_v45  ;;  %v1743_v55 = vmul.f32 %v6019_v14, %v4428_v7  ;;  %v6021_v21 = vld [vmem:[#allocation27_spill] sm:$0xff] }
 0x104   :  { %v1731_v19 = vadd.f32 %v1723_v27, %v1703_v29  ;;  %v1203_v59 = vadd.f32 %v1195_v0, %v1167_v12  ;;  %v1763_v25 = vmul.f32 %v5991_v31, %v6018_v45  ;;  %v1791_v4 = vmul.f32 %v5941_v20, %v4433_v3  ;;  %v6022_v29 = vld [vmem:[#allocation9_spill] sm:$0xff]  ;;  %v6023_v3 = vld [vmem:[#allocation10_spill] sm:$0xff] }
 0x105   :  { %v1579_v46 = vmul.f32 %v1571_v33, %v1147_v32  ;;  %v1607_v50 = vmul.f32 %v1599_v62, %v1147_v32  ;;  %v1367_v16 = vmul.f32 %v1359_v26, %v867_v57  ;;  %v1387_v56 = vmul.f32 %v1379_v63, %v6020_v30  ;;  %v6024_v57 = vld [vmem:[#allocation11_spill] sm:$0xff] }
 0x106   :  { %2143 = vrot.lane.b32.xlu1 %v1731_v19, %s2990_s17  ;;  %v1627_v7 = vmul.f32 %v1619_v53, %v1203_v59  ;;  %v1751_v28 = vmul.f32 %v1743_v55, %v1347_v36  ;;  %v4569_v14 = vsub.f32 %v4559_v60, %v6021_v21  ;;  %v4573_v12 = vsub.f32 %v4559_v60, %v6022_v29  ;;  %v6025_v36 = vld [vmem:[#allocation12_spill] sm:$0xff] }
 0x107   :  { %v1587_v27 = vadd.f32 %v1579_v46, %v1559_v15  ;;  %v1395_v0 = vadd.f32 %v1387_v56, %v1367_v16  ;;  %v4577_v62 = vsub.f32 %v4559_v60, %v6023_v3  ;;  %v4581_v33 = vsub.f32 %v4559_v60, %v6024_v57  ;;  %v6030_v56 = vld [vmem:[#allocation15_spill] sm:$0xff]  ;;  %v6038_v57 = vld [vmem:[#allocation33_spill] sm:$0xff] }
 0x108   :  { %v1635_v63 = vadd.f32 %v1627_v7, %v1607_v50  ;;  %v4585_v53 = vsub.f32 %v4559_v60, %v6025_v36  ;;  %vm236_vm8 = vcmp.ge.f32.partialorder %v4569_v14, 0.0  ;;  %vm244_vm13 = vcmp.ge.f32.partialorder %v4573_v12, 0.0 }
 0x109   :  { %v1963_v32 = vmul.f32 %v1955_v35, %v1587_v27  ;;  %v1991_v15 = vmul.f32 %v1983_v58, %v1587_v27  ;;  %v1771_v26 = vmul.f32 %v1763_v25, %v1395_v0  ;;  %v4589_v45 = vmul.f32 %v1791_v4, %v1395_v0  ;;  %vm428_vm9 = vmxor %vm244_vm13, %vm2988_vm5  ;;  %v6031_v27 = vld [vmem:[#allocation30_spill] sm:$0xff] }
 0x10a   :  { %v2011_v55 = vmul.f32 %v2003_v37, %v1635_v63  ;;  %vm252_vm10 = vcmp.ge.f32.partialorder %v4577_v62, 0.0  ;;  %vm260_vm12 = vcmp.ge.f32.partialorder %v4581_v33, 0.0  ;;  %vm268_vm14 = vcmp.ge.f32.partialorder %v4585_v53, 0.0  ;;  %vm436_vm15 = vmand %vm236_vm8, %vm428_vm9  ;;  %v6027_v37 = vld [vmem:[#allocation28_spill] sm:$0xff] }
 0x10b   :  { %6026 = vst [vmem:[#allocation51_spill] sm:$0xff] %v4589_v45  ;;  %v1971_v19 = vadd.f32 %v1963_v32, %v1943_v22  ;;  %v1779_v35 = vadd.f32 %v1771_v26, %v1751_v28  ;;  %v4600_v58 = vsel %vm436_vm15, 1.0, %v5782_v51  ;;  %vm460_vm3 = vmxor %vm252_vm10, %vm2988_vm5  ;;  %v880_v59 = vmul.f32 %v6027_v37, %v4569_v14  ;;  %v6029_v22 = vld [vmem:[#allocation14_spill] sm:$0xff]  ;;  %v6032_v32 = vld [vmem:[#allocation17_spill] sm:$0xff] }
 0x10c   :  { %v2019_v25 = vadd.f32 %v2011_v55, %v1991_v15  ;;  %vm468_vm2 = vmand %vm244_vm13, %vm460_vm3  ;;  %v4610_v4 = vsub.f32 0.0, %v4577_v62  ;;  %v936_v46 = vmul.f32 %v6029_v22, %v4573_v12  ;;  %v952_v50 = vsub.f32 0.0, %v4581_v33  ;;  %v6033_v26 = vld [vmem:[#allocation31_spill] sm:$0xff] }
 0x10d   :  { %2313 = vrot.lane.b32.xlu0 %v1971_v19, %s2992_s24  ;;  %2184 = vrot.lane.b32.xlu1 %v1779_v35, %s2992_s24  ;;  %v2712_v16 = vsel %vm468_vm2, 1.0, %v5782_v51  ;;  %vm492_vm0 = vmxor %vm260_vm12, %vm2988_vm5  ;;  %v888_v30 = vmul.f32 %v4600_v58, %v880_v59  ;;  %v992_v7 = vmul.f32 %v6030_v56, %v4577_v62  ;;  %v1008_v28 = vsub.f32 0.0, %v4585_v53  ;;  %v6034_v35 = vld [vmem:[#allocation18_spill] sm:$0xff]  ;;  %v6036_v56 = vld [vmem:[#allocation21_spill] sm:$0xff] }
 0x10e   :  { %6028 = vst [vmem:[#allocation26_spill] sm:$0xff] %v4610_v4  ;;  %2343 = vst.msk [vmem:[#allocation2 + $0x40] sm:$0xff] %vm2081_vm6, %v2019_v25  ;;  %v908_v0 = vmul.f32 %v6031_v27, %v4610_v4  ;;  %v944_v63 = vmul.f32 %v2712_v16, %v936_v46  ;;  %v964_v15 = vmul.f32 %v6032_v32, %v952_v50  ;;  %v6035_v25 = vld [vmem:[#allocation32_spill] sm:$0xff] }
 0x10f   :  { %vm500_vm1 = vmand %vm252_vm10, %vm492_vm0  ;;  %v1408_v55 = vmul.f32 %v6033_v26, %v4569_v14  ;;  %v1020_v59 = vmul.f32 %v6034_v35, %v1008_v28  ;;  %v1428_v45 = vmul.f32 %v6035_v25, %v952_v50  ;;  %v1456_v22 = vmul.f32 %v6036_v56, %v4573_v12  ;;  %v6037_v26 = vld [vmem:[#allocation22_spill] sm:$0xff]  ;;  %v6040_v25 = vld [vmem:[#allocation35_spill] sm:$0xff] }
 0x110   :  { %v2720_v19 = vsel %vm500_vm1, 1.0, %v5782_v51  ;;  %vm524_vm7 = vmxor %vm268_vm14, %vm2988_vm5  ;;  %v916_v46 = vmul.f32 %v2712_v16, %v908_v0  ;;  %v1476_v37 = vmul.f32 %v6037_v26, %v1008_v28  ;;  %v1812_v3 = vmul.f32 %v6038_v57, %v952_v50  ;;  %v6039_v35 = vld [vmem:[#allocation34_spill] sm:$0xff]  ;;  %v6042_v16 = vld [vmem:[#allocation53_spill] sm:$0xff] }
 0x111   :  { %vm532_vm4 = vmand %vm260_vm12, %vm524_vm7  ;;  %v972_v32 = vmul.f32 %v2720_v19, %v964_v15  ;;  %v1000_v27 = vmul.f32 %v2720_v19, %v992_v7  ;;  %v1840_v29 = vmul.f32 %v6039_v35, %v4569_v14  ;;  %v1860_v21 = vmul.f32 %v6040_v25, %v1008_v28  ;;  %v6043_v0 = vld [vmem:[#allocation37_spill] sm:$0xff]  ;;  %v6044_v19 = vld [vmem:[#allocation38_spill] sm:$0xff] }
 0x112   :  { %v4645_v36 = vsel %vm532_vm4, 1.0, %v5782_v51  ;;  %v4651_v20 = vadd.f32 %v916_v46, %v888_v30  ;;  %v4656_v7 = vsub.f32 %v4559_v60, %v6042_v16  ;;  %v4660_v15 = vsub.f32 %v4559_v60, %v6043_v0  ;;  %v6045_v35 = vld [vmem:[#allocation39_spill] sm:$0xff]  ;;  %v2404_v16 = vld [vmem:[#allocation3 + $0xf8] sm:$0xff]  ;;  %vm4683_vm12 = vmxor %vm236_vm8, %vm2988_vm5 }
 0x113   :  { %v980_v56 = vadd.f32 %v972_v32, %v944_v63  ;;  %v1028_v31 = vmul.f32 %v4645_v36, %v1020_v59  ;;  %v4664_v50 = vsub.f32 %v4559_v60, %v6044_v19  ;;  %v4668_v28 = vsub.f32 %v4559_v60, %v6045_v35  ;;  %v2388_v0 = vld [vmem:[#allocation3 + $0x78] sm:$0xff]  ;;  %v2403_v25 = vld [vmem:[#allocation3 + $0xf0] sm:$0xff]  ;;  %2773 = vmatprep.subr.mxu0 %v2404_v16 }
 0x114   :  { %6041 = vst [vmem:[#allocation20_spill] sm:$0xff] %v4651_v20  ;;  %v4671_v30 = vsub.f32 0.0, %v4569_v14  ;;  %v1416_v32 = vmul.f32 %v1408_v55, %v4651_v20  ;;  %vm204_vm11 = vcmp.ge.f32.partialorder %v4656_v7, 0.0  ;;  %vm212_vm13 = vcmp.ge.f32.partialorder %v4660_v15, 0.0  ;;  %2861 = vmatprep.subr.mxu1 %v2404_v16  ;;  %2774 = vmatpush3.msra.mxu0 %v2388_v0  ;;  %v2402_v14 = vld [vmem:[#allocation3 + $0xe8] sm:$0xff]  ;;  %v6049_v16 = vld [vmem:[#allocation40_spill] sm:$0xff] }
 0x115   :  { %v4673_v63 = vadd.f32 %v1028_v31, %v1000_v27  ;;  %v1436_v59 = vmul.f32 %v1428_v45, %v980_v56  ;;  %v1464_v46 = vmul.f32 %v1456_v22, %v980_v56  ;;  %vm220_vm9 = vcmp.ge.f32.partialorder %v4664_v50, 0.0  ;;  %v2387_v45 = vld [vmem:[#allocation3 + $0x70] sm:$0xff]  ;;  %vm300_vm15 = vmxor %vm212_vm13, %vm2988_vm5  ;;  %v6048_v27 = vld [vmem:[#allocation54_spill] sm:$0xff]  ;;  %2877 = vmatpush3.msra.mxu1 %v2388_v0  ;;  %2775 = vmatprep.subr.mxu0 %v2403_v25 }
 0x116   :  { %vm228_vm10 = vcmp.ge.f32.partialorder %v4668_v28, 0.0  ;;  %v656_v55 = vmul.f32 %v6048_v27, %v4656_v7  ;;  %v672_v35 = vsub.f32 0.0, %v4664_v50  ;;  %vm308_vm8 = vmand %vm204_vm11, %vm300_vm15  ;;  %v6051_v57 = vld [vmem:[#allocation44_spill] sm:$0xff]  ;;  %v2386_v27 = vld [vmem:[#allocation3 + $0x68] sm:$0xff]  ;;  %2862 = vmatprep.subr.mxu1 %v2403_v25  ;;  %2776 = vmatpush3.msra.mxu0 %v2387_v45  ;;  %v1648_v18 = vmul.f32 %v6010_v6, %v4656_v7 }
 0x117   :  { %v1444_v22 = vadd.f32 %v1436_v59, %v1416_v32  ;;  %v1484_v56 = vmul.f32 %v1476_v37, %v4673_v63  ;;  %v712_v32 = vmul.f32 %v6049_v16, %v4660_v15  ;;  %v728_v37 = vsub.f32 0.0, %v4668_v28  ;;  %v6050_v59 = vld [vmem:[#allocation42_spill] sm:$0xff]  ;;  %vm332_vm3 = vmxor %vm220_vm9, %vm2988_vm5  ;;  %v2401_v16 = vld [vmem:[#allocation3 + $0xe0] sm:$0xff]  ;;  %2878 = vmatpush3.msra.mxu1 %v2387_v45  ;;  %2777 = vmatprep.subr.mxu0 %v2402_v14 }
 0x118   :  { %v768_v19 = vmul.f32 %v6050_v59, %v4664_v50  ;;  %v796_v26 = vmul.f32 %v6051_v57, %v4671_v30  ;;  %v2672_v4 = vsel %vm308_vm8, 1.0, %v5782_v51  ;;  %vm340_vm2 = vmand %vm212_vm13, %vm332_vm3  ;;  %v6053_v59 = vld [vmem:[#allocation55_spill] sm:$0xff]  ;;  %v6056_v45 = vld [vmem:[#allocation57_spill] sm:$0xff]  ;;  %2778 = vmatpush3.msra.mxu0 %v2386_v27  ;;  %2863 = vmatprep.subr.mxu1 %v2402_v14  ;;  %v4742_v14 = vsub.f32 %v4559_v60, %v5858_v38 }
 0x119   :  { %v4703_v20 = vadd.f32 %v1484_v56, %v1464_v46  ;;  %v4705_v0 = vmul.f32 %v1812_v3, %v1444_v22  ;;  %v1848_v47 = vmul.f32 %v1840_v29, %v1444_v22  ;;  %v664_v57 = vmul.f32 %v2672_v4, %v656_v55  ;;  %v6054_v46 = vld [vmem:[#allocation41_spill] sm:$0xff]  ;;  %v6055_v3 = vld [vmem:[#allocation56_spill] sm:$0xff]  ;;  %vm364_vm0 = vmxor %vm228_vm10, %vm2988_vm5  ;;  %2779 = vmatprep.subr.mxu0 %v2401_v16 }
 0x11a   :  { %v684_v25 = vmul.f32 %v6053_v59, %v672_v35  ;;  %v740_v56 = vmul.f32 %v6054_v46, %v728_v37  ;;  %v1216_v29 = vmul.f32 %v6055_v3, %v4656_v7  ;;  %v2385_v22 = vld [vmem:[#allocation3 + $0x60] sm:$0xff]  ;;  %v2680_v5 = vsel %vm340_vm2, 1.0, %v5782_v51  ;;  %v6057_v4 = vld [vmem:[#allocation47_spill] sm:$0xff]  ;;  %v2400_v55 = vld [vmem:[#allocation3 + $0xd8] sm:$0xff]  ;;  %2879 = vmatpush3.msra.mxu1 %v2386_v27 }
 0x11b   :  { %6052 = vst [vmem:[#allocation60_spill] sm:$0xff] %v4705_v0  ;;  %v1868_v0 = vmul.f32 %v1860_v21, %v4703_v20  ;;  %v1236_v42 = vmul.f32 %v6056_v45, %v728_v37  ;;  %v1264_v35 = vmul.f32 %v6057_v4, %v4660_v15  ;;  %vm372_vm1 = vmand %vm220_vm9, %vm364_vm0  ;;  %v720_v46 = vmul.f32 %v2680_v5, %v712_v32  ;;  %v6058_v21 = vld [vmem:[#allocation48_spill] sm:$0xff]  ;;  %v2399_v7 = vld [vmem:[#allocation3 + $0xd0] sm:$0xff] }
 0x11c   :  { %v692_v3 = vmul.f32 %v2680_v5, %v684_v25  ;;  %v1284_v59 = vmul.f32 %v6058_v21, %v4671_v30  ;;  %v2688_v4 = vsel %vm372_vm1, 1.0, %v5782_v51  ;;  %vm404_vm7 = vmand %vm228_vm10, %vm4683_vm12  ;;  %v1668_v5 = vmul.f32 %v5909_v44, %v4671_v30  ;;  %2780 = vmatpush3.msra.mxu0 %v2385_v22  ;;  %v2383_v31 = vld [vmem:[#allocation3 + $0x50] sm:$0xff]  ;;  %2864 = vmatprep.subr.mxu1 %v2401_v16  ;;  %v2398_v27 = vld [vmem:[#allocation3 + $0xc8] sm:$0xff] }
 0x11d   :  { %v1876_v37 = vadd.f32 %v1868_v0, %v1848_v47  ;;  %v2696_v32 = vsel %vm404_vm7, 1.0, %v5782_v51  ;;  %v748_v0 = vmul.f32 %v2688_v4, %v740_v56  ;;  %v776_v25 = vmul.f32 %v2688_v4, %v768_v19  ;;  %2781 = vmatprep.subr.mxu0 %v2400_v55  ;;  %v2382_v16 = vld [vmem:[#allocation3 + $0x48] sm:$0xff]  ;;  %v2397_v4 = vld [vmem:[#allocation3 + $0xc0] sm:$0xff]  ;;  %2880 = vmatpush3.msra.mxu1 %v2385_v22 }
 0x11e   :  { %v700_v47 = vadd.f32 %v692_v3, %v664_v57  ;;  %v804_v6 = vmul.f32 %v2696_v32, %v796_v26  ;;  %vm276_vm4 = vcmp.ge.f32.partialorder %v4742_v14, 0.0  ;;  %v1048_v30 = vmul.f32 %v5913_v49, %v4581_v33  ;;  %2782 = vmatpush3.msra.mxu0 %v4731_v48  ;;  %2865 = vmatprep.subr.mxu1 %v2400_v55 }
 0x11f   :  { %2235 = vrot.lane.b32.xlu0 %v1876_v37, %s2991_s3  ;;  %v1064_v38 = vsub.f32 0.0, %v4742_v14  ;;  %v756_v44 = vadd.f32 %v748_v0, %v720_v46  ;;  %vm556_vm11 = vmxor %vm276_vm4, %vm2988_vm5  ;;  %v1504_v19 = vmul.f32 %v5914_v39, %v4577_v62  ;;  %v1888_v26 = vmul.f32 %v5961_v17, %v4573_v12  ;;  %2783 = vmatprep.subr.mxu0 %v2399_v7  ;;  %v2381_v39 = vld [vmem:[#allocation3 + $0x40] sm:$0xff] }
 0x120   :  { %v1224_v57 = vmul.f32 %v1216_v29, %v700_v47  ;;  %v812_v56 = vadd.f32 %v804_v6, %v776_v25  ;;  %vm564_vm13 = vmand %vm268_vm14, %vm556_vm11  ;;  %v1056_v3 = vmul.f32 %v4645_v36, %v1048_v30  ;;  %2784 = vmatpush3.msra.mxu0 %v2383_v31  ;;  %2881 = vmatpush3.msra.mxu1 %v4731_v48 }
 0x121   :  { %v1076_v46 = vmul.f32 %v5865_v1, %v1064_v38  ;;  %v1524_v29 = vmul.f32 %v5866_v34, %v1064_v38  ;;  %v1244_v37 = vmul.f32 %v1236_v42, %v756_v44  ;;  %v1272_v47 = vmul.f32 %v1264_v35, %v756_v44  ;;  %2785 = vmatprep.subr.mxu0 %v2398_v27 }
 0x122   :  { %v2736_v0 = vsel %vm564_vm13, 1.0, %v5782_v51  ;;  %v1512_v17 = vmul.f32 %v1504_v19, %v4673_v63  ;;  %v1292_v6 = vmul.f32 %v1284_v59, %v812_v56  ;;  %v1896_v49 = vmul.f32 %v1888_v26, %v4703_v20  ;;  %2786 = vmatpush3.msra.mxu0 %v2382_v16  ;;  %2866 = vmatprep.subr.mxu1 %v2399_v7 }
 0x123   :  { %v1084_v25 = vmul.f32 %v2736_v0, %v1076_v46  ;;  %v1908_v36 = vmul.f32 %v5867_v24, %v1064_v38  ;;  %v1252_v30 = vadd.f32 %v1244_v37, %v1224_v57  ;;  %v824_v34 = vmul.f32 %v5910_v9, %v4668_v28  ;;  %2787 = vmatprep.subr.mxu0 %v2397_v4 }
 0x124   :  { %v840_v44 = vsub.f32 0.0, %v4573_v12  ;;  %v1312_v42 = vmul.f32 %v5856_v10, %v4664_v50  ;;  %v1300_v63 = vadd.f32 %v1292_v6, %v1272_v47  ;;  %v1696_v59 = vmul.f32 %v5857_v54, %v4660_v15  ;;  %2788 = vmatpush3.msra.mxu0 %v2381_v39  ;;  %2882 = vmatpush3.msra.mxu1 %v2383_v31 }
 0x125   :  { %v1092_v22 = vadd.f32 %v1084_v25, %v1056_v3  ;;  %v184_v38 = vsub.f32 %v4559_v60, %v3498_v52  ;;  %v1656_v20 = vmul.f32 %v1648_v18, %v1252_v30  ;;  %v832_v35 = vmul.f32 %v2696_v32, %v824_v34  ;;  %2867 = vmatprep.subr.mxu1 %v2398_v27 }
 0x126   :  { %v852_v57 = vmul.f32 %v5859_v41, %v840_v44  ;;  %v1320_v19 = vmul.f32 %v1312_v42, %v812_v56  ;;  %v1676_v12 = vmul.f32 %v1668_v5, %v1300_v63  ;;  %v1332_v55 = vmul.f32 %v5911_v61, %v840_v44  ;;  %2883 = vmatpush3.msra.mxu1 %v2382_v16 }
 0x127   :  { %v1532_v26 = vmul.f32 %v1524_v29, %v1092_v22  ;;  %v1704_v46 = vmul.f32 %v1696_v59, %v1300_v63  ;;  %v1716_v15 = vmul.f32 %v5912_v8, %v840_v44  ;;  %v196_v37 = vsub.f32 %v4559_v60, %v3504_v23  ;;  %2868 = vmatprep.subr.mxu1 %v2397_v4  ;;  %v6060_v4 = vld [vmem:[#allocation63_spill] sm:$0xff] }
 0x128   :  { %v860_v3 = vmul.f32 %v4600_v58, %v852_v57  ;;  %vm284_vm14 = vcmp.ge.f32.partialorder %v184_v38, 0.0  ;;  %v1684_v34 = vadd.f32 %v1676_v12, %v1656_v20  ;;  %v1104_v48 = vmul.f32 %v5868_v43, %v4585_v53  ;;  %2884 = vmatpush3.msra.mxu1 %v2381_v39 }
 0x129   :  { %v1540_v18 = vadd.f32 %v1532_v26, %v1512_v17  ;;  %vm588_vm9 = vmxor %vm284_vm14, %vm2988_vm5  ;;  %v1120_v5 = vsub.f32 0.0, %v184_v38  ;;  %vm292_vm10 = vcmp.ge.f32.partialorder %v196_v37, 0.0  ;;  %v1160_v60 = vmul.f32 %v3514_v40, %v4742_v14  ;;  %v6061_v38 = vld [vmem:[#allocation64_spill] sm:$0xff] }
 0x12a   :  { %v868_v7 = vadd.f32 %v860_v3, %v832_v35  ;;  %vm596_vm12 = vmand %vm276_vm4, %vm588_vm9  ;;  %v1176_v58 = vsub.f32 0.0, %v196_v37  ;;  %2104 = vrot.lane.b32.xlu1 %v1684_v34, %s2991_s3  ;;  %v1112_v31 = vmul.f32 %v2736_v0, %v1104_v48  ;;  %v1552_v14 = vmul.f32 %v3525_v2, %v4581_v33  ;;  %v6062_v35 = vld [vmem:[#allocation65_spill] sm:$0xff]  ;;  %v6065_v3 = vld [vmem:[#allocation68_spill] sm:$0xff] }
 0x12b   :  { %v1916_v17 = vmul.f32 %v1908_v36, %v1540_v18  ;;  %v2744_v32 = vsel %vm596_vm12, 1.0, %v5782_v51  ;;  %vm620_vm15 = vmxor %vm292_vm10, %vm2988_vm5  ;;  %v1132_v27 = vmul.f32 %v6011_v13, %v1120_v5  ;;  %v6059_v36 = vld [vmem:[#allocation62_spill] sm:$0xff]  ;;  %v1600_v63 = vmul.f32 %v6060_v4, %v4585_v53  ;;  %v6066_v48 = vld [vmem:[#allocation71_spill] sm:$0xff] }
 0x12c   :  { %v1340_v56 = vmul.f32 %v1332_v55, %v868_v7  ;;  %vm628_vm8 = vmand %vm284_vm14, %vm620_vm15  ;;  %v1168_v29 = vmul.f32 %v2744_v32, %v1160_v60  ;;  %v1188_v47 = vmul.f32 %v6012_v11, %v1176_v58  ;;  %v1572_v30 = vmul.f32 %v6059_v36, %v1120_v5  ;;  %v6064_v55 = vld [vmem:[#allocation67_spill] sm:$0xff] }
 0x12d   :  { %v1924_v16 = vadd.f32 %v1916_v17, %v1896_v49  ;;  %v2752_v6 = vsel %vm628_vm8, 1.0, %v5782_v51  ;;  %v1140_v25 = vmul.f32 %v2744_v32, %v1132_v27  ;;  %v1560_v42 = vmul.f32 %v1552_v14, %v1092_v22  ;;  %v6063_v49 = vld [vmem:[#allocation66_spill] sm:$0xff]  ;;  %v4816_v17 = vld [vmem:[%s5580_s0 + $0x20] sm:$0xff] }
 0x12e   :  { %v1348_v0 = vadd.f32 %v1340_v56, %v1320_v19  ;;  %v1196_v44 = vmul.f32 %v2752_v6, %v1188_v47  ;;  %v1620_v20 = vmul.f32 %v6061_v38, %v1176_v58  ;;  %v1936_v39 = vmul.f32 %v6062_v35, %v4577_v62  ;;  %v2396_v62 = vld [vmem:[#allocation3 + $0xb8] sm:$0xff]  ;;  %v6067_v32 = vld [vmem:[#allocation26_spill] sm:$0xff]  ;;  %v6071_v6 = vld [vmem:[#allocation29_spill] sm:$0xff] }
 0x12f   :  { %2275 = vrot.lane.b32.xlu0 %v1924_v16, %s2990_s17  ;;  %v1148_v59 = vadd.f32 %v1140_v25, %v1112_v31  ;;  %v1956_v57 = vmul.f32 %v6063_v49, %v1120_v5  ;;  %v1984_v19 = vmul.f32 %v6064_v55, %v4581_v33  ;;  %v2004_v22 = vmul.f32 %v6065_v3, %v1176_v58  ;;  %v6068_v31 = vld [vmem:[#allocation72_spill] sm:$0xff]  ;;  %v6069_v33 = vld [vmem:[#allocation73_spill] sm:$0xff]  ;;  %v6070_v14 = vld [vmem:[#allocation74_spill] sm:$0xff] }
 0x130   :  { %v1724_v12 = vmul.f32 %v1716_v15, %v1348_v0  ;;  %v1204_v26 = vadd.f32 %v1196_v44, %v1168_v29  ;;  %v1944_v53 = vmul.f32 %v1936_v39, %v1540_v18  ;;  %v1360_v60 = vmul.f32 %v6066_v48, %v4668_v28  ;;  %2789 = vmatprep.subr.mxu0 %v2396_v62  ;;  %v2380_v56 = vld [vmem:[#allocation3 + $0x38] sm:$0xff]  ;;  %v2395_v18 = vld [vmem:[#allocation3 + $0xb0] sm:$0xff]  ;;  %v6097_v55 = vld [vmem:[#allocation38_spill] sm:$0xff] }
 0x131   :  { %v1580_v37 = vmul.f32 %v1572_v30, %v1148_v59  ;;  %v1608_v34 = vmul.f32 %v1600_v63, %v1148_v59  ;;  %v1380_v27 = vmul.f32 %v6068_v31, %v6067_v32  ;;  %v1744_v58 = vmul.f32 %v6069_v33, %v4664_v50  ;;  %2790 = vmatpush3.msra.mxu0 %v2380_v56  ;;  %v6072_v44 = vld [vmem:[#allocation20_spill] sm:$0xff]  ;;  %v6073_v50 = vld [vmem:[#allocation27_spill] sm:$0xff] }
 0x132   :  { %v1732_v5 = vadd.f32 %v1724_v12, %v1704_v46  ;;  %v1628_v15 = vmul.f32 %v1620_v20, %v1204_v26  ;;  %v1368_v47 = vmul.f32 %v1360_v60, %v868_v7  ;;  %v1764_v16 = vmul.f32 %v6070_v14, %v6067_v32  ;;  %v2379_v46 = vld [vmem:[#allocation3 + $0x30] sm:$0xff]  ;;  %v6074_v12 = vld [vmem:[#allocation9_spill] sm:$0xff]  ;;  %2791 = vmatprep.subr.mxu0 %v2395_v18  ;;  %v6077_v32 = vld [vmem:[#allocation12_spill] sm:$0xff] }
 0x133   :  { %v1588_v29 = vadd.f32 %v1580_v37, %v1560_v42  ;;  %v1792_v25 = vmul.f32 %v6071_v6, %v4668_v28  ;;  %v1388_v63 = vmul.f32 %v1380_v27, %v6072_v44  ;;  %v1752_v59 = vmul.f32 %v1744_v58, %v1348_v0  ;;  %v4832_v42 = vld [vmem:[#allocation3 + $0xa8] sm:$0xff]  ;;  %2792 = vmatpush3.msra.mxu0 %v2379_v46 }
 0x134   :  { %2145 = vrot.lane.b32.xlu1 %v1732_v5, %s2990_s17  ;;  %v1636_v30 = vadd.f32 %v1628_v15, %v1608_v34  ;;  %v4830_v20 = vsub.f32 %v4816_v17, %v6073_v50  ;;  %v4836_v26 = vsub.f32 %v4816_v17, %v6074_v12  ;;  %v6075_v28 = vld [vmem:[#allocation10_spill] sm:$0xff]  ;;  %v6076_v5 = vld [vmem:[#allocation11_spill] sm:$0xff]  ;;  %2793 = vmatprep.subr.mxu0 %v4832_v42 }
 0x135   :  { %v1964_v7 = vmul.f32 %v1956_v57, %v1588_v29  ;;  %v1992_v39 = vmul.f32 %v1984_v19, %v1588_v29  ;;  %v4840_v37 = vsub.f32 %v4816_v17, %v6075_v28  ;;  %v4842_v34 = vld [vmem:[#allocation3 + $0x28] sm:$0xff]  ;;  %v1396_v60 = vadd.f32 %v1388_v63, %v1368_v47  ;;  %v4852_v19 = vld [vmem:[#allocation3 + $0xa0] sm:$0xff]  ;;  %2869 = vmatprep.subr.mxu1 %v2396_v62  ;;  %v6079_v62 = vld [vmem:[#allocation28_spill] sm:$0xff] }
 0x136   :  { %v2012_v0 = vmul.f32 %v2004_v22, %v1636_v30  ;;  %v4846_v15 = vsub.f32 %v4816_v17, %v6076_v5  ;;  %v4850_v57 = vsub.f32 %v4816_v17, %v6077_v32  ;;  %vm237_vm3 = vcmp.ge.f32.partialorder %v4830_v20, 0.0  ;;  %v4858_v22 = vld [vmem:[#allocation3 + $0x20] sm:$0xff]  ;;  %2794 = vmatpush3.msra.mxu0 %v4842_v34  ;;  %2885 = vmatpush3.msra.mxu1 %v2380_v56  ;;  %v6081_v30 = vld [vmem:[#allocation14_spill] sm:$0xff]  ;;  %v4881_v63 = vld [vmem:[#allocation3 + $0x18] sm:$0xff] }
 0x137   :  { %v1972_v27 = vadd.f32 %v1964_v7, %v1944_v53  ;;  %vm245_vm2 = vcmp.ge.f32.partialorder %v4836_v26, 0.0  ;;  %vm253_vm0 = vcmp.ge.f32.partialorder %v4840_v37, 0.0  ;;  %v1772_v29 = vmul.f32 %v1764_v16, %v1396_v60  ;;  %v4867_v53 = vld [vmem:[#allocation3 + $0x98] sm:$0xff]  ;;  %2795 = vmatprep.subr.mxu0 %v4852_v19  ;;  %2870 = vmatprep.subr.mxu1 %v2395_v18  ;;  %v6088_v28 = vld [vmem:[#allocation21_spill] sm:$0xff]  ;;  %v4919_v12 = vld [vmem:[#allocation3 + $0x88] sm:$0xff] }
 0x138   :  { %v2020_v58 = vadd.f32 %v2012_v0, %v1992_v39  ;;  %v4860_v47 = vmul.f32 %v1792_v25, %v1396_v60  ;;  %vm261_vm1 = vcmp.ge.f32.partialorder %v4846_v15, 0.0  ;;  %vm429_vm7 = vmxor %vm245_vm2, %vm2988_vm5  ;;  %vm269_vm4 = vcmp.ge.f32.partialorder %v4850_v57, 0.0  ;;  %v6082_v0 = vld [vmem:[#allocation15_spill] sm:$0xff]  ;;  %2796 = vmatpush3.msra.mxu0 %v4858_v22  ;;  %2886 = vmatpush3.msra.mxu1 %v2379_v46  ;;  %v6087_v32 = vld [vmem:[#allocation32_spill] sm:$0xff] }
 0x139   :  { %2315 = vrot.lane.b32.xlu0 %v1972_v27, %s2992_s24  ;;  %vm437_vm11 = vmand %vm237_vm3, %vm429_vm7  ;;  %v881_v16 = vmul.f32 %v6079_v62, %v4830_v20  ;;  %v4876_v25 = vsub.f32 0.0, %v4840_v37  ;;  %v937_v44 = vmul.f32 %v6081_v30, %v4836_v26  ;;  %v1780_v56 = vadd.f32 %v1772_v29, %v1752_v59  ;;  %v4893_v27 = vpop.permute.xlu0 %2229  ;;  %v6085_v62 = vld [vmem:[#allocation31_spill] sm:$0xff]  ;;  %2797 = vmatprep.subr.mxu0 %v4867_v53  ;;  %v6089_v50 = vld [vmem:[#allocation18_spill] sm:$0xff] }
 0x13a   :  { %6078 = vst [vmem:[#allocation45_spill] sm:$0xff] %v4860_v47  ;;  %2344 = vst.msk [vmem:[#allocation2 + $0x58] sm:$0xff] %vm2081_vm6, %v2020_v58  ;;  %v4885_v7 = vsel %vm437_vm11, 1.0, %v5782_v51  ;;  %v953_v39 = vsub.f32 0.0, %v4846_v15  ;;  %v993_v60 = vmul.f32 %v6082_v0, %v4840_v37  ;;  %v4896_v47 = vld [vmem:[#allocation3 + $0x90] sm:$0xff]  ;;  %v6084_v58 = vld [vmem:[#allocation30_spill] sm:$0xff]  ;;  %v1409_v0 = vmul.f32 %v6085_v62, %v4830_v20  ;;  %2798 = vmatpush3.msra.mxu0 %v4881_v63 }
 0x13b   :  { %6080 = vst [vmem:[#allocation50_spill] sm:$0xff] %v4876_v25  ;;  %vm461_vm13 = vmxor %vm253_vm0, %vm2988_vm5  ;;  %v889_v59 = vmul.f32 %v4885_v7, %v881_v16  ;;  %v909_v29 = vmul.f32 %v6084_v58, %v4876_v25  ;;  %v1009_v30 = vsub.f32 0.0, %v4850_v57  ;;  %2186 = vrot.lane.b32.xlu1 %v1780_v56, %s2992_s24  ;;  %v6086_v16 = vld [vmem:[#allocation17_spill] sm:$0xff]  ;;  %v1457_v62 = vmul.f32 %v6088_v28, %v4836_v26  ;;  %v6090_v14 = vld [vmem:[#allocation22_spill] sm:$0xff] }
 0x13c   :  { %6083 = vst [vmem:[#allocation26_spill] sm:$0xff] %v4893_v27  ;;  %vm469_vm14 = vmand %vm245_vm2, %vm461_vm13  ;;  %v4907_v27 = vld [vmem:[#allocation3 + $0x10] sm:$0xff]  ;;  %v965_v58 = vmul.f32 %v6086_v16, %v953_v39  ;;  %v1429_v5 = vmul.f32 %v6087_v32, %v953_v39  ;;  %2799 = vmatprep.subr.mxu0 %v4896_v47  ;;  %v4926_v16 = vld [vmem:[#allocation3 + $0x8] sm:$0xff]  ;;  %2871 = vmatprep.subr.mxu1 %v4832_v42 }
 0x13d   :  { %v2713_v18 = vsel %vm469_vm14, 1.0, %v5782_v51  ;;  %vm493_vm9 = vmxor %vm261_vm1, %vm2988_vm5  ;;  %v1021_v6 = vmul.f32 %v6089_v50, %v1009_v30  ;;  %v1477_v33 = vmul.f32 %v6090_v14, %v1009_v30  ;;  %v6091_v28 = vld [vmem:[#allocation33_spill] sm:$0xff]  ;;  %v6092_v25 = vld [vmem:[#allocation34_spill] sm:$0xff]  ;;  %2800 = vmatpush3.msra.mxu0 %v4907_v27  ;;  %2887 = vmatpush3.msra.mxu1 %v4842_v34 }
 0x13e   :  { %vm501_vm10 = vmand %vm253_vm0, %vm493_vm9  ;;  %v917_v46 = vmul.f32 %v2713_v18, %v909_v29  ;;  %v945_v56 = vmul.f32 %v2713_v18, %v937_v44  ;;  %v1813_v31 = vmul.f32 %v6091_v28, %v953_v39  ;;  %v1841_v29 = vmul.f32 %v6092_v25, %v4830_v20  ;;  %v6093_v44 = vld [vmem:[#allocation35_spill] sm:$0xff]  ;;  %v4939_v14 = vld [vmem:[#allocation3 + $0x80] sm:$0xff]  ;;  %2801 = vmatprep.subr.mxu0 %v4919_v12 }
 0x13f   :  { %v2721_v32 = vsel %vm501_vm10, 1.0, %v5782_v51  ;;  %vm525_vm12 = vmxor %vm269_vm4, %vm2988_vm5  ;;  %v4936_v18 = vmul.f32 %v6093_v44, %v1009_v30  ;;  %v6095_v39 = vld [vmem:[#allocation53_spill] sm:$0xff]  ;;  %2802 = vmatpush3.msra.mxu0 %v4926_v16  ;;  %2872 = vmatprep.subr.mxu1 %v4852_v19 }
 0x140   :  { %vm533_vm15 = vmand %vm261_vm1, %vm525_vm12  ;;  %v4944_v50 = vadd.f32 %v917_v46, %v889_v59  ;;  %v973_v48 = vmul.f32 %v2721_v32, %v965_v58  ;;  %v1001_v3 = vmul.f32 %v2721_v32, %v993_v60  ;;  %v4948_v28 = vsub.f32 %v4816_v17, %v6095_v39  ;;  %v4951_v30 = vld [vmem:[#allocation3] sm:$0xff]  ;;  %v6098_v32 = vld [vmem:[#allocation39_spill] sm:$0xff]  ;;  %v4968_v58 = vpop.permute.xlu0 %2098  ;;  %2803 = vmatprep.subr.mxu0 %v4939_v14 }
 0x141   :  { %v4954_v44 = vsel %vm533_vm15, 1.0, %v5782_v51  ;;  %v6096_v25 = vld [vmem:[#allocation37_spill] sm:$0xff]  ;;  %v4962_v59 = vsub.f32 %v4816_v17, %v6097_v55  ;;  %v4966_v60 = vsub.f32 %v4816_v17, %v6098_v32  ;;  %6099 = vst [vmem:[#allocation76_spill] sm:$0xff] %v4968_v58  ;;  %vm4983_vm7 = vmxor %vm237_vm3, %vm2988_vm5  ;;  %2804 = vmatpush3.msra.mxu0 %v4951_v30  ;;  %2888 = vmatpush3.msra.mxu1 %v4858_v22  ;;  %v6105_v55 = vld [vmem:[#allocation55_spill] sm:$0xff] }
 0x142   :  { %6094 = vst [vmem:[#allocation20_spill] sm:$0xff] %v4944_v50  ;;  %v4958_v42 = vsub.f32 %v4816_v17, %v6096_v25  ;;  %v981_v46 = vadd.f32 %v973_v48, %v945_v56  ;;  %v1029_v39 = vmul.f32 %v4954_v44, %v1021_v6  ;;  %v1417_v25 = vmul.f32 %v1409_v0, %v4944_v50  ;;  %v6102_v6 = vld [vmem:[#allocation54_spill] sm:$0xff]  ;;  %v6114_v48 = vld [vmem:[#allocation59_spill] sm:$0xff] }
 0x143   :  { %vm205_vm8 = vcmp.ge.f32.partialorder %v4948_v28, 0.0  ;;  %vm221_vm0 = vcmp.ge.f32.partialorder %v4962_v59, 0.0  ;;  %vm229_vm1 = vcmp.ge.f32.partialorder %v4966_v60, 0.0  ;;  %v657_v34 = vmul.f32 %v6102_v6, %v4948_v28  ;;  %2873 = vmatprep.subr.mxu1 %v4867_v53  ;;  %v6103_v6 = vld [vmem:[#allocation40_spill] sm:$0xff] }
 0x144   :  { %vm213_vm2 = vcmp.ge.f32.partialorder %v4958_v42, 0.0  ;;  %v4991_v19 = vadd.f32 %v1029_v39, %v1001_v3  ;;  %v1437_v0 = vmul.f32 %v1429_v5, %v981_v46  ;;  %v1465_v56 = vmul.f32 %v1457_v62, %v981_v46  ;;  %v6104_v3 = vld [vmem:[#allocation42_spill] sm:$0xff]  ;;  %2889 = vmatpush3.msra.mxu1 %v4881_v63  ;;  %vm333_vm13 = vmxor %vm221_vm0, %vm2988_vm5  ;;  %v6107_v63 = vld [vmem:[#allocation44_spill] sm:$0xff]  ;;  %v5020_v49 = vpop.permute.xlu0 %2241 }
 0x145   :  { %vm301_vm11 = vmxor %vm213_vm2, %vm2988_vm5  ;;  %v673_v58 = vsub.f32 0.0, %v4962_v59  ;;  %v713_v32 = vmul.f32 %v6103_v6, %v4958_v42  ;;  %v729_v22 = vsub.f32 0.0, %v4966_v60  ;;  %v769_v5 = vmul.f32 %v6104_v3, %v4962_v59  ;;  %2874 = vmatprep.subr.mxu1 %v4896_v47  ;;  %6109 = vst [vmem:[#allocation55_spill] sm:$0xff] %v5020_v49 }
 0x146   :  { %vm309_vm3 = vmand %vm205_vm8, %vm301_vm11  ;;  %v785_v62 = vsub.f32 0.0, %v4830_v20  ;;  %v1445_v39 = vadd.f32 %v1437_v0, %v1417_v25  ;;  %v1485_v46 = vmul.f32 %v1477_v33, %v4991_v19  ;;  %v6106_v20 = vld [vmem:[#allocation41_spill] sm:$0xff]  ;;  %v6108_v33 = vld [vmem:[#allocation56_spill] sm:$0xff]  ;;  %2890 = vmatpush3.msra.mxu1 %v4907_v27 }
 0x147   :  { %v2673_v53 = vsel %vm309_vm3, 1.0, %v5782_v51  ;;  %v685_v6 = vmul.f32 %v6105_v55, %v673_v58  ;;  %vm341_vm14 = vmand %vm213_vm2, %vm333_vm13  ;;  %v741_v50 = vmul.f32 %v6106_v20, %v729_v22  ;;  %v1217_v0 = vmul.f32 %v6108_v33, %v4948_v28  ;;  %2875 = vmatprep.subr.mxu1 %v4919_v12  ;;  %v6111_v27 = vld [vmem:[#allocation47_spill] sm:$0xff] }
 0x148   :  { %v665_v3 = vmul.f32 %v2673_v53, %v657_v34  ;;  %v797_v25 = vmul.f32 %v6107_v63, %v785_v62  ;;  %v1493_v35 = vadd.f32 %v1485_v46, %v1465_v56  ;;  %v5023_v38 = vmul.f32 %v1813_v31, %v1445_v39  ;;  %vm365_vm9 = vmxor %vm229_vm1, %vm2988_vm5  ;;  %2891 = vmatpush3.msra.mxu1 %v4926_v16  ;;  %v6115_v63 = vld [vmem:[#allocation13_spill] sm:$0xff] }
 0x149   :  { %v1849_v58 = vmul.f32 %v1841_v29, %v1445_v39  ;;  %v2681_v47 = vsel %vm341_vm14, 1.0, %v5782_v51  ;;  %vm373_vm10 = vmand %vm221_vm0, %vm365_vm9  ;;  %v1237_v49 = vmul.f32 %v6056_v45, %v729_v22  ;;  %v1265_v31 = vmul.f32 %v6111_v27, %v4958_v42  ;;  %v5036_v29 = vld [vmem:[#allocation3 + $0x118] sm:$0xff]  ;;  %2876 = vmatprep.subr.mxu1 %v4939_v14 }
 0x14a   :  { %6110 = vst [vmem:[#allocation41_spill] sm:$0xff] %v5023_v38  ;;  %v693_v34 = vmul.f32 %v2681_v47, %v685_v6  ;;  %v721_v53 = vmul.f32 %v2681_v47, %v713_v32  ;;  %6112 = vst [vmem:[#allocation56_spill] sm:$0xff] %v5036_v29  ;;  %v1869_v56 = vmul.f32 %v4936_v18, %v1493_v35  ;;  %v2689_v39 = vsel %vm373_vm10, 1.0, %v5782_v51  ;;  %v6113_v32 = vld [vmem:[#allocation58_spill] sm:$0xff]  ;;  %v6116_v14 = vld [vmem:[#allocation16_spill] sm:$0xff] }
 0x14b   :  { %vm405_vm12 = vmand %vm229_vm1, %vm4983_vm7  ;;  %v1285_v12 = vmul.f32 %v6058_v21, %v785_v62  ;;  %v1649_v6 = vmul.f32 %v6113_v32, %v4948_v28  ;;  %v749_v46 = vmul.f32 %v2689_v39, %v741_v50  ;;  %v777_v47 = vmul.f32 %v2689_v39, %v769_v5  ;;  %2892 = vmatpush3.msra.mxu1 %v4951_v30  ;;  %v5058_v5 = vpop.permute.xlu0 %2110 }
 0x14c   :  { %v2697_v16 = vsel %vm405_vm12, 1.0, %v5782_v51  ;;  %v701_v22 = vadd.f32 %v693_v34, %v665_v3  ;;  %v1877_v18 = vadd.f32 %v1869_v56, %v1849_v58  ;;  %v1669_v27 = vmul.f32 %v6114_v48, %v785_v62  ;;  %2841 = vmatprep.subr.mxu1 %v5036_v29  ;;  %v6117_v3 = vld [vmem:[#allocation23_spill] sm:$0xff]  ;;  %6118 = vst [vmem:[#allocation59_spill] sm:$0xff] %v5058_v5 }
 0x14d   :  { %v805_v38 = vmul.f32 %v2697_v16, %v797_v25  ;;  %v173_v45 = vsub.f32 %v4816_v17, %v6115_v63  ;;  %v757_v21 = vadd.f32 %v749_v46, %v721_v53  ;;  %v1049_v32 = vmul.f32 %v6116_v14, %v4846_v15  ;;  %v6119_v25 = vld [vmem:[#allocation25_spill] sm:$0xff] }
 0x14e   :  { %v1225_v28 = vmul.f32 %v1217_v0, %v701_v22  ;;  %v1505_v50 = vmul.f32 %v6117_v3, %v4840_v37  ;;  %2237 = vrot.lane.b32.xlu0 %v1877_v18, %s2991_s3  ;;  %v1889_v58 = vmul.f32 %v6119_v25, %v4836_v26  ;;  %v6120_v22 = vld [vmem:[#allocation24_spill] sm:$0xff] }
 0x14f   :  { %v813_v30 = vadd.f32 %v805_v38, %v777_v47  ;;  %vm277_vm15 = vcmp.ge.f32.partialorder %v173_v45, 0.0  ;;  %v1065_v62 = vsub.f32 0.0, %v173_v45  ;;  %v1245_v34 = vmul.f32 %v1237_v49, %v757_v21 }
 0x150   :  { %v1273_v56 = vmul.f32 %v1265_v31, %v757_v21  ;;  %vm557_vm8 = vmxor %vm277_vm15, %vm2988_vm5  ;;  %v1057_v0 = vmul.f32 %v4954_v44, %v1049_v32  ;;  %v1513_v53 = vmul.f32 %v1505_v50, %v4991_v19  ;;  %v1897_v47 = vmul.f32 %v1889_v58, %v1493_v35  ;;  %v5078_v50 = vpop.permute.xlu1 %2269 }
 0x151   :  { %v1293_v39 = vmul.f32 %v1285_v12, %v813_v30  ;;  %vm565_vm2 = vmand %vm269_vm4, %vm557_vm8  ;;  %v1077_v38 = vmul.f32 %v5865_v1, %v1065_v62  ;;  %v1525_v46 = vmul.f32 %v6120_v22, %v1065_v62  ;;  %v1253_v18 = vadd.f32 %v1245_v34, %v1225_v28  ;;  %6121 = vst [vmem:[#allocation13_spill] sm:$0xff] %v5078_v50 }
 0x152   :  { %v2737_v49 = vsel %vm565_vm2, 1.0, %v5782_v51  ;;  %v1909_v21 = vmul.f32 %v5867_v24, %v1065_v62  ;;  %v825_v31 = vmul.f32 %v5910_v9, %v4966_v60  ;;  %v841_v19 = vsub.f32 0.0, %v4836_v26  ;;  %v5084_v62 = vpop.permute.xlu0 %2281 }
 0x153   :  { %v1301_v44 = vadd.f32 %v1293_v39, %v1273_v56  ;;  %v1085_v32 = vmul.f32 %v2737_v49, %v1077_v38  ;;  %v1313_v12 = vmul.f32 %v5856_v10, %v4962_v59  ;;  %v1657_v29 = vmul.f32 %v1649_v6, %v1253_v18  ;;  %6122 = vst [vmem:[#allocation16_spill] sm:$0xff] %v5084_v62 }
 0x154   :  { %v833_v5 = vmul.f32 %v2697_v16, %v825_v31  ;;  %v1697_v35 = vmul.f32 %v5857_v54, %v4958_v42  ;;  %v185_v28 = vsub.f32 %v4816_v17, %v3498_v52  ;;  %v853_v56 = vmul.f32 %v5859_v41, %v841_v19 }
 0x155   :  { %v1677_v58 = vmul.f32 %v1669_v27, %v1301_v44  ;;  %v1093_v34 = vadd.f32 %v1085_v32, %v1057_v0  ;;  %v1321_v26 = vmul.f32 %v1313_v12, %v813_v30  ;;  %v1333_v39 = vmul.f32 %v5911_v61, %v841_v19 }
 0x156   :  { %v1705_v38 = vmul.f32 %v1697_v35, %v1301_v44  ;;  %v1717_v50 = vmul.f32 %v5912_v8, %v841_v19  ;;  %v197_v6 = vsub.f32 %v4816_v17, %v3504_v23  ;;  %v861_v18 = vmul.f32 %v4885_v7, %v853_v56  ;;  %v5107_v35 = vpop.permute.xlu0 %2231 }
 0x157   :  { %v1685_v16 = vadd.f32 %v1677_v58, %v1657_v29  ;;  %v1533_v42 = vmul.f32 %v1525_v46, %v1093_v34  ;;  %vm285_vm4 = vcmp.ge.f32.partialorder %v185_v28, 0.0  ;;  %v1105_v27 = vmul.f32 %v5868_v43, %v4850_v57  ;;  %v5101_v29 = vpop.permute.xlu1 %2139  ;;  %6124 = vst [vmem:[#allocation25_spill] sm:$0xff] %v5107_v35 }
 0x158   :  { %vm293_vm0 = vcmp.ge.f32.partialorder %v197_v6, 0.0  ;;  %vm589_vm1 = vmxor %vm285_vm4, %vm2988_vm5  ;;  %v1121_v30 = vsub.f32 0.0, %v185_v28  ;;  %v1161_v0 = vmul.f32 %v3514_v40, %v173_v45  ;;  %v869_v44 = vadd.f32 %v861_v18, %v833_v5  ;;  %6123 = vst [vmem:[#allocation23_spill] sm:$0xff] %v5101_v29  ;;  %v6125_v29 = vld [vmem:[#allocation64_spill] sm:$0xff] }
 0x159   :  { %2106 = vrot.lane.b32.xlu1 %v1685_v16, %s2991_s3  ;;  %v1541_v31 = vadd.f32 %v1533_v42, %v1513_v53  ;;  %vm597_vm7 = vmand %vm277_vm15, %vm589_vm1  ;;  %v1177_v17 = vsub.f32 0.0, %v197_v6  ;;  %v1553_v7 = vmul.f32 %v3525_v2, %v4846_v15  ;;  %v1113_v32 = vmul.f32 %v2737_v49, %v1105_v27 }
 0x15a   :  { %v2745_v46 = vsel %vm597_vm7, 1.0, %v5782_v51  ;;  %vm621_vm11 = vmxor %vm293_vm0, %vm2988_vm5  ;;  %v1133_v19 = vmul.f32 %v6011_v13, %v1121_v30  ;;  %v1573_v12 = vmul.f32 %v6059_v36, %v1121_v30  ;;  %v1341_v45 = vmul.f32 %v1333_v39, %v869_v44  ;;  %v6127_v39 = vld [vmem:[#allocation66_spill] sm:$0xff]  ;;  %v6128_v36 = vld [vmem:[#allocation67_spill] sm:$0xff] }
 0x15b   :  { %v1917_v5 = vmul.f32 %v1909_v21, %v1541_v31  ;;  %vm629_vm3 = vmand %vm285_vm4, %vm621_vm11  ;;  %v1169_v53 = vmul.f32 %v2745_v46, %v1161_v0  ;;  %v1189_v58 = vmul.f32 %v6012_v11, %v1177_v17  ;;  %v1561_v16 = vmul.f32 %v1553_v7, %v1093_v34  ;;  %v6126_v21 = vld [vmem:[#allocation65_spill] sm:$0xff] }
 0x15c   :  { %v2753_v56 = vsel %vm629_vm3, 1.0, %v5782_v51  ;;  %v1141_v6 = vmul.f32 %v2745_v46, %v1133_v19  ;;  %v1601_v49 = vmul.f32 %v6060_v4, %v4850_v57  ;;  %v1349_v18 = vadd.f32 %v1341_v45, %v1321_v26  ;;  %v6129_v46 = vld [vmem:[#allocation68_spill] sm:$0xff]  ;;  %v5124_v19 = vpop.permute.xlu1 %2309 }
 0x15d   :  { %v1925_v42 = vadd.f32 %v1917_v5, %v1897_v47  ;;  %v1197_v27 = vmul.f32 %v2753_v56, %v1189_v58  ;;  %v1621_v62 = vmul.f32 %v6125_v29, %v1177_v17  ;;  %v1937_v28 = vmul.f32 %v6126_v21, %v4840_v37  ;;  %v6130_v47 = vld [vmem:[#allocation71_spill] sm:$0xff]  ;;  %6131 = vst [vmem:[#allocation24_spill] sm:$0xff] %v5124_v19  ;;  %v6132_v37 = vld [vmem:[#allocation50_spill] sm:$0xff]  ;;  %v6133_v58 = vld [vmem:[#allocation72_spill] sm:$0xff] }
 0x15e   :  { %v1149_v35 = vadd.f32 %v1141_v6, %v1113_v32  ;;  %v1957_v0 = vmul.f32 %v6127_v39, %v1121_v30  ;;  %v1985_v11 = vmul.f32 %v6128_v36, %v4846_v15  ;;  %v1725_v34 = vmul.f32 %v1717_v50, %v1349_v18  ;;  %v5131_v15 = vld [vmem:[%s5580_s0 + $0x28] sm:$0xff]  ;;  %v5133_v50 = vpop.permute.xlu0 %2100  ;;  %v6135_v6 = vld [vmem:[#allocation73_spill] sm:$0xff]  ;;  %v6179_v36 = vld [vmem:[#allocation48_spill] sm:$0xff] }
 0x15f   :  { %2277 = vrot.lane.b32.xlu0 %v1925_v42, %s2990_s17  ;;  %v1205_v7 = vadd.f32 %v1197_v27, %v1169_v53  ;;  %v2005_v57 = vmul.f32 %v6129_v46, %v1177_v17  ;;  %v1361_v26 = vmul.f32 %v6130_v47, %v4966_v60  ;;  %v1945_v45 = vmul.f32 %v1937_v28, %v1541_v31  ;;  %v6137_v31 = vld [vmem:[#allocation74_spill] sm:$0xff]  ;;  %v6138_v28 = vld [vmem:[#allocation29_spill] sm:$0xff] }
 0x160   :  { %v1581_v32 = vmul.f32 %v1573_v12, %v1149_v35  ;;  %v1609_v5 = vmul.f32 %v1601_v49, %v1149_v35  ;;  %v1381_v30 = vmul.f32 %v6133_v58, %v6132_v37  ;;  %6134 = vst [vmem:[#allocation50_spill] sm:$0xff] %v5133_v50  ;;  %v1733_v53 = vadd.f32 %v1725_v34, %v1705_v38  ;;  %v6136_v12 = vld [vmem:[#allocation20_spill] sm:$0xff]  ;;  %v6139_v50 = vld [vmem:[#allocation27_spill] sm:$0xff]  ;;  %v6140_v38 = vld [vmem:[#allocation9_spill] sm:$0xff] }
 0x161   :  { %v1629_v17 = vmul.f32 %v1621_v62, %v1205_v7  ;;  %v1369_v56 = vmul.f32 %v1361_v26, %v869_v44  ;;  %v1745_v42 = vmul.f32 %v6135_v6, %v4962_v59  ;;  %v1765_v49 = vmul.f32 %v6137_v31, %v6132_v37  ;;  %v6141_v7 = vld [vmem:[#allocation10_spill] sm:$0xff]  ;;  %v6163_v31 = vld [vmem:[#allocation53_spill] sm:$0xff] }
 0x162   :  { %v1589_v27 = vadd.f32 %v1581_v32, %v1561_v16  ;;  %v1389_v35 = vmul.f32 %v1381_v30, %v6136_v12  ;;  %v1793_v19 = vmul.f32 %v6138_v28, %v4966_v60  ;;  %2147 = vrot.lane.b32.xlu1 %v1733_v53, %s2990_s17  ;;  %v5145_v62 = vsub.f32 %v5131_v15, %v6139_v50  ;;  %v6142_v32 = vld [vmem:[#allocation11_spill] sm:$0xff]  ;;  %v5164_v30 = vpop.permute.xlu1 %2180  ;;  %v5169_v53 = vpop.permute.xlu0 %2271  ;;  %v6175_v46 = vld [vmem:[#allocation57_spill] sm:$0xff]  ;;  %v6180_v21 = vld [vmem:[#allocation58_spill] sm:$0xff] }
 0x163   :  { %v1637_v58 = vadd.f32 %v1629_v17, %v1609_v5  ;;  %v1753_v47 = vmul.f32 %v1745_v42, %v1349_v18  ;;  %v5149_v59 = vsub.f32 %v5131_v15, %v6140_v38  ;;  %v5153_v26 = vsub.f32 %v5131_v15, %v6141_v7  ;;  %v6143_v18 = vld [vmem:[#allocation12_spill] sm:$0xff]  ;;  %6144 = vst [vmem:[#allocation20_spill] sm:$0xff] %v5164_v30  ;;  %v6150_v12 = vld [vmem:[#allocation15_spill] sm:$0xff]  ;;  %v6159_v30 = vld [vmem:[#allocation33_spill] sm:$0xff] }
 0x164   :  { %v1965_v44 = vmul.f32 %v1957_v0, %v1589_v27  ;;  %v1993_v16 = vmul.f32 %v1985_v11, %v1589_v27  ;;  %v1397_v34 = vadd.f32 %v1389_v35, %v1369_v56  ;;  %v5157_v5 = vsub.f32 %v5131_v15, %v6142_v32  ;;  %6146 = vst [vmem:[#allocation9_spill] sm:$0xff] %v5169_v53  ;;  %v6149_v56 = vld [vmem:[#allocation14_spill] sm:$0xff] }
 0x165   :  { %v2013_v60 = vmul.f32 %v2005_v57, %v1637_v58  ;;  %v5161_v37 = vsub.f32 %v5131_v15, %v6143_v18  ;;  %vm238_vm13 = vcmp.ge.f32.partialorder %v5145_v62, 0.0  ;;  %vm246_vm14 = vcmp.ge.f32.partialorder %v5149_v59, 0.0 }
 0x166   :  { %v1973_v0 = vadd.f32 %v1965_v44, %v1945_v45  ;;  %v1773_v11 = vmul.f32 %v1765_v49, %v1397_v34  ;;  %v5166_v50 = vmul.f32 %v1793_v19, %v1397_v34  ;;  %vm254_vm9 = vcmp.ge.f32.partialorder %v5153_v26, 0.0  ;;  %vm430_vm15 = vmxor %vm246_vm14, %vm2988_vm5  ;;  %v6147_v19 = vld [vmem:[#allocation28_spill] sm:$0xff]  ;;  %v6151_v44 = vld [vmem:[#allocation30_spill] sm:$0xff] }
 0x167   :  { %v2021_v57 = vadd.f32 %v2013_v60, %v1993_v16  ;;  %vm262_vm10 = vcmp.ge.f32.partialorder %v5157_v5, 0.0  ;;  %vm270_vm12 = vcmp.ge.f32.partialorder %v5161_v37, 0.0  ;;  %vm438_vm8 = vmand %vm238_vm13, %vm430_vm15  ;;  %v882_v58 = vmul.f32 %v6147_v19, %v5145_v62  ;;  %v6152_v34 = vld [vmem:[#allocation31_spill] sm:$0xff]  ;;  %v6153_v60 = vld [vmem:[#allocation21_spill] sm:$0xff] }
 0x168   :  { %6145 = vst [vmem:[#allocation27_spill] sm:$0xff] %v5166_v50  ;;  %2317 = vrot.lane.b32.xlu0 %v1973_v0, %s2992_s24  ;;  %v1781_v45 = vadd.f32 %v1773_v11, %v1753_v47  ;;  %v5183_v17 = vsub.f32 0.0, %v5153_v26  ;;  %v938_v42 = vmul.f32 %v6149_v56, %v5149_v59  ;;  %v5189_v27 = vsel %vm438_vm8, 1.0, %v5782_v51  ;;  %vm462_vm2 = vmxor %vm254_vm9, %vm2988_vm5  ;;  %v6154_v0 = vld [vmem:[#allocation17_spill] sm:$0xff]  ;;  %v6156_v19 = vld [vmem:[#allocation32_spill] sm:$0xff]  ;;  %v5215_v56 = vpop.permute.xlu1 %2151  ;;  %v5221_v50 = vpop.permute.xlu0 %2243 }
 0x169   :  { %2345 = vst.msk [vmem:[#allocation2 + $0x70] sm:$0xff] %vm2081_vm6, %v2021_v57  ;;  %v954_v47 = vsub.f32 0.0, %v5157_v5  ;;  %v994_v35 = vmul.f32 %v6150_v12, %v5153_v26  ;;  %v1010_v49 = vsub.f32 0.0, %v5161_v37  ;;  %vm470_vm4 = vmand %vm246_vm14, %vm462_vm2  ;;  %v890_v38 = vmul.f32 %v5189_v27, %v882_v58  ;;  %v6155_v57 = vld [vmem:[#allocation18_spill] sm:$0xff] }
 0x16a   :  { %6148 = vst [vmem:[#allocation10_spill] sm:$0xff] %v5183_v17  ;;  %2188 = vrot.lane.b32.xlu1 %v1781_v45, %s2992_s24  ;;  %v910_v16 = vmul.f32 %v6151_v44, %v5183_v17  ;;  %v1410_v7 = vmul.f32 %v6152_v34, %v5145_v62  ;;  %v1458_v32 = vmul.f32 %v6153_v60, %v5149_v59  ;;  %v2714_v18 = vsel %vm470_vm4, 1.0, %v5782_v51  ;;  %vm494_vm0 = vmxor %vm262_vm10, %vm2988_vm5  ;;  %v6158_v34 = vld [vmem:[#allocation22_spill] sm:$0xff] }
 0x16b   :  { %v966_v11 = vmul.f32 %v6154_v0, %v954_v47  ;;  %v1022_v45 = vmul.f32 %v6155_v57, %v1010_v49  ;;  %v1430_v58 = vmul.f32 %v6156_v19, %v954_v47  ;;  %6157 = vst [vmem:[#allocation11_spill] sm:$0xff] %v5215_v56  ;;  %vm502_vm1 = vmand %vm254_vm9, %vm494_vm0  ;;  %v946_v44 = vmul.f32 %v2714_v18, %v938_v42  ;;  %v6161_v0 = vld [vmem:[#allocation34_spill] sm:$0xff]  ;;  %v6162_v19 = vld [vmem:[#allocation35_spill] sm:$0xff] }
 0x16c   :  { %v918_v12 = vmul.f32 %v2714_v18, %v910_v16  ;;  %v1478_v60 = vmul.f32 %v6158_v34, %v1010_v49  ;;  %v1814_v53 = vmul.f32 %v6159_v30, %v954_v47  ;;  %6160 = vst [vmem:[#allocation12_spill] sm:$0xff] %v5221_v50  ;;  %v2722_v28 = vsel %vm502_vm1, 1.0, %v5782_v51  ;;  %vm526_vm7 = vmxor %vm270_vm12, %vm2988_vm5  ;;  %v6165_v18 = vld [vmem:[#allocation37_spill] sm:$0xff]  ;;  %v5273_v6 = vpop.permute.xlu0 %2112 }
 0x16d   :  { %v1842_v57 = vmul.f32 %v6161_v0, %v5145_v62  ;;  %v1862_v56 = vmul.f32 %v6162_v19, %v1010_v49  ;;  %v66_v42 = vsub.f32 %v5131_v15, %v6163_v31  ;;  %vm534_vm11 = vmand %vm262_vm10, %vm526_vm7  ;;  %v974_v47 = vmul.f32 %v2722_v28, %v966_v11  ;;  %v6166_v0 = vld [vmem:[#allocation38_spill] sm:$0xff]  ;;  %v6167_v19 = vld [vmem:[#allocation39_spill] sm:$0xff]  ;;  %6173 = vst [vmem:[#allocation15_spill] sm:$0xff] %v5273_v6 }
 0x16e   :  { %v5234_v30 = vadd.f32 %v918_v12, %v890_v38  ;;  %v1002_v16 = vmul.f32 %v2722_v28, %v994_v35  ;;  %v5238_v34 = vsub.f32 %v5131_v15, %v6165_v18  ;;  %v5241_v50 = vsel %vm534_vm11, 1.0, %v5782_v51  ;;  %vm5257_vm9 = vmxor %vm238_vm13, %vm2988_vm5 }
 0x16f   :  { %v5245_v49 = vsub.f32 %v5131_v15, %v6166_v0  ;;  %v5249_v31 = vsub.f32 %v5131_v15, %v6167_v19  ;;  %vm206_vm3 = vcmp.ge.f32.partialorder %v66_v42, 0.0  ;;  %v982_v38 = vadd.f32 %v974_v47, %v946_v44  ;;  %v5268_v44 = vpop.permute.xlu1 %2321  ;;  %v6172_v19 = vld [vmem:[#allocation40_spill] sm:$0xff] }
 0x170   :  { %6164 = vst [vmem:[#allocation28_spill] sm:$0xff] %v5234_v30  ;;  %v1030_v11 = vmul.f32 %v5241_v50, %v1022_v45  ;;  %v1418_v28 = vmul.f32 %v1410_v7, %v5234_v30  ;;  %vm214_vm14 = vcmp.ge.f32.partialorder %v5238_v34, 0.0  ;;  %v6170_v45 = vld [vmem:[#allocation54_spill] sm:$0xff]  ;;  %6171 = vst [vmem:[#allocation14_spill] sm:$0xff] %v5268_v44  ;;  %v714_v30 = vmul.f32 %v6172_v19, %v5238_v34 }
 0x171   :  { %vm222_vm10 = vcmp.ge.f32.partialorder %v5245_v49, 0.0  ;;  %vm230_vm15 = vcmp.ge.f32.partialorder %v5249_v31, 0.0  ;;  %vm302_vm8 = vmxor %vm214_vm14, %vm2988_vm5  ;;  %v658_v12 = vmul.f32 %v6170_v45, %v66_v42  ;;  %v674_v7 = vsub.f32 0.0, %v5245_v49 }
 0x172   :  { %v1038_v47 = vadd.f32 %v1030_v11, %v1002_v16  ;;  %v1438_v18 = vmul.f32 %v1430_v58, %v982_v38  ;;  %v1466_v0 = vmul.f32 %v1458_v32, %v982_v38  ;;  %vm310_vm13 = vmand %vm206_vm3, %vm302_vm8  ;;  %v730_v44 = vsub.f32 0.0, %v5249_v31  ;;  %v6174_v58 = vld [vmem:[#allocation42_spill] sm:$0xff] }
 0x173   :  { %v2674_v17 = vsel %vm310_vm13, 1.0, %v5782_v51  ;;  %vm334_vm2 = vmxor %vm222_vm10, %vm2988_vm5  ;;  %v686_v45 = vmul.f32 %v6105_v55, %v674_v7  ;;  %v770_v32 = vmul.f32 %v6174_v58, %v5245_v49  ;;  %v786_v19 = vsub.f32 0.0, %v5145_v62 }
 0x174   :  { %v1446_v16 = vadd.f32 %v1438_v18, %v1418_v28  ;;  %v1486_v38 = vmul.f32 %v1478_v60, %v1038_v47  ;;  %vm342_vm4 = vmand %vm214_vm14, %vm334_vm2  ;;  %v666_v11 = vmul.f32 %v2674_v17, %v658_v12  ;;  %v742_v55 = vmul.f32 %v6106_v20, %v730_v44  ;;  %v6177_v12 = vld [vmem:[#allocation44_spill] sm:$0xff] }
 0x175   :  { %v2682_v6 = vsel %vm342_vm4, 1.0, %v5782_v51  ;;  %vm366_vm0 = vmxor %vm230_vm15, %vm2988_vm5  ;;  %v1218_v7 = vmul.f32 %v6108_v33, %v66_v42  ;;  %v1238_v58 = vmul.f32 %v6175_v46, %v730_v44  ;;  %v798_v33 = vmul.f32 %v6177_v12, %v786_v19  ;;  %v6178_v46 = vld [vmem:[#allocation47_spill] sm:$0xff] }
 0x176   :  { %v1494_v28 = vadd.f32 %v1486_v38, %v1466_v0  ;;  %v5293_v60 = vmul.f32 %v1814_v53, %v1446_v16  ;;  %v1850_v18 = vmul.f32 %v1842_v57, %v1446_v16  ;;  %vm374_vm1 = vmand %vm222_vm10, %vm366_vm0  ;;  %v694_v62 = vmul.f32 %v2682_v6, %v686_v45  ;;  %v5305_v53 = vpop.permute.xlu1 %2192  ;;  %v5308_v38 = vpop.permute.xlu0 %2283 }
 0x177   :  { %v2690_v17 = vsel %vm374_vm1, 1.0, %v5782_v51  ;;  %vm406_vm7 = vmand %vm230_vm15, %vm5257_vm9  ;;  %v722_v20 = vmul.f32 %v2682_v6, %v714_v30  ;;  %v1266_v44 = vmul.f32 %v6178_v46, %v5238_v34  ;;  %v1286_v39 = vmul.f32 %v6179_v36, %v786_v19 }
 0x178   :  { %6176 = vst [vmem:[#allocation30_spill] sm:$0xff] %v5293_v60  ;;  %v1870_v57 = vmul.f32 %v1862_v56, %v1494_v28  ;;  %v2698_v0 = vsel %vm406_vm7, 1.0, %v5782_v51  ;;  %v702_v16 = vadd.f32 %v694_v62, %v666_v11  ;;  %v750_v45 = vmul.f32 %v2690_v17, %v742_v55 }
 0x179   :  { %v778_v60 = vmul.f32 %v2690_v17, %v770_v32  ;;  %v806_v35 = vmul.f32 %v2698_v0, %v798_v33  ;;  %v1650_v6 = vmul.f32 %v6180_v21, %v66_v42  ;;  %v1670_v46 = vmul.f32 %v6114_v48, %v786_v19 }
 0x17a   :  { %v1878_v30 = vadd.f32 %v1870_v57, %v1850_v18  ;;  %v758_v12 = vadd.f32 %v750_v45, %v722_v20  ;;  %v1226_v29 = vmul.f32 %v1218_v7, %v702_v16  ;;  %v174_v56 = vsub.f32 %v5131_v15, %v6115_v63  ;;  %v5325_v7 = vpop.permute.xlu1 %2141  ;;  %v5329_v18 = vpop.permute.xlu0 %2233 }
 0x17b   :  { %v814_v4 = vadd.f32 %v806_v35, %v778_v60  ;;  %v1050_v11 = vmul.f32 %v6116_v14, %v5157_v5  ;;  %v1506_v32 = vmul.f32 %v6117_v3, %v5153_v26  ;;  %v1890_v21 = vmul.f32 %v6119_v25, %v5149_v59 }
 0x17c   :  { %2239 = vrot.lane.b32.xlu0 %v1878_v30, %s2991_s3  ;;  %v1246_v36 = vmul.f32 %v1238_v58, %v758_v12  ;;  %v1274_v55 = vmul.f32 %v1266_v44, %v758_v12  ;;  %v826_v48 = vmul.f32 %v5910_v9, %v5249_v31  ;;  %vm278_vm11 = vcmp.ge.f32.partialorder %v174_v56, 0.0  ;;  %v6181_v12 = vld [vmem:[#allocation61_spill] sm:$0xff] }
 0x17d   :  { %v1294_v42 = vmul.f32 %v1286_v39, %v814_v4  ;;  %v1058_v63 = vmul.f32 %v5241_v50, %v1050_v11  ;;  %v1066_v19 = vsub.f32 0.0, %v174_v56  ;;  %vm558_vm3 = vmxor %vm278_vm11, %vm2988_vm5  ;;  %v1514_v3 = vmul.f32 %v1506_v32, %v1038_v47  ;;  %v6182_v11 = vld [vmem:[#allocation62_spill] sm:$0xff] }
 0x17e   :  { %v1254_v14 = vadd.f32 %v1246_v36, %v1226_v29  ;;  %v1898_v58 = vmul.f32 %v1890_v21, %v1494_v28  ;;  %v834_v60 = vmul.f32 %v2698_v0, %v826_v48  ;;  %vm566_vm14 = vmand %vm270_vm12, %vm558_vm3  ;;  %v842_v17 = vsub.f32 0.0, %v5149_v59  ;;  %v5349_v45 = vpop.permute.xlu1 %2311 }
 0x17f   :  { %v1302_v25 = vadd.f32 %v1294_v42, %v1274_v55  ;;  %v1078_v9 = vmul.f32 %v5865_v1, %v1066_v19  ;;  %v1526_v39 = vmul.f32 %v6120_v22, %v1066_v19  ;;  %v1910_v50 = vmul.f32 %v5867_v24, %v1066_v19  ;;  %v6184_v42 = vld [vmem:[#allocation64_spill] sm:$0xff] }
 0x180   :  { %v1658_v62 = vmul.f32 %v1650_v6, %v1254_v14  ;;  %v2738_v29 = vsel %vm566_vm14, 1.0, %v5782_v51  ;;  %v1314_v47 = vmul.f32 %v5856_v10, %v5245_v49  ;;  %v1698_v33 = vmul.f32 %v5857_v54, %v5238_v34 }
 0x181   :  { %v1678_v28 = vmul.f32 %v1670_v46, %v1302_v25  ;;  %v1086_v20 = vmul.f32 %v2738_v29, %v1078_v9  ;;  %v186_v1 = vsub.f32 %v5131_v15, %v3498_v52  ;;  %v854_v22 = vmul.f32 %v5859_v41, %v842_v17 }
 0x182   :  { %v1322_v44 = vmul.f32 %v1314_v47, %v814_v4  ;;  %v1334_v24 = vmul.f32 %v5911_v61, %v842_v17  ;;  %v1718_v57 = vmul.f32 %v5912_v8, %v842_v17  ;;  %v1706_v16 = vmul.f32 %v1698_v33, %v1302_v25  ;;  %v5354_v4 = vpop.permute.xlu0 %2102  ;;  %v5373_v19 = vpop.permute.xlu1 %2182  ;;  %v6185_v25 = vld [vmem:[#allocation65_spill] sm:$0xff]  ;;  %v6188_v47 = vld [vmem:[#allocation68_spill] sm:$0xff] }
 0x183   :  { %v1686_v0 = vadd.f32 %v1678_v28, %v1658_v62  ;;  %v1094_v59 = vadd.f32 %v1086_v20, %v1058_v63  ;;  %v198_v10 = vsub.f32 %v5131_v15, %v3504_v23  ;;  %v862_v54 = vmul.f32 %v5189_v27, %v854_v22 }
 0x184   :  { %vm286_vm12 = vcmp.ge.f32.partialorder %v186_v1, 0.0  ;;  %v1106_v52 = vmul.f32 %v5868_v43, %v5161_v37  ;;  %v1122_v41 = vsub.f32 0.0, %v186_v1  ;;  %v1162_v23 = vmul.f32 %v3514_v40, %v174_v56 }
 0x185   :  { %2108 = vrot.lane.b32.xlu1 %v1686_v0, %s2991_s3  ;;  %v1534_v61 = vmul.f32 %v1526_v39, %v1094_v59  ;;  %vm294_vm9 = vcmp.ge.f32.partialorder %v198_v10, 0.0  ;;  %vm590_vm10 = vmxor %vm286_vm12, %vm2988_vm5  ;;  %v1178_v8 = vsub.f32 0.0, %v198_v10  ;;  %v870_v34 = vadd.f32 %v862_v54, %v834_v60  ;;  %v6191_v0 = vld [vmem:[#allocation72_spill] sm:$0xff] }
 0x186   :  { %vm598_vm15 = vmand %vm278_vm11, %vm590_vm10  ;;  %v1114_v27 = vmul.f32 %v2738_v29, %v1106_v52  ;;  %v1134_v35 = vmul.f32 %v6011_v13, %v1122_v41  ;;  %v1554_v43 = vmul.f32 %v3525_v2, %v5157_v5  ;;  %v1574_v32 = vmul.f32 %v6182_v11, %v1122_v41  ;;  %v6183_v2 = vld [vmem:[#allocation63_spill] sm:$0xff]  ;;  %v5377_v39 = vpop.permute.xlu0 %2273  ;;  %v6186_v29 = vld [vmem:[#allocation66_spill] sm:$0xff] }
 0x187   :  { %v1542_v6 = vadd.f32 %v1534_v61, %v1514_v3  ;;  %v2746_v30 = vsel %vm598_vm15, 1.0, %v5782_v51  ;;  %vm622_vm8 = vmxor %vm294_vm9, %vm2988_vm5  ;;  %v1190_v46 = vmul.f32 %v6181_v12, %v1178_v8  ;;  %v1342_v40 = vmul.f32 %v1334_v24, %v870_v34  ;;  %v6190_v24 = vld [vmem:[#allocation10_spill] sm:$0xff]  ;;  %v6196_v11 = vld [vmem:[#allocation75_spill] sm:$0xff] }
 0x188   :  { %vm630_vm13 = vmand %vm286_vm12, %vm622_vm8  ;;  %v1142_v56 = vmul.f32 %v2746_v30, %v1134_v35  ;;  %v1170_v36 = vmul.f32 %v2746_v30, %v1162_v23  ;;  %v1562_v55 = vmul.f32 %v1554_v43, %v1094_v59  ;;  %v1602_v48 = vmul.f32 %v6183_v2, %v5161_v37  ;;  %v6192_v59 = vld [vmem:[#allocation73_spill] sm:$0xff]  ;;  %v6194_v23 = vld [vmem:[#allocation28_spill] sm:$0xff] }
 0x189   :  { %v1918_v21 = vmul.f32 %v1910_v50, %v1542_v6  ;;  %v2754_v13 = vsel %vm630_vm13, 1.0, %v5782_v51  ;;  %v1622_v63 = vmul.f32 %v6184_v42, %v1178_v8  ;;  %v1350_v14 = vadd.f32 %v1342_v40, %v1322_v44  ;;  %v6187_v51 = vld [vmem:[#allocation67_spill] sm:$0xff]  ;;  %v6195_v35 = vld [vmem:[#allocation29_spill] sm:$0xff] }
 0x18a   :  { %v1150_v3 = vadd.f32 %v1142_v56, %v1114_v27  ;;  %v1198_v60 = vmul.f32 %v2754_v13, %v1190_v46  ;;  %v1938_v9 = vmul.f32 %v6185_v25, %v5153_v26  ;;  %v1958_v50 = vmul.f32 %v6186_v29, %v1122_v41  ;;  %v6189_v44 = vld [vmem:[#allocation71_spill] sm:$0xff]  ;;  %v5405_v40 = vld [vmem:[%s5580_s0] sm:$0xff]  ;;  %v6202_v25 = vld [vmem:[#allocation46_spill] sm:$0xff] }
 0x18b   :  { %v1926_v62 = vadd.f32 %v1918_v21, %v1898_v58  ;;  %v1986_v17 = vmul.f32 %v6187_v51, %v5157_v5  ;;  %v2006_v37 = vmul.f32 %v6188_v47, %v1178_v8  ;;  %v1726_v28 = vmul.f32 %v1718_v57, %v1350_v14  ;;  %v6193_v57 = vld [vmem:[#allocation74_spill] sm:$0xff]  ;;  %v6199_v21 = vld [vmem:[#allocation36_spill] sm:$0xff]  ;;  %v5414_v42 = vld [vmem:[%s5580_s0 + $0x30] sm:$0xff] }
 0x18c   :  { %v1206_v20 = vadd.f32 %v1198_v60, %v1170_v36  ;;  %v1582_v33 = vmul.f32 %v1574_v32, %v1150_v3  ;;  %v1610_v1 = vmul.f32 %v1602_v48, %v1150_v3  ;;  %v1946_v22 = vmul.f32 %v1938_v9, %v1542_v6  ;;  %v5395_v6 = vpop.permute.xlu1 %2153  ;;  %v6197_v32 = vld [vmem:[#allocation43_spill] sm:$0xff]  ;;  %v6200_v3 = vld [vmem:[#allocation26_spill] sm:$0xff]  ;;  %v6204_v51 = vld [vmem:[#allocation69_spill] sm:$0xff] }
 0x18d   :  { %2279 = vrot.lane.b32.xlu0 %v1926_v62, %s2990_s17  ;;  %v1362_v26 = vmul.f32 %v6189_v44, %v5249_v31  ;;  %v1382_v58 = vmul.f32 %v6191_v0, %v6190_v24  ;;  %v1746_v10 = vmul.f32 %v6192_v59, %v5245_v49  ;;  %v1734_v54 = vadd.f32 %v1726_v28, %v1706_v16  ;;  %v5398_v16 = vpop.permute.xlu0 %2313  ;;  %v6201_v60 = vld [vmem:[#allocation70_spill] sm:$0xff]  ;;  %v6206_v28 = vld [vmem:[#allocation55_spill] sm:$0xff]  ;;  %v6208_v44 = vld [vmem:[#allocation49_spill] sm:$0xff] }
 0x18e   :  { %v1590_v5 = vadd.f32 %v1582_v33, %v1562_v55  ;;  %v1630_v52 = vmul.f32 %v1622_v63, %v1206_v20  ;;  %v1766_v41 = vmul.f32 %v6193_v57, %v6190_v24  ;;  %v1794_v43 = vmul.f32 %v6195_v35, %v5249_v31  ;;  %v6198_v55 = vld [vmem:[#allocation19_spill] sm:$0xff]  ;;  %v5426_v62 = vld [vmem:[%s5580_s0 + $0x8] sm:$0xff]  ;;  %v5438_v20 = vld [vmem:[%s5580_s0 + $0x38] sm:$0xff] }
 0x18f   :  { %v1370_v61 = vmul.f32 %v1362_v26, %v870_v34  ;;  %v1390_v8 = vmul.f32 %v1382_v58, %v6194_v23  ;;  %v1754_v27 = vmul.f32 %v1746_v10, %v1350_v14  ;;  %2149 = vrot.lane.b32.xlu1 %v1734_v54, %s2990_s17  ;;  %vm2122_vm5 = vcmask 523520   ;;  %v6209_v24 = vld [vmem:[#allocation24_spill] sm:$0xff]  ;;  %v5453_v58 = vld [vmem:[%s5580_s0 + $0x10] sm:$0xff]  ;;  %v6211_v10 = vld [vmem:[#allocation45_spill] sm:$0xff] }
 0x190   :  { %v1638_v30 = vadd.f32 %v1630_v52, %v1610_v1  ;;  %v1966_v12 = vmul.f32 %v1958_v50, %v1590_v5  ;;  %v1994_v49 = vmul.f32 %v1986_v17, %v1590_v5  ;;  %v1825_v34 = vadd.f32 %v6197_v32, %v6196_v11  ;;  %v6203_v50 = vld [vmem:[#allocation52_spill] sm:$0xff]  ;;  %v2324_v1 = vpop.permute.xlu1 %2323  ;;  %v6214_v23 = vld [vmem:[#allocation25_spill] sm:$0xff] }
 0x191   :  { %v1398_v46 = vadd.f32 %v1390_v8, %v1370_v61  ;;  %v2757_v31 = vmul.f32 -1.442695, %v5405_v40  ;;  %vm2163_vm2 = vcmask 785920   ;;  %vm2204_vm4 = vcmask 1048320   ;;  %v6210_v0 = vld [vmem:[#allocation16_spill] sm:$0xff]  ;;  %v2236_v52 = vpop.permute.xlu0 %2235  ;;  %v6213_v61 = vld [vmem:[#allocation14_spill] sm:$0xff] }
 0x192   :  { %v1974_v56 = vadd.f32 %v1966_v12, %v1946_v22  ;;  %v2014_v36 = vmul.f32 %v2006_v37, %v1638_v30  ;;  %v1831_v13 = vadd.f32 %v6199_v21, %v6198_v55  ;;  %2213 = vst.msk [vmem:[#allocation2 + $0x8] sm:$0xff] %vm2081_vm6, %v1825_v34  ;;  %v2763_v63 = vmul.f32 -1.442695, %v5414_v42  ;;  %v6205_v37 = vld [vmem:[#allocation13_spill] sm:$0xff]  ;;  %v6207_v22 = vld [vmem:[#allocation51_spill] sm:$0xff]  ;;  %v6212_v54 = vld [vmem:[#allocation60_spill] sm:$0xff] }
 0x193   :  { %v1774_v2 = vmul.f32 %v1766_v41, %v1398_v46  ;;  %v1802_v48 = vmul.f32 %v1794_v43, %v1398_v46  ;;  %2902 = vpow2.f32 %v2757_v31  ;;  %2253 = vst.msk [vmem:[#allocation2 + $0x8] sm:$0xff] %vm2122_vm5, %v6200_v3  ;;  %v1826_v9 = vadd.f32 %v6202_v25, %v6201_v60  ;;  %v5461_v57 = vld [vmem:[%s5580_s0 + $0x18] sm:$0xff]  ;;  %v6217_v35 = vld [vmem:[#allocation41_spill] sm:$0xff] }
 0x194   :  { %v2022_v14 = vadd.f32 %v2014_v36, %v1994_v49  ;;  %2319 = vrot.lane.b32.xlu0 %v1974_v56, %s2992_s24  ;;  %2219 = vst.msk [vmem:[#allocation2 + $0x98] sm:$0xff] %vm2081_vm6, %v1831_v13  ;;  %v2758_v29 = vmul.f32 -1.442695, %v5426_v62  ;;  %v1832_v17 = vadd.f32 %v6204_v51, %v6203_v50  ;;  %2904 = vpow2.f32 %v2763_v63  ;;  %v6215_v8 = vld [vmem:[#allocation12_spill] sm:$0xff]  ;;  %v5477_v30 = vld [vmem:[%s5580_s0 + $0x20] sm:$0xff]  ;;  %v6218_v49 = vld [vmem:[#allocation30_spill] sm:$0xff] }
 0x195   :  { %v1782_v47 = vadd.f32 %v1774_v2, %v1754_v27  ;;  %2293 = vst.msk [vmem:[#allocation2 + $0x8] sm:$0xff] %vm2163_vm2, %v6205_v37  ;;  %v2764_v33 = vmul.f32 -1.442695, %v5438_v20  ;;  %v1827_v26 = vadd.f32 %v6208_v44, %v6207_v22  ;;  %v2759_v59 = vmul.f32 -1.442695, %v5453_v58  ;;  %v6216_v27 = vld [vmem:[#allocation27_spill] sm:$0xff] }
 0x196   :  { %2259 = vst.msk [vmem:[#allocation2 + $0x98] sm:$0xff] %vm2122_vm5, %v6206_v28  ;;  %2906 = vpow2.f32 %v2758_v29  ;;  %v1828_v5 = vadd.f32 %v6212_v54, %v6211_v10  ;;  %v2760_v41 = vmul.f32 -1.442695, %v5461_v57  ;;  %v1829_v43 = vadd.f32 %v6217_v35, %v6216_v27  ;;  %v6219_v11 = vld [vmem:[#allocation9_spill] sm:$0xff]  ;;  %v6222_v54 = vld [vmem:[#allocation20_spill] sm:$0xff]  ;;  %s2993_s0 = smov [#allocation6]  }
 0x197   :  { %2346 = vst.msk [vmem:[#allocation2 + $0x88] sm:$0xff] %vm2081_vm6, %v2022_v14  ;;  %2214 = vst.msk [vmem:[#allocation2 + $0x20] sm:$0xff] %vm2081_vm6, %v1826_v9  ;;  %2190 = vrot.lane.b32.xlu1 %v1782_v47, %s2992_s24  ;;  %2908 = vpow2.f32 %v2764_v33  ;;  %v2761_v12 = vmul.f32 -1.442695, %v5477_v30  ;;  %v1830_v46 = vadd.f32 %v6218_v49, %v1802_v48  ;;  %v2762_v32 = vmul.f32 -1.442695, %v5131_v15 }
 0x198   :  { %2333 = vst.msk [vmem:[#allocation2 + $0x8] sm:$0xff] %vm2204_vm4, %v6209_v24  ;;  %2910 = vpow2.f32 %v2759_v59  ;;  %v6221_v59 = vld [vmem:[#allocation23_spill] sm:$0xff]  ;;  %v6227_v35 = vld [vmem:[#allocation56_spill] sm:$0xff]  ;;  %s2657_s24 = sshll.u32 %s2993_s0, 4  ;;  %s2658_s24 = int_to_ptr.vmem [resolvable:$true] %s2657_s24 }
 0x199   :  { %2299 = vst.msk [vmem:[#allocation2 + $0x98] sm:$0xff] %vm2163_vm2, %v6210_v0  ;;  %2912 = vpow2.f32 %v2760_v41  ;;  %v6225_v41 = vld [vmem:[#allocation50_spill] sm:$0xff]  ;;  %v2351_v49 = vld [vmem:[#allocation2 + $0x10] sm:$0xff]  ;;  %s2961_s25 = scalar_lea.vmem %s2658_s24, 1024  ;;  %p2966_p6 = scmp.lt.s32.totalorder %s2658_s24, %s2658_s24 }
 0x19a   :  { %2220 = vst.msk [vmem:[#allocation2 + $0xb0] sm:$0xff] %vm2081_vm6, %v1832_v17  ;;  %2215 = vst.msk [vmem:[#allocation2 + $0x38] sm:$0xff] %vm2081_vm6, %v1827_v26  ;;  %2914 = vpow2.f32 %v2761_v12  ;;  %v6220_v26 = vld [vmem:[#allocation76_spill] sm:$0xff]  ;;  %p2962_p5 = scmp.ne.s32.totalorder %s2658_s24, %s2961_s25  ;;  %p2967_p7 = scmp.lt.s32.totalorder %s2961_s25, %s2961_s25 }
 0x19b   :  { %2339 = vst.msk [vmem:[#allocation2 + $0x98] sm:$0xff] %vm2204_vm4, %v6213_v61  ;;  %2916 = vpow2.f32 %v2762_v32 }
 0x19c   :  { %2254 = vst.msk [vmem:[#allocation2 + $0x20] sm:$0xff] %vm2122_vm5, %v6214_v23  ;;  %2260 = vst.msk [vmem:[#allocation2 + $0xb0] sm:$0xff] %vm2122_vm5, %v6215_v8  ;;  %v6226_v23 = vld [vmem:[#allocation15_spill] sm:$0xff]  ;;  %p2968_p8 = por %p2967_p7, %p2966_p6 }
 0x19d   :  { %2294 = vst.msk [vmem:[#allocation2 + $0x20] sm:$0xff] %vm2163_vm2, %v6219_v11  ;;  %2300 = vst.msk [vmem:[#allocation2 + $0xb0] sm:$0xff] %vm2163_vm2, %v5308_v38  ;;  %v5499_v38 = vpop.permute.xlu1 %2194 }
 0x19e   :  { %2255 = vst.msk [vmem:[#allocation2 + $0x38] sm:$0xff] %vm2122_vm5, %v5329_v18  ;;  %p2969_p9 = pnand %p2968_p8, %p2962_p5 }
 0x19f   :  { %2216 = vst.msk [vmem:[#allocation2 + $0x50] sm:$0xff] %vm2081_vm6, %v1828_v5  ;;  %2217 = vst.msk [vmem:[#allocation2 + $0x68] sm:$0xff] %vm2081_vm6, %v1829_v43  ;;  %v2350_v18 = vld [vmem:[#allocation2 + $0x8] sm:$0xff] }
 0x1a0   :  { %2334 = vst.msk [vmem:[#allocation2 + $0x20] sm:$0xff] %vm2204_vm4, %v5349_v45  ;;  %2340 = vst.msk [vmem:[#allocation2 + $0xb0] sm:$0xff] %vm2204_vm4, %v2324_v1  ;;  %2498 = vmatprep.mubr.f32.mxu0 %v2350_v18  ;;  %v2903_v34 = vpop.eup %2902  ;;  %v2357_v18 = vld [vmem:[#allocation2 + $0x40] sm:$0xff] }
 0x1a1   :  { %2295 = vst.msk [vmem:[#allocation2 + $0x38] sm:$0xff] %vm2163_vm2, %v5377_v39  ;;  %v2049_v39 = vadd.f32 1.0, %v2903_v34  ;;  %v5501_v31 = vpop.permute.xlu1 %2143  ;;  %v2905_v56 = vpop.eup %2904  ;;  %v2360_v34 = vld [vmem:[#allocation2 + $0x58] sm:$0xff] }
 0x1a2   :  { %2256 = vst.msk [vmem:[#allocation2 + $0x50] sm:$0xff] %vm2122_vm5, %v2236_v52  ;;  %v2368_v45 = vld [vmem:[#allocation2 + $0x98] sm:$0xff]  ;;  %v2055_v55 = vadd.f32 1.0, %v2905_v56  ;;  %v2276_v21 = vpop.permute.xlu0 %2275  ;;  %v6224_v52 = vld [vmem:[#allocation11_spill] sm:$0xff]  ;;  %v2366_v56 = vld [vmem:[#allocation2 + $0x88] sm:$0xff] }
 0x1a3   :  { %2218 = vst.msk [vmem:[#allocation2 + $0x80] sm:$0xff] %vm2081_vm6, %v1830_v46  ;;  %2528 = vmatprep.mubr.f32.mxu1 %v2368_v45  ;;  %v2907_v36 = vpop.eup %2906  ;;  %2918 = vrcp.f32 %v2049_v39  ;;  %v2405_v46 = vld [vmem:[#allocation3 + $0x100] sm:$0xff]  ;;  %v2363_v39 = vld [vmem:[#allocation2 + $0x70] sm:$0xff] }
 0x1a4   :  { %2335 = vst.msk [vmem:[#allocation2 + $0x38] sm:$0xff] %vm2204_vm4, %v5398_v16  ;;  %v2909_v13 = vpop.eup %2908  ;;  %v2050_v2 = vadd.f32 1.0, %v2907_v36  ;;  %2920 = vrcp.f32 %v2055_v55  ;;  %v2369_v36 = vld [vmem:[#allocation2 + $0xa0] sm:$0xff]  ;;  %v2372_v55 = vld [vmem:[#allocation2 + $0xb8] sm:$0xff] }
 0x1a5   :  { %2296 = vst.msk [vmem:[#allocation2 + $0x50] sm:$0xff] %vm2163_vm2, %v2276_v21  ;;  %v2911_v16 = vpop.eup %2910  ;;  %v2056_v48 = vadd.f32 1.0, %v2909_v13  ;;  %v2185_v60 = vpop.permute.xlu1 %2184 }
 0x1a6   :  { %v2913_v63 = vpop.eup %2912  ;;  %2922 = vrcp.f32 %v2050_v2  ;;  %v2051_v14 = vadd.f32 1.0, %v2911_v16 }
 0x1a7   :  { %v2915_v3 = vpop.eup %2914  ;;  %2924 = vrcp.f32 %v2056_v48  ;;  %v2052_v25 = vadd.f32 1.0, %v2913_v63 }
 0x1a8   :  { %v2917_v9 = vpop.eup %2916  ;;  %2926 = vrcp.f32 %v2051_v14  ;;  %v2053_v29 = vadd.f32 1.0, %v2915_v3 }
 0x1a9   :  { %2928 = vrcp.f32 %v2052_v25  ;;  %v2054_v50 = vadd.f32 1.0, %v2917_v9  ;;  %v2105_v51 = vpop.permute.xlu1 %2104 }
 0x1aa   :  { %2930 = vrcp.f32 %v2053_v29 }
 0x1ab   :  { %2932 = vrcp.f32 %v2054_v50  ;;  %v2316_v17 = vpop.permute.xlu0 %2315  ;;  %v2356_v27 = vld [vmem:[#allocation2 + $0x38] sm:$0xff] }
 0x1ac   :  { %2336 = vst.msk [vmem:[#allocation2 + $0x50] sm:$0xff] %vm2204_vm4, %v2316_v17 }
 0x1ad   :  { %v2146_v22 = vpop.permute.xlu1 %2145 }
 0x1b0   :  { %v2919_v47 = vpop.eup %2918 }
 0x1b1   :  { %v2073_v37 = vmul.f32 %v5405_v40, %v2919_v47  ;;  %v2921_v28 = vpop.eup %2920 }
 0x1b2   :  { %v2079_v1 = vmul.f32 %v5414_v42, %v2921_v28  ;;  %v6223_v42 = vld [vmem:[#allocation59_spill] sm:$0xff] }
 0x1b3   :  { %v2923_v33 = vpop.eup %2922  ;;  %2082 = vst.msk [vmem:[#allocation2] sm:$0xff] %vm2081_vm6, %v2073_v37  ;;  %v2359_v32 = vld [vmem:[#allocation2 + $0x50] sm:$0xff] }
 0x1b4   :  { %v2925_v44 = vpop.eup %2924  ;;  %2123 = vst.msk [vmem:[#allocation2] sm:$0xff] %vm2122_vm5, %v6220_v26  ;;  %v2074_v24 = vmul.f32 %v5426_v62, %v2923_v33 }
 0x1b5   :  { %v2927_v0 = vpop.eup %2926  ;;  %2164 = vst.msk [vmem:[#allocation2] sm:$0xff] %vm2163_vm2, %v6221_v59  ;;  %v2080_v40 = vmul.f32 %v5438_v20, %v2925_v44 }
 0x1b6   :  { %2088 = vst.msk [vmem:[#allocation2 + $0x90] sm:$0xff] %vm2081_vm6, %v2079_v1  ;;  %v2929_v10 = vpop.eup %2928  ;;  %2083 = vst.msk [vmem:[#allocation2 + $0x18] sm:$0xff] %vm2081_vm6, %v2074_v24  ;;  %v2075_v5 = vmul.f32 %v5453_v58, %v2927_v0 }
 0x1b7   :  { %2205 = vst.msk [vmem:[#allocation2] sm:$0xff] %vm2204_vm4, %v6222_v54  ;;  %v2931_v62 = vpop.eup %2930  ;;  %v2076_v20 = vmul.f32 %v5461_v57, %v2929_v10  ;;  %v2407_v57 = vld [vmem:[#allocation3 + $0x110] sm:$0xff] }
 0x1b8   :  { %2129 = vst.msk [vmem:[#allocation2 + $0x90] sm:$0xff] %vm2122_vm5, %v6223_v42  ;;  %2124 = vst.msk [vmem:[#allocation2 + $0x18] sm:$0xff] %vm2122_vm5, %v6225_v41  ;;  %v2933_v61 = vpop.eup %2932  ;;  %v2077_v58 = vmul.f32 %v5477_v30, %v2931_v62  ;;  %v2406_v30 = vld [vmem:[#allocation3 + $0x108] sm:$0xff] }
 0x1b9   :  { %2170 = vst.msk [vmem:[#allocation2 + $0x90] sm:$0xff] %vm2163_vm2, %v6224_v52  ;;  %2165 = vst.msk [vmem:[#allocation2 + $0x18] sm:$0xff] %vm2163_vm2, %v5325_v7  ;;  %v2078_v7 = vmul.f32 %v2933_v61, %v5131_v15 }
 0x1ba   :  { %2089 = vst.msk [vmem:[#allocation2 + $0xa8] sm:$0xff] %vm2081_vm6, %v2080_v40  ;;  %2084 = vst.msk [vmem:[#allocation2 + $0x30] sm:$0xff] %vm2081_vm6, %v2075_v5 }
 0x1bb   :  { %2211 = vst.msk [vmem:[#allocation2 + $0x90] sm:$0xff] %vm2204_vm4, %v5305_v53  ;;  %2206 = vst.msk [vmem:[#allocation2 + $0x18] sm:$0xff] %vm2204_vm4, %v5373_v19  ;;  %v2187_v53 = vpop.permute.xlu1 %2186  ;;  %v2371_v19 = vld [vmem:[#allocation2 + $0xb0] sm:$0xff] }
 0x1bc   :  { %2130 = vst.msk [vmem:[#allocation2 + $0xa8] sm:$0xff] %vm2122_vm5, %v6226_v23  ;;  %2125 = vst.msk [vmem:[#allocation2 + $0x30] sm:$0xff] %vm2122_vm5, %v5354_v4  ;;  %v2353_v4 = vld [vmem:[#allocation2 + $0x20] sm:$0xff] }
 0x1bd   :  { %2171 = vst.msk [vmem:[#allocation2 + $0xa8] sm:$0xff] %vm2163_vm2, %v5395_v6  ;;  %2166 = vst.msk [vmem:[#allocation2 + $0x30] sm:$0xff] %vm2163_vm2, %v5501_v31 }
 0x1be   :  { %2085 = vst.msk [vmem:[#allocation2 + $0x48] sm:$0xff] %vm2081_vm6, %v2076_v20  ;;  %2086 = vst.msk [vmem:[#allocation2 + $0x60] sm:$0xff] %vm2081_vm6, %v2077_v58  ;;  %v2349_v15 = vld [vmem:[#allocation2] sm:$0xff] }
 0x1bf   :  { %2212 = vst.msk [vmem:[#allocation2 + $0xa8] sm:$0xff] %vm2204_vm4, %v5499_v38  ;;  %2207 = vst.msk [vmem:[#allocation2 + $0x30] sm:$0xff] %vm2204_vm4, %v2185_v60  ;;  %2499 = vmatmul.mubr.f32.vlgmr.msra.gmra.mxu0 %v2349_v15  ;;  %v2354_v38 = vld [vmem:[#allocation2 + $0x28] sm:$0xff] }
 0x1c0   :  { %2126 = vst.msk [vmem:[#allocation2 + $0x48] sm:$0xff] %vm2122_vm5, %v2105_v51  ;;  %2503 = vmatprep.mubr.f32.mxu0 %v2353_v4  ;;  %v2238_v12 = vpop.permute.xlu0 %2237 }
 0x1c1   :  { %2167 = vst.msk [vmem:[#allocation2 + $0x48] sm:$0xff] %vm2163_vm2, %v2146_v22 }
 0x1c2   :  { %2087 = vst.msk [vmem:[#allocation2 + $0x78] sm:$0xff] %vm2081_vm6, %v2078_v7  ;;  %v2367_v6 = vld [vmem:[#allocation2 + $0x90] sm:$0xff]  ;;  %v2352_v8 = vld [vmem:[#allocation2 + $0x18] sm:$0xff] }
 0x1c3   :  { %2208 = vst.msk [vmem:[#allocation2 + $0x48] sm:$0xff] %vm2204_vm4, %v2187_v53  ;;  %2529 = vmatmul.mubr.f32.vlgmr.msra.gmra.mxu1 %v2367_v6  ;;  %2504 = vmatmul.mubr.f32.gmra.mxu0 %v2352_v8 }
 0x1c4   :  { %2533 = vmatprep.mubr.f32.mxu1 %v2371_v19  ;;  %2842 = vmatpush3.msra.mxu1 %v6227_v35  ;;  %2257 = vst.msk [vmem:[#allocation2 + $0x68] sm:$0xff] %vm2122_vm5, %v2238_v12 }
 0x1c5   :  { %2843 = vmatprep.subr.mxu1 %v2407_v57  ;;  %2508 = vmatprep.mubr.f32.mxu0 %v2356_v27 }
 0x1c6   :  { %v2370_v43 = vld [vmem:[#allocation2 + $0xa8] sm:$0xff]  ;;  %2844 = vmatpush3.msra.mxu1 %v2407_v57  ;;  %v2355_v11 = vld [vmem:[#allocation2 + $0x30] sm:$0xff] }
 0x1c7   :  { %2534 = vmatmul.mubr.f32.gmra.mxu1 %v2370_v43  ;;  %2845 = vmatprep.subr.mxu1 %v2406_v30 }
 0x1c8   :  { %2846 = vmatpush3.msra.mxu1 %v2406_v30  ;;  %2849 = vmatprep.mubr.msk.f32.mxu1 %vm2081_vm6, %v2351_v49 }
 0x1c9   :  { %2847 = vmatprep.subr.mxu1 %v2405_v46  ;;  %2509 = vmatmul.mubr.f32.gmra.mxu0 %v2355_v11 }
 0x1ca   :  { %2848 = vmatpush3.msra.mxu1 %v2405_v46  ;;  %2513 = vmatprep.mubr.f32.mxu0 %v2359_v32  ;;  %v2358_v45 = vld [vmem:[#allocation2 + $0x48] sm:$0xff] }
 0x1cb   :  { %2850 = vmatmul.mubr.msk.f32.vlgmr.msra.gmra.mxu1 %vm2081_vm6, %v2354_v38  ;;  %v2107_v31 = vpop.permute.xlu1 %2106 }
 0x1cc   :  { %2852 = vmatprep.mubr.msk.f32.mxu1 %vm2081_vm6, %v2357_v18  ;;  %2127 = vst.msk [vmem:[#allocation2 + $0x60] sm:$0xff] %vm2122_vm5, %v2107_v31 }
 0x1cd   :  { %2514 = vmatmul.mubr.f32.gmra.mxu0 %v2358_v45 }
 0x1cf   :  { %2853 = vmatmul.mubr.msk.f32.gmra.mxu1 %vm2081_vm6, %v2360_v34 }
 0x1d0   :  { %2855 = vmatprep.mubr.msk.f32.mxu1 %vm2081_vm6, %v2363_v39 }
 0x1d1   :  { %v2278_v21 = vpop.permute.xlu0 %2277 }
 0x1d2   :  { %2297 = vst.msk [vmem:[#allocation2 + $0x68] sm:$0xff] %vm2163_vm2, %v2278_v21 }
 0x1d3   :  { %2856 = vmatmul.mubr.msk.f32.gmra.mxu1 %vm2081_vm6, %v2366_v56 }
 0x1d4   :  { %2858 = vmatprep.mubr.msk.f32.mxu1 %vm2081_vm6, %v2369_v36  ;;  %v2148_v13 = vpop.permute.xlu1 %2147 }
 0x1d5   :  { %2168 = vst.msk [vmem:[#allocation2 + $0x60] sm:$0xff] %vm2163_vm2, %v2148_v13 }
 0x1d7   :  { %2859 = vmatmul.mubr.msk.f32.gmra.mxu1 %vm2081_vm6, %v2372_v55 }
 0x1da   :  { %v2318_v2 = vpop.permute.xlu0 %2317 }
 0x1db   :  { %2337 = vst.msk [vmem:[#allocation2 + $0x68] sm:$0xff] %vm2204_vm4, %v2318_v2 }
 0x1dc   :  { %v2189_v16 = vpop.permute.xlu1 %2188 }
 0x1dd   :  { %2209 = vst.msk [vmem:[#allocation2 + $0x60] sm:$0xff] %vm2204_vm4, %v2189_v16 }
 0x1e2   :  { %v2362_v48 = vld [vmem:[#allocation2 + $0x68] sm:$0xff] }
 0x1e3   :  { %2518 = vmatprep.mubr.f32.mxu0 %v2362_v48 }
 0x1e4   :  { %v2361_v63 = vld [vmem:[#allocation2 + $0x60] sm:$0xff] }
 0x1e5   :  { %2519 = vmatmul.mubr.f32.gmra.mxu0 %v2361_v63 }
 0x1ee   :  { %v2240_v14 = vpop.permute.xlu0 %2239 }
 0x1ef   :  { %2258 = vst.msk [vmem:[#allocation2 + $0x80] sm:$0xff] %vm2122_vm5, %v2240_v14 }
 0x1f7   :  { %v2109_v3 = vpop.permute.xlu1 %2108 }
 0x1f8   :  { %2128 = vst.msk [vmem:[#allocation2 + $0x78] sm:$0xff] %vm2122_vm5, %v2109_v3 }
 0x1ff   :  { %v2280_v60 = vpop.permute.xlu0 %2279 }
 0x200   :  { %2298 = vst.msk [vmem:[#allocation2 + $0x80] sm:$0xff] %vm2163_vm2, %v2280_v60 }
 0x201   :  { %v2150_v25 = vpop.permute.xlu1 %2149 }
 0x202   :  { %2169 = vst.msk [vmem:[#allocation2 + $0x78] sm:$0xff] %vm2163_vm2, %v2150_v25 }
 0x206   :  { %v2320_v9 = vpop.permute.xlu0 %2319 }
 0x207   :  { %2338 = vst.msk [vmem:[#allocation2 + $0x80] sm:$0xff] %vm2204_vm4, %v2320_v9 }
 0x209   :  { %v2191_v29 = vpop.permute.xlu1 %2190 }
 0x20a   :  { %2210 = vst.msk [vmem:[#allocation2 + $0x78] sm:$0xff] %vm2204_vm4, %v2191_v29 }
 0x20e   :  { %v2365_v50 = vld [vmem:[#allocation2 + $0x80] sm:$0xff] }
 0x20f   :  { %2523 = vmatprep.mubr.f32.mxu0 %v2365_v50 }
 0x211   :  { %v2364_v51 = vld [vmem:[#allocation2 + $0x78] sm:$0xff] }
 0x212   :  { %2524 = vmatmul.mubr.f32.gmra.mxu0 %v2364_v51 }
 0x27f   :  { %v2805_v17 = vpop.f32.mrf.mxu0 }
 0x281   :  { %v2806_v47 = vpop.f32.mrf.mxu0 }
 0x282   :  { %v2807_v40 = vadd.f32 %v2806_v47, %v2805_v17 }
 0x283   :  { %v2823_v37 = vpop.f32.mrf.mxu1  ;;  %v2808_v33 = vpop.f32.mrf.mxu0 }
 0x285   :  { %v2824_v28 = vpop.f32.mrf.mxu1  ;;  %v2809_v1 = vpop.f32.mrf.mxu0 }
 0x286   :  { %v2810_v24 = vadd.f32 %v2809_v1, %v2808_v33  ;;  %v2825_v19 = vadd.f32 %v2824_v28, %v2823_v37 }
 0x287   :  { %v2826_v22 = vpop.f32.mrf.mxu1 }
 0x289   :  { %v2827_v44 = vpop.f32.mrf.mxu1  ;;  %v2811_v26 = vpop.f32.mrf.mxu0 }
 0x28a   :  { %v2828_v4 = vadd.f32 %v2827_v44, %v2826_v22 }
 0x28b   :  { %v2851_v0 = vpop.f32.mrf.mxu1  ;;  %v2812_v59 = vpop.f32.mrf.mxu0 }
 0x28c   :  { %v2611_v10 = vadd.f32 %v2851_v0, %v2810_v24  ;;  %v2813_v62 = vadd.f32 %v2812_v59, %v2811_v26 }
 0x28d   :  { %v2605_v54 = vpop.f32.mrf.mxu1  ;;  %v2814_v42 = vpop.f32.mrf.mxu0 }
 0x28e   :  { %2645 = vst [vmem:[#allocation6 + $0x8] sm:$0xff] %v2611_v10  ;;  %v2606_v5 = vadd.f32 %v2807_v40, %v2605_v54 }
 0x28f   :  { %v2854_v52 = vpop.f32.mrf.mxu1  ;;  %v2815_v41 = vpop.f32.mrf.mxu0 }
 0x290   :  { %2644 = vst [vmem:[#allocation6] sm:$0xff] %v2606_v5  ;;  %v2816_v20 = vadd.f32 %v2815_v41, %v2814_v42 }
 0x291   :  { %v2615_v61 = vpop.f32.mrf.mxu1 }
 0x292   :  { %v2616_v23 = vadd.f32 %v2813_v62, %v2615_v61  ;;  %v2621_v58 = vadd.f32 %v2854_v52, %v2816_v20 }
 0x293   :  { %v2857_v53 = vpop.f32.mrf.mxu1 }
 0x294   :  { %2646 = vst [vmem:[#allocation6 + $0x10] sm:$0xff] %v2616_v23  ;;  %2647 = vst [vmem:[#allocation6 + $0x18] sm:$0xff] %v2621_v58 }
 0x295   :  { %v2625_v7 = vpop.f32.mrf.mxu1 }
 0x297   :  { %v2860_v15 = vpop.f32.mrf.mxu1 }
 0x298   :  { %v2641_v6 = vadd.f32 %v2860_v15, %v2828_v4 }
 0x299   :  { %v2635_v57 = vpop.f32.mrf.mxu1 }
 0x29a   :  { %2651 = vst [vmem:[#allocation6 + $0x38] sm:$0xff] %v2641_v6  ;;  %v2636_v8 = vadd.f32 %v2825_v19, %v2635_v57 }
 0x29c   :  { %2650 = vst [vmem:[#allocation6 + $0x30] sm:$0xff] %v2636_v8 }
 0x2a5   :  { %v2817_v27 = vpop.f32.mrf.mxu0 }
 0x2a7   :  { %v2818_v35 = vpop.f32.mrf.mxu0 }
 0x2a8   :  { %v2819_v43 = vadd.f32 %v2818_v35, %v2817_v27 }
 0x2aa   :  { %v2626_v30 = vadd.f32 %v2819_v43, %v2625_v7 }
 0x2ac   :  { %2648 = vst [vmem:[#allocation6 + $0x20] sm:$0xff] %v2626_v30 }
 0x2d2   :  { %v2820_v12 = vpop.f32.mrf.mxu0 }
 0x2d4   :  { %v2821_v49 = vpop.f32.mrf.mxu0 }
 0x2d5   :  { %v2822_v46 = vadd.f32 %v2821_v49, %v2820_v12 }
 0x2d7   :  { %v2631_v11 = vadd.f32 %v2857_v53, %v2822_v46 }
 0x2d9   :  { %2649 = vst [vmem:[#allocation6 + $0x28] sm:$0xff] %v2631_v11 }
 0x2da   :  { %2972 = shalt.err (!%p2969_p9)
}
 0x2db   :  { %2663 = dma.vmem_to_hbm [thread:$0]  %s2658_s24, 1024, %s5585_s5, [#allocation5], %s2986_s21, %s2986_s21, %s2987_s22  }
 0x2dc   :  { %2983 = dma.done.wait [#allocation5], 1024  }
 0x2dd   :  { %2984 = vsyncadd [#allocation5], 4294966272 }
 0x2de   :  { %2667 = vsyncpa [#allocation4], 1 }
 0x2df   :  { %2668 = vsyncpa [#allocation5], 1 }

</bundles_post_ra>
